<compile_context>
chip_gen: v5e
topology: v5e:2x2
jax: 0.10.0
libtpu: 0.0.40
codegen_flags: <defaults>
</compile_context>

<pallas_src>
import jax
import jax.numpy as jnp
from jax.experimental import pallas as pl
from jax.experimental.pallas import tpu as pltpu


# ----------------------------- synthetic config -----------------------------
class CFG:
    image_size = (32, 48)   # stand-in for [480, 720]
    patch_size = 16         # vae spatial down (8) * transformer patch (2)
    vae_down = 8
    lc = 4                  # latent channels   (16 in CogVideoX-5b)
    D = 32                  # transformer inner dim (3072 in 5b)  -> feat_dim
    H = 2                   # attention heads   (48 in 5b)
    hd = 16                 # head dim          (64 in 5b)
    Td = 16                 # time_embed_dim    (512 in 5b)
    L = 4                   # transformer blocks (last layer collected, layer=-1)
    n_txt = 8               # text sequence length (226 in 5b)
    text_dim = 48           # text encoder dim  (4096 T5 in 5b)
    tp = 2                  # transformer patch size
    scaling_factor = 0.7
    invert_scale_latents = True   # 5b-I2V config -> latents / scaling_factor
    num_frames = 1


# ----------------------------- tiling helper -----------------------------
def _pick_tile(dim, pref, align):
    """Largest tile <= pref that divides dim and is a multiple of align, else full dim."""
    if dim <= pref:
        return dim
    t = (pref // align) * align
    while t >= align:
        if dim % t == 0:
            return t
        t -= align
    return dim


# ----------------------------- generic Pallas kernels -----------------------------
def linear_pallas(x, w, b, activation="none", tm=512, tn=512, tk=512):
    """Tiled (M,K)@(K,N)+b.  bf16 MXU operands, f32 accumulation, optional activation."""
    M, K = x.shape
    N = w.shape[1]
    tm = _pick_tile(M, tm, 8)
    tn = _pick_tile(N, tn, 128)
    tk = _pick_tile(K, tk, 128)
    gm, gn, gk = M // tm, N // tn, K // tk

    def kernel(x_ref, w_ref, b_ref, o_ref, acc_ref):
        @pl.when(pl.program_id(2) == 0)
        def _():
            acc_ref[...] = jnp.zeros_like(acc_ref)

        acc_ref[...] += jnp.dot(x_ref[...], w_ref[...],
                                preferred_element_type=jnp.float32)

        @pl.when(pl.program_id(2) == gk - 1)
        def _():
            y = acc_ref[...] + b_ref[...]
            if activation == "silu":
                y = y * jax.nn.sigmoid(y)
            elif activation == "gelu_tanh":
                y = jax.nn.gelu(y, approximate=True)
            o_ref[...] = y.astype(o_ref.dtype)

    return pl.pallas_call(
        kernel,
        grid=(gm, gn, gk),
        in_specs=[pl.BlockSpec((tm, tk), lambda i, j, k: (i, k)),
                  pl.BlockSpec((tk, tn), lambda i, j, k: (k, j)),
                  pl.BlockSpec((1, tn), lambda i, j, k: (0, j))],
        out_specs=pl.BlockSpec((tm, tn), lambda i, j, k: (i, j)),
        out_shape=jax.ShapeDtypeStruct((M, N), jnp.float32),
        scratch_shapes=[pltpu.VMEM((tm, tn), jnp.float32)],
        compiler_params=pltpu.CompilerParams(
            dimension_semantics=("parallel", "parallel", "arbitrary")),
    )(x.astype(jnp.bfloat16), w.astype(jnp.bfloat16),
      b.reshape(1, N).astype(jnp.float32))


def layernorm_pallas(x, w, b, eps, tm=512):
    """Row-tiled LayerNorm over last dim with affine params."""
    M, D = x.shape
    tm = _pick_tile(M, tm, 8)

    def kernel(x_ref, w_ref, b_ref, o_ref):
        xv = x_ref[...]
        mu = jnp.mean(xv, axis=-1, keepdims=True)
        var = jnp.mean(jnp.square(xv - mu), axis=-1, keepdims=True)
        o_ref[...] = ((xv - mu) * jax.lax.rsqrt(var + eps) * w_ref[...]
                      + b_ref[...]).astype(o_ref.dtype)

    return pl.pallas_call(
        kernel,
        grid=(M // tm,),
        in_specs=[pl.BlockSpec((tm, D), lambda i: (i, 0)),
                  pl.BlockSpec((1, D), lambda i: (0, 0)),
                  pl.BlockSpec((1, D), lambda i: (0, 0))],
        out_specs=pl.BlockSpec((tm, D), lambda i: (i, 0)),
        out_shape=jax.ShapeDtypeStruct((M, D), jnp.float32),
        compiler_params=pltpu.CompilerParams(dimension_semantics=("parallel",)),
    )(x.astype(jnp.float32), w.reshape(1, D).astype(jnp.float32),
      b.reshape(1, D).astype(jnp.float32))


def interp_matrix(out_size, in_size):
    """PyTorch bilinear (align_corners=False) interpolation as a dense matrix."""
    scale = in_size / out_size
    o = jnp.arange(out_size, dtype=jnp.float32)
    x = jnp.maximum((o + 0.5) * scale - 0.5, 0.0)
    x0 = jnp.floor(x)
    w1 = x - x0
    x0 = jnp.minimum(x0.astype(jnp.int32), in_size - 1)
    x1 = jnp.minimum(x0 + 1, in_size - 1)
    A = ((1.0 - w1)[:, None] * jax.nn.one_hot(x0, in_size, dtype=jnp.float32)
         + w1[:, None] * jax.nn.one_hot(x1, in_size, dtype=jnp.float32))
    return A                                # (out, in)


def resize_bilinear_pallas(images, Hout, Wout):
    """F.interpolate(bilinear, align_corners=False) as fused Ah @ img @ AwT per (b,c)."""
    B, C, Hin, Win = images.shape
    Ah = interp_matrix(Hout, Hin)           # (Hout, Hin)
    AwT = interp_matrix(Wout, Win).T        # (Win, Wout)
    x = images.astype(jnp.float32).reshape(B * C, Hin, Win)

    def kernel(x_ref, ah_ref, awt_ref, o_ref):
        tmp = jnp.dot(ah_ref[...], x_ref[0], preferred_element_type=jnp.float32)
        o_ref[0] = jnp.dot(tmp, awt_ref[...], preferred_element_type=jnp.float32)

    out = pl.pallas_call(
        kernel,
        grid=(B * C,),
        in_specs=[pl.BlockSpec((1, Hin, Win), lambda i: (i, 0, 0)),
                  pl.BlockSpec((Hout, Hin), lambda i: (0, 0)),
                  pl.BlockSpec((Win, Wout), lambda i: (0, 0))],
        out_specs=pl.BlockSpec((1, Hout, Wout), lambda i: (i, 0, 0)),
        out_shape=jax.ShapeDtypeStruct((B * C, Hout, Wout), jnp.float32),
        compiler_params=pltpu.CompilerParams(dimension_semantics=("parallel",)),
    )(x, Ah, AwT)
    return out.reshape(B, C, Hout, Wout)


# ----------------------------- CogVideoX transformer block kernel -----------------------------
def make_block_kernel(cfg, Nt, N):
    D, H, hd = cfg.D, cfg.H, cfg.hd
    half = hd // 2
    scale_q = hd ** -0.5

    def _ln(x, w, b, eps):
        mu = jnp.mean(x, axis=-1, keepdims=True)
        var = jnp.mean(jnp.square(x - mu), axis=-1, keepdims=True)
        return (x - mu) * jax.lax.rsqrt(var + eps) * w + b

    def kernel(x0, ada1, ada2, cosf, sinf,
               n1gw, n1gb, wq, bq, wk, bk, wv, bv,
               nqw, nqb, nkw, nkb, wo, bo,
               n2gw, n2gb, fw1, fb1, fw2, fb2,
               x_out):
        l = pl.program_id(1)

        # carried [text ; image] token state lives in the VMEM-resident output block
        @pl.when(l == 0)
        def _():
            x_out[...] = x0[...]

        x = x_out[0]                                        # (N, D)
        is_txt = jax.lax.broadcasted_iota(jnp.int32, (N, 1), 0) < Nt

        def mod(a):                                         # (6,D) -> row-selected shift/scale/gate
            shift = jnp.where(is_txt, a[3:4, :], a[0:1, :])
            scale = jnp.where(is_txt, a[4:5, :], a[1:2, :])
            gate = jnp.where(is_txt, a[5:6, :], a[2:3, :])
            return shift, scale, gate

        cos = cosf[...]                                     # (N, hd); text rows: cos=1, sin=0
        sin = sinf[...]                                     # sign already folded for rot_half

        def rope(t):                                        # halves-layout RoPE on (H, N, hd)
            tr = jnp.concatenate([t[..., half:], t[..., :half]], axis=-1)
            return t * cos + tr * sin

        # ---------------- norm1 + attention ----------------
        shift1, scale1, gate1 = mod(ada1[0, 0])
        xn = _ln(x, n1gw[0], n1gb[0], 1e-5) * (1.0 + scale1) + shift1
        xb = xn.astype(jnp.bfloat16)
        q = jnp.dot(xb, wq[0], preferred_element_type=jnp.float32) + bq[0]
        k = jnp.dot(xb, wk[0], preferred_element_type=jnp.float32) + bk[0]
        v = jnp.dot(xb, wv[0], preferred_element_type=jnp.float32) + bv[0]

        # head-batched layout (H, N, hd); the per-head slicing is layout plumbing only
        q3 = jnp.stack([q[:, h * hd:(h + 1) * hd] for h in range(H)], axis=0)
        k3 = jnp.stack([k[:, h * hd:(h + 1) * hd] for h in range(H)], axis=0)
        v3 = jnp.stack([v[:, h * hd:(h + 1) * hd] for h in range(H)], axis=0)

        q3 = rope(_ln(q3, nqw[0], nqb[0], 1e-6)) * scale_q  # qk-LN, RoPE, fold 1/sqrt(hd) into q
        k3 = rope(_ln(k3, nkw[0], nkb[0], 1e-6))

        sc = jax.lax.dot_general(                           # (H, N, N) scores, batched over heads
            q3.astype(jnp.bfloat16), k3.astype(jnp.bfloat16),
            (((2,), (2,)), ((0,), (0,))), preferred_element_type=jnp.float32)
        p = jnp.exp(sc - jnp.max(sc, axis=-1, keepdims=True))
        p = p * pl.reciprocal(jnp.sum(p, axis=-1, keepdims=True), approx=True)
        o = jax.lax.dot_general(                            # (H, N, hd)
            p.astype(jnp.bfloat16), v3.astype(jnp.bfloat16),
            (((2,), (1,)), ((0,), (0,))), preferred_element_type=jnp.float32)

        # output projection accumulated per head (avoids a (H,N,hd)->(N,H*hd) relayout)
        attn = jnp.dot(o[0].astype(jnp.bfloat16), wo[0, 0:hd, :],
                       preferred_element_type=jnp.float32)
        for h in range(1, H):
            attn = attn + jnp.dot(o[h].astype(jnp.bfloat16),
                                  wo[0, h * hd:(h + 1) * hd, :],
                                  preferred_element_type=jnp.float32)
        attn = attn + bo[0]
        x = x + gate1 * attn

        # ---------------- norm2 + feed-forward ----------------
        shift2, scale2, gate2 = mod(ada2[0, 0])
        xn = _ln(x, n2gw[0], n2gb[0], 1e-5) * (1.0 + scale2) + shift2
        y = jnp.dot(xn.astype(jnp.bfloat16), fw1[0],
                    preferred_element_type=jnp.float32) + fb1[0]
        y = jax.nn.gelu(y, approximate=True)                # gelu-approximate (tanh), f32
        y = jnp.dot(y.astype(jnp.bfloat16), fw2[0],
                    preferred_element_type=jnp.float32) + fb2[0]
        x = x + gate2 * y

        x_out[0] = x

    return kernel


def run_blocks(x0, ada1, ada2, cosf, sinf, layers, cfg, Nt):
    B, N, D = x0.shape
    L = layers[0].shape[0]
    kernel = make_block_kernel(cfg, Nt, N)

    shared_specs = [
        pl.BlockSpec((1, N, D), lambda b, l: (b, 0, 0)),
        pl.BlockSpec((1, 1, 6, D), lambda b, l: (b, l, 0, 0)),
        pl.BlockSpec((1, 1, 6, D), lambda b, l: (b, l, 0, 0)),
        pl.BlockSpec(cosf.shape, lambda b, l: (0, 0)),
        pl.BlockSpec(sinf.shape, lambda b, l: (0, 0)),
    ]
    w_specs = [pl.BlockSpec((1,) + tuple(w.shape[1:]), lambda b, l: (l, 0, 0))
               for w in layers]
    out_spec = pl.BlockSpec((1, N, D), lambda b, l: (b, 0, 0))

    return pl.pallas_call(
        kernel,
        grid=(B, L),                   # batch parallel (v7x dual TC), layers sequential carry
        in_specs=shared_specs + w_specs,
        out_specs=out_spec,
        out_shape=jax.ShapeDtypeStruct((B, N, D), jnp.float32),
        compiler_params=pltpu.CompilerParams(
            dimension_semantics=("parallel", "arbitrary")),
    )(x0, ada1, ada2, cosf, sinf, *layers)


# ----------------------------- glue (plain JAX) -----------------------------
def timestep_embedding(t, dim):
    """diffusers get_timestep_embedding, flip_sin_to_cos=True, freq_shift=0."""
    half = dim // 2
    freqs = jnp.exp(-jnp.log(10000.0) * jnp.arange(half, dtype=jnp.float32) / half)
    args = t[:, None].astype(jnp.float32) * freqs[None]
    return jnp.concatenate([jnp.cos(args), jnp.sin(args)], axis=-1)


def rope_3d_freqs(head_dim, t_len, h_len, w_len, theta=10000.0):
    # TODO(synk): simplified get_3d_rotary_pos_embed — no crop-region rescaling of the grid.
    dim_t, dim_h, dim_w = head_dim // 4, head_dim // 8 * 3, head_dim // 8 * 3

    def freqs_1d(dim, pos):
        inv = 1.0 / (theta ** (jnp.arange(0, dim, 2, dtype=jnp.float32) / dim))
        return jnp.outer(pos.astype(jnp.float32), inv)

    ft = freqs_1d(dim_t, jnp.arange(t_len))
    fh = freqs_1d(dim_h, jnp.arange(h_len))
    fw = freqs_1d(dim_w, jnp.arange(w_len))
    ft = jnp.broadcast_to(ft[:, None, None, :], (t_len, h_len, w_len, dim_t // 2))
    fh = jnp.broadcast_to(fh[None, :, None, :], (t_len, h_len, w_len, dim_h // 2))
    fw = jnp.broadcast_to(fw[None, None, :, :], (t_len, h_len, w_len, dim_w // 2))
    return jnp.concatenate([ft, fh, fw], axis=-1).reshape(t_len * h_len * w_len,
                                                          head_dim // 2)


def rope_tables(cfg, t_len, h_len, w_len, Nt):
    """cos/sin tables in 'halves' layout, with identity rows for the text tokens."""
    freqs = rope_3d_freqs(cfg.hd, t_len, h_len, w_len)          # (Ni, hd//2)
    cos_h, sin_h = jnp.cos(freqs), jnp.sin(freqs)
    cos_img = jnp.concatenate([cos_h, cos_h], axis=-1)
    sin_img = jnp.concatenate([-sin_h, sin_h], axis=-1)          # sign folded for rot_half
    cos_full = jnp.concatenate([jnp.ones((Nt, cfg.hd), jnp.float32), cos_img], axis=0)
    sin_full = jnp.concatenate([jnp.zeros((Nt, cfg.hd), jnp.float32), sin_img], axis=0)
    return cos_full, sin_full


def init_params(key, cfg):
    keys = iter(jax.random.split(key, 64))

    def nrm(shape, std=0.05):
        return std * jax.random.normal(next(keys), shape, jnp.float32)

    C = 3
    p = {}
    # VAE patchify-conv stand-in; latent scaling (1/scaling_factor for the I2V config)
    # is folded into the weights so no extra VPU pass is needed at runtime.
    # TODO(synk): full CogVideoX 3D-causal VAE encoder replaced by a strided conv stand-in.
    lat_scale = (1.0 / cfg.scaling_factor) if cfg.invert_scale_latents else cfg.scaling_factor
    p["vae_w"] = nrm((C * cfg.vae_down * cfg.vae_down, 2 * cfg.lc)) * lat_scale
    p["vae_b"] = jnp.zeros((2 * cfg.lc,), jnp.float32)
    # TODO(synk): T5 text encoder not reimplemented — synthetic deterministic prompt embeddings.
    p["prompt_embeds"] = nrm((1, cfg.n_txt, cfg.text_dim), std=1.0)
    p["tp_w"] = nrm((cfg.text_dim, cfg.D))
    p["tp_b"] = jnp.zeros((cfg.D,), jnp.float32)
    p["pe_w"] = nrm((cfg.lc * cfg.tp * cfg.tp, cfg.D))
    p["pe_b"] = jnp.zeros((cfg.D,), jnp.float32)
    p["te_w1"] = nrm((cfg.D, cfg.Td))
    p["te_b1"] = jnp.zeros((cfg.Td,), jnp.float32)
    p["te_w2"] = nrm((cfg.Td, cfg.Td))
    p["te_b2"] = jnp.zeros((cfg.Td,), jnp.float32)
    p["nf_w"] = jnp.ones((cfg.D,), jnp.float32)
    p["nf_b"] = jnp.zeros((cfg.D,), jnp.float32)

    L, D, Td, hd, H = cfg.L, cfg.D, cfg.Td, cfg.hd, cfg.H

    def stack(shape, std=0.05):
        return nrm((L,) + shape, std)

    # adaLN (CogVideoXLayerNormZero) linears for every layer, packed so a single
    # (B,Td)@(Td,L*6*D) matmul precomputes all modulation vectors.
    ada1_w = stack((Td, 6 * D))
    ada2_w = stack((Td, 6 * D))
    p["ada1_w"] = ada1_w.transpose(1, 0, 2).reshape(Td, L * 6 * D)
    p["ada1_b"] = jnp.zeros((L * 6 * D,), jnp.float32)
    p["ada2_w"] = ada2_w.transpose(1, 0, 2).reshape(Td, L * 6 * D)
    p["ada2_b"] = jnp.zeros((L * 6 * D,), jnp.float32)

    wq, wk, wv, wo = stack((D, D)), stack((D, D)), stack((D, D)), stack((D, D))
    bq = jnp.zeros((L, 1, D), jnp.float32)
    bk = jnp.zeros((L, 1, D), jnp.float32)
    bv = jnp.zeros((L, 1, D), jnp.float32)
    bo = jnp.zeros((L, 1, D), jnp.float32)
    nqw = jnp.ones((L, 1, hd), jnp.float32)
    nqb = jnp.zeros((L, 1, hd), jnp.float32)
    nkw = jnp.ones((L, 1, hd), jnp.float32)
    nkb = jnp.zeros((L, 1, hd), jnp.float32)
    n1gw = jnp.ones((L, 1, D), jnp.float32)
    n1gb = jnp.zeros((L, 1, D), jnp.float32)
    n2gw = jnp.ones((L, 1, D), jnp.float32)
    n2gb = jnp.zeros((L, 1, D), jnp.float32)
    fw1 = stack((D, 4 * D))
    fb1 = jnp.zeros((L, 1, 4 * D), jnp.float32)
    fw2 = stack((4 * D, D))
    fb2 = jnp.zeros((L, 1, D), jnp.float32)

    # Permute q/k head features from interleaved-pair order to halves order so RoPE is
    # a half-rotation (x*cos + rot_half(x)*sin) with no per-pair shuffle or matmul.
    # Attention scores are invariant to a common permutation of q/k features (and the
    # qk-LN affine params are permuted identically), so semantics are unchanged.
    perm_h = jnp.concatenate([jnp.arange(0, hd, 2), jnp.arange(1, hd, 2)])
    perm = jnp.concatenate([perm_h + h * hd for h in range(H)])
    wq, bq = wq[:, :, perm], bq[:, :, perm]
    wk, bk = wk[:, :, perm], bk[:, :, perm]
    nqw, nqb = nqw[:, :, perm_h], nqb[:, :, perm_h]
    nkw, nkb = nkw[:, :, perm_h], nkb[:, :, perm_h]

    bf = lambda a: a.astype(jnp.bfloat16)   # MXU operands streamed per layer in bf16
    p["layers"] = [
        n1gw, n1gb,
        bf(wq), bq, bf(wk), bk, bf(wv), bv,
        nqw, nqb, nkw, nkb,
        bf(wo), bo,
        n2gw, n2gb,
        bf(fw1), fb1, bf(fw2), fb2,
    ]
    return p


# ----------------------------- forward -----------------------------
def cogvideox_forward(params, images, cfg):
    B, C, Hin, Win = images.shape
    Hout, Wout = cfg.image_size
    h_tok, w_tok = Hout // cfg.patch_size, Wout // cfg.patch_size

    # preprocess_image: bilinear resize (align_corners=False), fused per-(b,c) kernel
    x = resize_bilinear_pallas(images, Hout, Wout)          # (B, C, Hout, Wout)
    images5 = x[:, :, None]                                 # add time dim (num_frames == 1)
    T = images5.shape[2]

    # VAE encode (stand-in): strided patchify-conv as a tiled matmul; mode() = mean half
    d = cfg.vae_down
    h8, w8 = Hout // d, Wout // d
    patches = (images5.reshape(B, C, T, h8, d, w8, d)
               .transpose(0, 2, 3, 5, 1, 4, 6).reshape(B * T * h8 * w8, C * d * d))
    lat = linear_pallas(patches, params["vae_w"], params["vae_b"])
    lat = lat.reshape(B, T, h8, w8, 2 * cfg.lc)[..., :cfg.lc]   # mode(); scaling folded into W

    # patch_embed: text proj + per-frame 2x2 strided conv (im2col matmul); [text ; image]
    # NOTE: 5b uses rotary embeddings only -> no learned positional embedding is added.
    hp, wp = h8 // cfg.tp, w8 // cfg.tp
    ip = (lat.reshape(B, T, hp, cfg.tp, wp, cfg.tp, cfg.lc)
          .transpose(0, 1, 2, 4, 6, 3, 5).reshape(B * T * hp * wp, cfg.lc * cfg.tp * cfg.tp))
    img_tok = linear_pallas(ip, params["pe_w"], params["pe_b"]).reshape(B, T * hp * wp, cfg.D)
    prompt = jnp.broadcast_to(params["prompt_embeds"], (B, cfg.n_txt, cfg.text_dim))
    txt_tok = linear_pallas(prompt.reshape(B * cfg.n_txt, cfg.text_dim),
                            params["tp_w"], params["tp_b"]).reshape(B, cfg.n_txt, cfg.D)
    Ni = T * hp * wp
    tokens = jnp.concatenate([txt_tok, img_tok], axis=1)        # (B, Nt+Ni, D)

    # time embedding for timestep = 0; blocks consume SiLU(temb), so SiLU is fused into
    # the final time-embedding linear.
    t_emb = timestep_embedding(jnp.zeros((B,), jnp.float32), cfg.D)
    h1 = linear_pallas(t_emb, params["te_w1"], params["te_b1"], activation="silu")
    st = linear_pallas(h1, params["te_w2"], params["te_b2"], activation="silu")     # SiLU(temb)

    # precompute every layer's adaLN modulation vectors (2 x 6 chunks per layer)
    ada1 = linear_pallas(st, params["ada1_w"], params["ada1_b"]).reshape(B, cfg.L, 6, cfg.D)
    ada2 = linear_pallas(st, params["ada2_w"], params["ada2_b"]).reshape(B, cfg.L, 6, cfg.D)

    # 3D rotary tables (halves layout; text rows are identity)
    cosf, sinf = rope_tables(cfg, T, hp, wp, cfg.n_txt)

    # transformer blocks: single fused Pallas kernel, grid = (batch, layer)
    x_all = run_blocks(tokens, ada1, ada2, cosf, sinf, params["layers"], cfg, cfg.n_txt)
    hid = x_all[:, cfg.n_txt:]                                  # image tokens, last block

    # norm_final + tokens_to_output('dense', feat[:, :h*w], None, (h, w))
    feat = layernorm_pallas(hid.reshape(B * Ni, cfg.D), params["nf_w"], params["nf_b"], 1e-5)
    feat = feat.reshape(B, Ni, cfg.D)
    dense = feat[:, :h_tok * w_tok].reshape(B, h_tok, w_tok, cfg.D).transpose(0, 3, 1, 2)
    return dense.astype(jnp.float32)                            # (B, feat_dim, h, w)


# ----------------------------- main -----------------------------
if __name__ == "__main__":
    key = jax.random.PRNGKey(0)
    pkey, xkey = jax.random.split(key)
    params = init_params(pkey, CFG)
    x = jax.random.normal(xkey, (2, 3, 16, 16), jnp.float32)   # NCHW images

    fwd = jax.jit(lambda imgs: cogvideox_forward(params, imgs, CFG))
    out = jax.block_until_ready(fwd(x))

    expect = (2, CFG.D, CFG.image_size[0] // CFG.patch_size, CFG.image_size[1] // CFG.patch_size)
    assert out.shape == expect, (out.shape, expect)
    assert out.dtype == jnp.float32
    assert bool(jnp.all(jnp.isfinite(out)))
    print("KERNEL_OK")
</pallas_src>

<mosaic_0001>
module attributes {stable_mosaic.version = 11 : i64} {
  func.func @kernel(%arg0: i32, %arg1: memref<1x16x16xf32, #tpu.memory_space<vmem>>, %arg2: memref<32x16xf32, #tpu.memory_space<vmem>>, %arg3: memref<16x48xf32, #tpu.memory_space<vmem>>, %arg4: memref<1x32x48xf32, #tpu.memory_space<vmem>>) attributes {dimension_semantics = [#tpu.dimension_semantics<parallel>], iteration_bounds = array<i64: 6>, scalar_prefetch = 0 : i64, scratch_operands = 0 : i64, tpu.core_type = #tpu.core_type<tc>, window_params = [{transform_indices = @transform_0, window_bounds = array<i64: 1, 16, 16>}, {pipeline_mode = #tpu.pipeline_mode<synchronous>, transform_indices = @transform_1, window_bounds = array<i64: 32, 16>}, {pipeline_mode = #tpu.pipeline_mode<synchronous>, transform_indices = @transform_2, window_bounds = array<i64: 16, 48>}, {transform_indices = @transform_3, window_bounds = array<i64: 1, 32, 48>}]} {
    %c0 = arith.constant 0 : index
    %c0_0 = arith.constant 0 : index
    %0 = vector.load %arg2[%c0, %c0_0] : memref<32x16xf32, #tpu.memory_space<vmem>>, vector<32x16xf32>
    %c0_1 = arith.constant 0 : index
    %c0_2 = arith.constant 0 : index
    %c0_3 = arith.constant 0 : index
    %1 = vector.load %arg1[%c0_1, %c0_2, %c0_3] : memref<1x16x16xf32, #tpu.memory_space<vmem>>, vector<1x16x16xf32>
    %2 = vector.shape_cast %1 : vector<1x16x16xf32> to vector<16x16xf32>
    %cst = arith.constant dense<0.000000e+00> : vector<32x16xf32>
    %3 = tpu.matmul %0, %2, %cst {dimension_numbers = #tpu.dot_dimension_numbers<[1], [0], [0], [1], [0, 0, 1, 1], [], []>} : vector<32x16xf32>, vector<16x16xf32>, vector<32x16xf32> -> vector<32x16xf32>
    %c0_4 = arith.constant 0 : index
    %c0_5 = arith.constant 0 : index
    %4 = vector.load %arg3[%c0_4, %c0_5] : memref<16x48xf32, #tpu.memory_space<vmem>>, vector<16x48xf32>
    %cst_6 = arith.constant dense<0.000000e+00> : vector<32x48xf32>
    %5 = tpu.matmul %3, %4, %cst_6 {dimension_numbers = #tpu.dot_dimension_numbers<[1], [0], [0], [1], [0, 0, 1, 1], [], []>} : vector<32x16xf32>, vector<16x48xf32>, vector<32x48xf32> -> vector<32x48xf32>
    %c0_7 = arith.constant 0 : index
    %c0_8 = arith.constant 0 : index
    %c0_9 = arith.constant 0 : index
    %6 = vector.load %arg4[%c0_7, %c0_8, %c0_9] : memref<1x32x48xf32, #tpu.memory_space<vmem>>, vector<1x32x48xf32>
    %7 = vector.shape_cast %6 : vector<1x32x48xf32> to vector<32x48xf32>
    %8 = vector.shape_cast %5 : vector<32x48xf32> to vector<1x32x48xf32>
    tpu.vector_store %arg4[%c0_7, %c0_8, %c0_9], %8 {strides = array<i32>} : memref<1x32x48xf32, #tpu.memory_space<vmem>>, vector<1x32x48xf32>,
    return
  }
  func.func @transform_0(%arg0: i32) -> (i32, i32, i32) {
    %c0_i32 = arith.constant 0 : i32
    %c0_i32_0 = arith.constant 0 : i32
    %c0_i32_1 = arith.constant 0 : i32
    return %arg0, %c0_i32, %c0_i32_0 : i32, i32, i32
  }
  func.func @transform_1(%arg0: i32) -> (i32, i32) {
    %c0_i32 = arith.constant 0 : i32
    %c0_i32_0 = arith.constant 0 : i32
    %c0_i32_1 = arith.constant 0 : i32
    return %c0_i32, %c0_i32_0 : i32, i32
  }
  func.func @transform_2(%arg0: i32) -> (i32, i32) {
    %c0_i32 = arith.constant 0 : i32
    %c0_i32_0 = arith.constant 0 : i32
    %c0_i32_1 = arith.constant 0 : i32
    return %c0_i32, %c0_i32_0 : i32, i32
  }
  func.func @transform_3(%arg0: i32) -> (i32, i32, i32) {
    %c0_i32 = arith.constant 0 : i32
    %c0_i32_0 = arith.constant 0 : i32
    %c0_i32_1 = arith.constant 0 : i32
    return %arg0, %c0_i32, %c0_i32_0 : i32, i32, i32
  }
}

module attributes {stable_mosaic.version = 11 : i64} {
  func.func @kernel(%arg0: i32, %arg1: i32, %arg2: i32, %arg3: memref<48x192xbf16, #tpu.memory_space<vmem>>, %arg4: memref<192x8xbf16, #tpu.memory_space<vmem>>, %arg5: memref<1x8xf32, #tpu.memory_space<vmem>>, %arg6: memref<48x8xf32, #tpu.memory_space<vmem>>, %arg7: memref<48x8xf32, #tpu.memory_space<vmem>>) attributes {dimension_semantics = [#tpu.dimension_semantics<parallel>, #tpu.dimension_semantics<parallel>, #tpu.dimension_semantics<arbitrary>], iteration_bounds = array<i64: 1, 1, 1>, scalar_prefetch = 0 : i64, scratch_operands = 1 : i64, tpu.core_type = #tpu.core_type<tc>, window_params = [{transform_indices = @transform_0, window_bounds = array<i64: 48, 192>}, {transform_indices = @transform_1, window_bounds = array<i64: 192, 8>}, {transform_indices = @transform_2, window_bounds = array<i64: 1, 8>}, {transform_indices = @transform_3, window_bounds = array<i64: 48, 8>}]} {
    %c0_i32 = arith.constant 0 : i32
    %0 = arith.cmpi eq, %arg2, %c0_i32 : i32
    %1 = arith.extui %0 : i1 to i32
    %c0_i32_0 = arith.constant 0 : i32
    %2 = arith.cmpi ne, %1, %c0_i32_0 : i32
    scf.if %2 {
      %cst_10 = arith.constant 0.000000e+00 : f32
      %12 = vector.broadcast %cst_10 : f32 to vector<48x8xf32>
      %c0_11 = arith.constant 0 : index
      %c0_12 = arith.constant 0 : index
      %13 = vector.load %arg7[%c0_11, %c0_12] : memref<48x8xf32, #tpu.memory_space<vmem>>, vector<48x8xf32>
      tpu.vector_store %arg7[%c0_11, %c0_12], %12 {strides = array<i32>} : memref<48x8xf32, #tpu.memory_space<vmem>>, vector<48x8xf32>,
    } else {
    }
    %c0 = arith.constant 0 : index
    %c0_1 = arith.constant 0 : index
    %3 = vector.load %arg7[%c0, %c0_1] : memref<48x8xf32, #tpu.memory_space<vmem>>, vector<48x8xf32>
    %c0_2 = arith.constant 0 : index
    %c0_3 = arith.constant 0 : index
    %4 = vector.load %arg3[%c0_2, %c0_3] : memref<48x192xbf16, #tpu.memory_space<vmem>>, vector<48x192xbf16>
    %c0_4 = arith.constant 0 : index
    %c0_5 = arith.constant 0 : index
    %5 = vector.load %arg4[%c0_4, %c0_5] : memref<192x8xbf16, #tpu.memory_space<vmem>>, vector<192x8xbf16>
    %cst = arith.constant dense<0.000000e+00> : vector<48x8xf32>
    %6 = tpu.matmul %4, %5, %cst {dimension_numbers = #tpu.dot_dimension_numbers<[1], [0], [0], [1], [0, 0, 1, 1], [], []>} : vector<48x192xbf16>, vector<192x8xbf16>, vector<48x8xf32> -> vector<48x8xf32>
    %7 = arith.addf %3, %6 : vector<48x8xf32>
    %c0_6 = arith.constant 0 : index
    %c0_7 = arith.constant 0 : index
    %8 = vector.load %arg7[%c0_6, %c0_7] : memref<48x8xf32, #tpu.memory_space<vmem>>, vector<48x8xf32>
    tpu.vector_store %arg7[%c0_6, %c0_7], %7 {strides = array<i32>} : memref<48x8xf32, #tpu.memory_space<vmem>>, vector<48x8xf32>,
    %c0_i32_8 = arith.constant 0 : i32
    %9 = arith.cmpi eq, %arg2, %c0_i32_8 : i32
    %10 = arith.extui %9 : i1 to i32
    %c0_i32_9 = arith.constant 0 : i32
    %11 = arith.cmpi ne, %10, %c0_i32_9 : i32
    scf.if %11 {
      %c0_10 = arith.constant 0 : index
      %c0_11 = arith.constant 0 : index
      %12 = vector.load %arg7[%c0_10, %c0_11] : memref<48x8xf32, #tpu.memory_space<vmem>>, vector<48x8xf32>
      %c0_12 = arith.constant 0 : index
      %c0_13 = arith.constant 0 : index
      %13 = vector.load %arg5[%c0_12, %c0_13] : memref<1x8xf32, #tpu.memory_space<vmem>>, vector<1x8xf32>
      %14 = vector.broadcast %13 : vector<1x8xf32> to vector<48x8xf32>
      %15 = arith.addf %12, %14 : vector<48x8xf32>
      %c0_14 = arith.constant 0 : index
      %c0_15 = arith.constant 0 : index
      %16 = vector.load %arg6[%c0_14, %c0_15] : memref<48x8xf32, #tpu.memory_space<vmem>>, vector<48x8xf32>
      tpu.vector_store %arg6[%c0_14, %c0_15], %15 {strides = array<i32>} : memref<48x8xf32, #tpu.memory_space<vmem>>, vector<48x8xf32>,
    } else {
    }
    return
  }
  func.func @transform_0(%arg0: i32, %arg1: i32, %arg2: i32) -> (i32, i32) {
    %c0_i32 = arith.constant 0 : i32
    return %arg0, %arg2 : i32, i32
  }
  func.func @transform_1(%arg0: i32, %arg1: i32, %arg2: i32) -> (i32, i32) {
    %c0_i32 = arith.constant 0 : i32
    return %arg2, %arg1 : i32, i32
  }
  func.func @transform_2(%arg0: i32, %arg1: i32, %arg2: i32) -> (i32, i32) {
    %c0_i32 = arith.constant 0 : i32
    %c0_i32_0 = arith.constant 0 : i32
    return %c0_i32, %arg1 : i32, i32
  }
  func.func @transform_3(%arg0: i32, %arg1: i32, %arg2: i32) -> (i32, i32) {
    %c0_i32 = arith.constant 0 : i32
    return %arg0, %arg1 : i32, i32
  }
}

module attributes {stable_mosaic.version = 11 : i64} {
  func.func @kernel(%arg0: i32, %arg1: i32, %arg2: i32, %arg3: memref<16x48xbf16, #tpu.memory_space<vmem>>, %arg4: memref<48x32xbf16, #tpu.memory_space<vmem>>, %arg5: memref<1x32xf32, #tpu.memory_space<vmem>>, %arg6: memref<16x32xf32, #tpu.memory_space<vmem>>, %arg7: memref<16x32xf32, #tpu.memory_space<vmem>>) attributes {dimension_semantics = [#tpu.dimension_semantics<parallel>, #tpu.dimension_semantics<parallel>, #tpu.dimension_semantics<arbitrary>], iteration_bounds = array<i64: 1, 1, 1>, scalar_prefetch = 0 : i64, scratch_operands = 1 : i64, tpu.core_type = #tpu.core_type<tc>, window_params = [{transform_indices = @transform_0, window_bounds = array<i64: 16, 48>}, {transform_indices = @transform_1, window_bounds = array<i64: 48, 32>}, {transform_indices = @transform_2, window_bounds = array<i64: 1, 32>}, {transform_indices = @transform_3, window_bounds = array<i64: 16, 32>}]} {
    %c0_i32 = arith.constant 0 : i32
    %0 = arith.cmpi eq, %arg2, %c0_i32 : i32
    %1 = arith.extui %0 : i1 to i32
    %c0_i32_0 = arith.constant 0 : i32
    %2 = arith.cmpi ne, %1, %c0_i32_0 : i32
    scf.if %2 {
      %cst_10 = arith.constant 0.000000e+00 : f32
      %12 = vector.broadcast %cst_10 : f32 to vector<16x32xf32>
      %c0_11 = arith.constant 0 : index
      %c0_12 = arith.constant 0 : index
      %13 = vector.load %arg7[%c0_11, %c0_12] : memref<16x32xf32, #tpu.memory_space<vmem>>, vector<16x32xf32>
      tpu.vector_store %arg7[%c0_11, %c0_12], %12 {strides = array<i32>} : memref<16x32xf32, #tpu.memory_space<vmem>>, vector<16x32xf32>,
    } else {
    }
    %c0 = arith.constant 0 : index
    %c0_1 = arith.constant 0 : index
    %3 = vector.load %arg7[%c0, %c0_1] : memref<16x32xf32, #tpu.memory_space<vmem>>, vector<16x32xf32>
    %c0_2 = arith.constant 0 : index
    %c0_3 = arith.constant 0 : index
    %4 = vector.load %arg3[%c0_2, %c0_3] : memref<16x48xbf16, #tpu.memory_space<vmem>>, vector<16x48xbf16>
    %c0_4 = arith.constant 0 : index
    %c0_5 = arith.constant 0 : index
    %5 = vector.load %arg4[%c0_4, %c0_5] : memref<48x32xbf16, #tpu.memory_space<vmem>>, vector<48x32xbf16>
    %cst = arith.constant dense<0.000000e+00> : vector<16x32xf32>
    %6 = tpu.matmul %4, %5, %cst {dimension_numbers = #tpu.dot_dimension_numbers<[1], [0], [0], [1], [0, 0, 1, 1], [], []>} : vector<16x48xbf16>, vector<48x32xbf16>, vector<16x32xf32> -> vector<16x32xf32>
    %7 = arith.addf %3, %6 : vector<16x32xf32>
    %c0_6 = arith.constant 0 : index
    %c0_7 = arith.constant 0 : index
    %8 = vector.load %arg7[%c0_6, %c0_7] : memref<16x32xf32, #tpu.memory_space<vmem>>, vector<16x32xf32>
    tpu.vector_store %arg7[%c0_6, %c0_7], %7 {strides = array<i32>} : memref<16x32xf32, #tpu.memory_space<vmem>>, vector<16x32xf32>,
    %c0_i32_8 = arith.constant 0 : i32
    %9 = arith.cmpi eq, %arg2, %c0_i32_8 : i32
    %10 = arith.extui %9 : i1 to i32
    %c0_i32_9 = arith.constant 0 : i32
    %11 = arith.cmpi ne, %10, %c0_i32_9 : i32
    scf.if %11 {
      %c0_10 = arith.constant 0 : index
      %c0_11 = arith.constant 0 : index
      %12 = vector.load %arg7[%c0_10, %c0_11] : memref<16x32xf32, #tpu.memory_space<vmem>>, vector<16x32xf32>
      %c0_12 = arith.constant 0 : index
      %c0_13 = arith.constant 0 : index
      %13 = vector.load %arg5[%c0_12, %c0_13] : memref<1x32xf32, #tpu.memory_space<vmem>>, vector<1x32xf32>
      %14 = vector.broadcast %13 : vector<1x32xf32> to vector<16x32xf32>
      %15 = arith.addf %12, %14 : vector<16x32xf32>
      %c0_14 = arith.constant 0 : index
      %c0_15 = arith.constant 0 : index
      %16 = vector.load %arg6[%c0_14, %c0_15] : memref<16x32xf32, #tpu.memory_space<vmem>>, vector<16x32xf32>
      tpu.vector_store %arg6[%c0_14, %c0_15], %15 {strides = array<i32>} : memref<16x32xf32, #tpu.memory_space<vmem>>, vector<16x32xf32>,
    } else {
    }
    return
  }
  func.func @transform_0(%arg0: i32, %arg1: i32, %arg2: i32) -> (i32, i32) {
    %c0_i32 = arith.constant 0 : i32
    return %arg0, %arg2 : i32, i32
  }
  func.func @transform_1(%arg0: i32, %arg1: i32, %arg2: i32) -> (i32, i32) {
    %c0_i32 = arith.constant 0 : i32
    return %arg2, %arg1 : i32, i32
  }
  func.func @transform_2(%arg0: i32, %arg1: i32, %arg2: i32) -> (i32, i32) {
    %c0_i32 = arith.constant 0 : i32
    %c0_i32_0 = arith.constant 0 : i32
    return %c0_i32, %arg1 : i32, i32
  }
  func.func @transform_3(%arg0: i32, %arg1: i32, %arg2: i32) -> (i32, i32) {
    %c0_i32 = arith.constant 0 : i32
    return %arg0, %arg1 : i32, i32
  }
}

module attributes {stable_mosaic.version = 11 : i64} {
  func.func @kernel(%arg0: i32, %arg1: i32, %arg2: i32, %arg3: memref<12x16xbf16, #tpu.memory_space<vmem>>, %arg4: memref<16x32xbf16, #tpu.memory_space<vmem>>, %arg5: memref<1x32xf32, #tpu.memory_space<vmem>>, %arg6: memref<12x32xf32, #tpu.memory_space<vmem>>, %arg7: memref<12x32xf32, #tpu.memory_space<vmem>>) attributes {dimension_semantics = [#tpu.dimension_semantics<parallel>, #tpu.dimension_semantics<parallel>, #tpu.dimension_semantics<arbitrary>], iteration_bounds = array<i64: 1, 1, 1>, scalar_prefetch = 0 : i64, scratch_operands = 1 : i64, tpu.core_type = #tpu.core_type<tc>, window_params = [{transform_indices = @transform_0, window_bounds = array<i64: 12, 16>}, {transform_indices = @transform_1, window_bounds = array<i64: 16, 32>}, {transform_indices = @transform_2, window_bounds = array<i64: 1, 32>}, {transform_indices = @transform_3, window_bounds = array<i64: 12, 32>}]} {
    %c0_i32 = arith.constant 0 : i32
    %0 = arith.cmpi eq, %arg2, %c0_i32 : i32
    %1 = arith.extui %0 : i1 to i32
    %c0_i32_0 = arith.constant 0 : i32
    %2 = arith.cmpi ne, %1, %c0_i32_0 : i32
    scf.if %2 {
      %cst_10 = arith.constant 0.000000e+00 : f32
      %12 = vector.broadcast %cst_10 : f32 to vector<12x32xf32>
      %c0_11 = arith.constant 0 : index
      %c0_12 = arith.constant 0 : index
      %13 = vector.load %arg7[%c0_11, %c0_12] : memref<12x32xf32, #tpu.memory_space<vmem>>, vector<12x32xf32>
      tpu.vector_store %arg7[%c0_11, %c0_12], %12 {strides = array<i32>} : memref<12x32xf32, #tpu.memory_space<vmem>>, vector<12x32xf32>,
    } else {
    }
    %c0 = arith.constant 0 : index
    %c0_1 = arith.constant 0 : index
    %3 = vector.load %arg7[%c0, %c0_1] : memref<12x32xf32, #tpu.memory_space<vmem>>, vector<12x32xf32>
    %c0_2 = arith.constant 0 : index
    %c0_3 = arith.constant 0 : index
    %4 = vector.load %arg3[%c0_2, %c0_3] : memref<12x16xbf16, #tpu.memory_space<vmem>>, vector<12x16xbf16>
    %c0_4 = arith.constant 0 : index
    %c0_5 = arith.constant 0 : index
    %5 = vector.load %arg4[%c0_4, %c0_5] : memref<16x32xbf16, #tpu.memory_space<vmem>>, vector<16x32xbf16>
    %cst = arith.constant dense<0.000000e+00> : vector<12x32xf32>
    %6 = tpu.matmul %4, %5, %cst {dimension_numbers = #tpu.dot_dimension_numbers<[1], [0], [0], [1], [0, 0, 1, 1], [], []>} : vector<12x16xbf16>, vector<16x32xbf16>, vector<12x32xf32> -> vector<12x32xf32>
    %7 = arith.addf %3, %6 : vector<12x32xf32>
    %c0_6 = arith.constant 0 : index
    %c0_7 = arith.constant 0 : index
    %8 = vector.load %arg7[%c0_6, %c0_7] : memref<12x32xf32, #tpu.memory_space<vmem>>, vector<12x32xf32>
    tpu.vector_store %arg7[%c0_6, %c0_7], %7 {strides = array<i32>} : memref<12x32xf32, #tpu.memory_space<vmem>>, vector<12x32xf32>,
    %c0_i32_8 = arith.constant 0 : i32
    %9 = arith.cmpi eq, %arg2, %c0_i32_8 : i32
    %10 = arith.extui %9 : i1 to i32
    %c0_i32_9 = arith.constant 0 : i32
    %11 = arith.cmpi ne, %10, %c0_i32_9 : i32
    scf.if %11 {
      %c0_10 = arith.constant 0 : index
      %c0_11 = arith.constant 0 : index
      %12 = vector.load %arg7[%c0_10, %c0_11] : memref<12x32xf32, #tpu.memory_space<vmem>>, vector<12x32xf32>
      %c0_12 = arith.constant 0 : index
      %c0_13 = arith.constant 0 : index
      %13 = vector.load %arg5[%c0_12, %c0_13] : memref<1x32xf32, #tpu.memory_space<vmem>>, vector<1x32xf32>
      %14 = vector.broadcast %13 : vector<1x32xf32> to vector<12x32xf32>
      %15 = arith.addf %12, %14 : vector<12x32xf32>
      %c0_14 = arith.constant 0 : index
      %c0_15 = arith.constant 0 : index
      %16 = vector.load %arg6[%c0_14, %c0_15] : memref<12x32xf32, #tpu.memory_space<vmem>>, vector<12x32xf32>
      tpu.vector_store %arg6[%c0_14, %c0_15], %15 {strides = array<i32>} : memref<12x32xf32, #tpu.memory_space<vmem>>, vector<12x32xf32>,
    } else {
    }
    return
  }
  func.func @transform_0(%arg0: i32, %arg1: i32, %arg2: i32) -> (i32, i32) {
    %c0_i32 = arith.constant 0 : i32
    return %arg0, %arg2 : i32, i32
  }
  func.func @transform_1(%arg0: i32, %arg1: i32, %arg2: i32) -> (i32, i32) {
    %c0_i32 = arith.constant 0 : i32
    return %arg2, %arg1 : i32, i32
  }
  func.func @transform_2(%arg0: i32, %arg1: i32, %arg2: i32) -> (i32, i32) {
    %c0_i32 = arith.constant 0 : i32
    %c0_i32_0 = arith.constant 0 : i32
    return %c0_i32, %arg1 : i32, i32
  }
  func.func @transform_3(%arg0: i32, %arg1: i32, %arg2: i32) -> (i32, i32) {
    %c0_i32 = arith.constant 0 : i32
    return %arg0, %arg1 : i32, i32
  }
}

module attributes {stable_mosaic.version = 11 : i64} {
  func.func @kernel(%arg0: i32, %arg1: i32, %arg2: i32, %arg3: memref<2x16xbf16, #tpu.memory_space<vmem>>, %arg4: memref<16x16xbf16, #tpu.memory_space<vmem>>, %arg5: memref<1x16xf32, #tpu.memory_space<vmem>>, %arg6: memref<2x16xf32, #tpu.memory_space<vmem>>, %arg7: memref<2x16xf32, #tpu.memory_space<vmem>>) attributes {dimension_semantics = [#tpu.dimension_semantics<parallel>, #tpu.dimension_semantics<parallel>, #tpu.dimension_semantics<arbitrary>], iteration_bounds = array<i64: 1, 1, 1>, scalar_prefetch = 0 : i64, scratch_operands = 1 : i64, tpu.core_type = #tpu.core_type<tc>, window_params = [{transform_indices = @transform_0, window_bounds = array<i64: 2, 16>}, {transform_indices = @transform_1, window_bounds = array<i64: 16, 16>}, {transform_indices = @transform_2, window_bounds = array<i64: 1, 16>}, {transform_indices = @transform_3, window_bounds = array<i64: 2, 16>}]} {
    %c0_i32 = arith.constant 0 : i32
    %0 = arith.cmpi eq, %arg2, %c0_i32 : i32
    %1 = arith.extui %0 : i1 to i32
    %c0_i32_0 = arith.constant 0 : i32
    %2 = arith.cmpi ne, %1, %c0_i32_0 : i32
    scf.if %2 {
      %cst_10 = arith.constant 0.000000e+00 : f32
      %12 = vector.broadcast %cst_10 : f32 to vector<2x16xf32>
      %c0_11 = arith.constant 0 : index
      %c0_12 = arith.constant 0 : index
      %13 = vector.load %arg7[%c0_11, %c0_12] : memref<2x16xf32, #tpu.memory_space<vmem>>, vector<2x16xf32>
      tpu.vector_store %arg7[%c0_11, %c0_12], %12 {strides = array<i32>} : memref<2x16xf32, #tpu.memory_space<vmem>>, vector<2x16xf32>,
    } else {
    }
    %c0 = arith.constant 0 : index
    %c0_1 = arith.constant 0 : index
    %3 = vector.load %arg7[%c0, %c0_1] : memref<2x16xf32, #tpu.memory_space<vmem>>, vector<2x16xf32>
    %c0_2 = arith.constant 0 : index
    %c0_3 = arith.constant 0 : index
    %4 = vector.load %arg3[%c0_2, %c0_3] : memref<2x16xbf16, #tpu.memory_space<vmem>>, vector<2x16xbf16>
    %c0_4 = arith.constant 0 : index
    %c0_5 = arith.constant 0 : index
    %5 = vector.load %arg4[%c0_4, %c0_5] : memref<16x16xbf16, #tpu.memory_space<vmem>>, vector<16x16xbf16>
    %cst = arith.constant dense<0.000000e+00> : vector<2x16xf32>
    %6 = tpu.matmul %4, %5, %cst {dimension_numbers = #tpu.dot_dimension_numbers<[1], [0], [0], [1], [0, 0, 1, 1], [], []>} : vector<2x16xbf16>, vector<16x16xbf16>, vector<2x16xf32> -> vector<2x16xf32>
    %7 = arith.addf %3, %6 : vector<2x16xf32>
    %c0_6 = arith.constant 0 : index
    %c0_7 = arith.constant 0 : index
    %8 = vector.load %arg7[%c0_6, %c0_7] : memref<2x16xf32, #tpu.memory_space<vmem>>, vector<2x16xf32>
    tpu.vector_store %arg7[%c0_6, %c0_7], %7 {strides = array<i32>} : memref<2x16xf32, #tpu.memory_space<vmem>>, vector<2x16xf32>,
    %c0_i32_8 = arith.constant 0 : i32
    %9 = arith.cmpi eq, %arg2, %c0_i32_8 : i32
    %10 = arith.extui %9 : i1 to i32
    %c0_i32_9 = arith.constant 0 : i32
    %11 = arith.cmpi ne, %10, %c0_i32_9 : i32
    scf.if %11 {
      %c0_10 = arith.constant 0 : index
      %c0_11 = arith.constant 0 : index
      %12 = vector.load %arg7[%c0_10, %c0_11] : memref<2x16xf32, #tpu.memory_space<vmem>>, vector<2x16xf32>
      %c0_12 = arith.constant 0 : index
      %c0_13 = arith.constant 0 : index
      %13 = vector.load %arg5[%c0_12, %c0_13] : memref<1x16xf32, #tpu.memory_space<vmem>>, vector<1x16xf32>
      %14 = vector.broadcast %13 : vector<1x16xf32> to vector<2x16xf32>
      %15 = arith.addf %12, %14 : vector<2x16xf32>
      %16 = arith.negf %15 : vector<2x16xf32>
      %17 = math.exp %16 : vector<2x16xf32>
      %cst_14 = arith.constant 1.000000e+00 : f32
      %18 = vector.broadcast %cst_14 : f32 to vector<2x16xf32>
      %19 = arith.addf %18, %17 : vector<2x16xf32>
      %20 = arith.divf %18, %19 : vector<2x16xf32>
      %21 = arith.mulf %15, %20 : vector<2x16xf32>
      %c0_15 = arith.constant 0 : index
      %c0_16 = arith.constant 0 : index
      %22 = vector.load %arg6[%c0_15, %c0_16] : memref<2x16xf32, #tpu.memory_space<vmem>>, vector<2x16xf32>
      tpu.vector_store %arg6[%c0_15, %c0_16], %21 {strides = array<i32>} : memref<2x16xf32, #tpu.memory_space<vmem>>, vector<2x16xf32>,
    } else {
    }
    return
  }
  func.func @transform_0(%arg0: i32, %arg1: i32, %arg2: i32) -> (i32, i32) {
    %c0_i32 = arith.constant 0 : i32
    return %arg0, %arg2 : i32, i32
  }
  func.func @transform_1(%arg0: i32, %arg1: i32, %arg2: i32) -> (i32, i32) {
    %c0_i32 = arith.constant 0 : i32
    return %arg2, %arg1 : i32, i32
  }
  func.func @transform_2(%arg0: i32, %arg1: i32, %arg2: i32) -> (i32, i32) {
    %c0_i32 = arith.constant 0 : i32
    %c0_i32_0 = arith.constant 0 : i32
    return %c0_i32, %arg1 : i32, i32
  }
  func.func @transform_3(%arg0: i32, %arg1: i32, %arg2: i32) -> (i32, i32) {
    %c0_i32 = arith.constant 0 : i32
    return %arg0, %arg1 : i32, i32
  }
}

module attributes {stable_mosaic.version = 11 : i64} {
  func.func @kernel(%arg0: i32, %arg1: i32, %arg2: i32, %arg3: memref<2x32xbf16, #tpu.memory_space<vmem>>, %arg4: memref<32x16xbf16, #tpu.memory_space<vmem>>, %arg5: memref<1x16xf32, #tpu.memory_space<vmem>>, %arg6: memref<2x16xf32, #tpu.memory_space<vmem>>, %arg7: memref<2x16xf32, #tpu.memory_space<vmem>>) attributes {dimension_semantics = [#tpu.dimension_semantics<parallel>, #tpu.dimension_semantics<parallel>, #tpu.dimension_semantics<arbitrary>], iteration_bounds = array<i64: 1, 1, 1>, scalar_prefetch = 0 : i64, scratch_operands = 1 : i64, tpu.core_type = #tpu.core_type<tc>, window_params = [{transform_indices = @transform_0, window_bounds = array<i64: 2, 32>}, {transform_indices = @transform_1, window_bounds = array<i64: 32, 16>}, {transform_indices = @transform_2, window_bounds = array<i64: 1, 16>}, {transform_indices = @transform_3, window_bounds = array<i64: 2, 16>}]} {
    %c0_i32 = arith.constant 0 : i32
    %0 = arith.cmpi eq, %arg2, %c0_i32 : i32
    %1 = arith.extui %0 : i1 to i32
    %c0_i32_0 = arith.constant 0 : i32
    %2 = arith.cmpi ne, %1, %c0_i32_0 : i32
    scf.if %2 {
      %cst_10 = arith.constant 0.000000e+00 : f32
      %12 = vector.broadcast %cst_10 : f32 to vector<2x16xf32>
      %c0_11 = arith.constant 0 : index
      %c0_12 = arith.constant 0 : index
      %13 = vector.load %arg7[%c0_11, %c0_12] : memref<2x16xf32, #tpu.memory_space<vmem>>, vector<2x16xf32>
      tpu.vector_store %arg7[%c0_11, %c0_12], %12 {strides = array<i32>} : memref<2x16xf32, #tpu.memory_space<vmem>>, vector<2x16xf32>,
    } else {
    }
    %c0 = arith.constant 0 : index
    %c0_1 = arith.constant 0 : index
    %3 = vector.load %arg7[%c0, %c0_1] : memref<2x16xf32, #tpu.memory_space<vmem>>, vector<2x16xf32>
    %c0_2 = arith.constant 0 : index
    %c0_3 = arith.constant 0 : index
    %4 = vector.load %arg3[%c0_2, %c0_3] : memref<2x32xbf16, #tpu.memory_space<vmem>>, vector<2x32xbf16>
    %c0_4 = arith.constant 0 : index
    %c0_5 = arith.constant 0 : index
    %5 = vector.load %arg4[%c0_4, %c0_5] : memref<32x16xbf16, #tpu.memory_space<vmem>>, vector<32x16xbf16>
    %cst = arith.constant dense<0.000000e+00> : vector<2x16xf32>
    %6 = tpu.matmul %4, %5, %cst {dimension_numbers = #tpu.dot_dimension_numbers<[1], [0], [0], [1], [0, 0, 1, 1], [], []>} : vector<2x32xbf16>, vector<32x16xbf16>, vector<2x16xf32> -> vector<2x16xf32>
    %7 = arith.addf %3, %6 : vector<2x16xf32>
    %c0_6 = arith.constant 0 : index
    %c0_7 = arith.constant 0 : index
    %8 = vector.load %arg7[%c0_6, %c0_7] : memref<2x16xf32, #tpu.memory_space<vmem>>, vector<2x16xf32>
    tpu.vector_store %arg7[%c0_6, %c0_7], %7 {strides = array<i32>} : memref<2x16xf32, #tpu.memory_space<vmem>>, vector<2x16xf32>,
    %c0_i32_8 = arith.constant 0 : i32
    %9 = arith.cmpi eq, %arg2, %c0_i32_8 : i32
    %10 = arith.extui %9 : i1 to i32
    %c0_i32_9 = arith.constant 0 : i32
    %11 = arith.cmpi ne, %10, %c0_i32_9 : i32
    scf.if %11 {
      %c0_10 = arith.constant 0 : index
      %c0_11 = arith.constant 0 : index
      %12 = vector.load %arg7[%c0_10, %c0_11] : memref<2x16xf32, #tpu.memory_space<vmem>>, vector<2x16xf32>
      %c0_12 = arith.constant 0 : index
      %c0_13 = arith.constant 0 : index
      %13 = vector.load %arg5[%c0_12, %c0_13] : memref<1x16xf32, #tpu.memory_space<vmem>>, vector<1x16xf32>
      %14 = vector.broadcast %13 : vector<1x16xf32> to vector<2x16xf32>
      %15 = arith.addf %12, %14 : vector<2x16xf32>
      %16 = arith.negf %15 : vector<2x16xf32>
      %17 = math.exp %16 : vector<2x16xf32>
      %cst_14 = arith.constant 1.000000e+00 : f32
      %18 = vector.broadcast %cst_14 : f32 to vector<2x16xf32>
      %19 = arith.addf %18, %17 : vector<2x16xf32>
      %20 = arith.divf %18, %19 : vector<2x16xf32>
      %21 = arith.mulf %15, %20 : vector<2x16xf32>
      %c0_15 = arith.constant 0 : index
      %c0_16 = arith.constant 0 : index
      %22 = vector.load %arg6[%c0_15, %c0_16] : memref<2x16xf32, #tpu.memory_space<vmem>>, vector<2x16xf32>
      tpu.vector_store %arg6[%c0_15, %c0_16], %21 {strides = array<i32>} : memref<2x16xf32, #tpu.memory_space<vmem>>, vector<2x16xf32>,
    } else {
    }
    return
  }
  func.func @transform_0(%arg0: i32, %arg1: i32, %arg2: i32) -> (i32, i32) {
    %c0_i32 = arith.constant 0 : i32
    return %arg0, %arg2 : i32, i32
  }
  func.func @transform_1(%arg0: i32, %arg1: i32, %arg2: i32) -> (i32, i32) {
    %c0_i32 = arith.constant 0 : i32
    return %arg2, %arg1 : i32, i32
  }
  func.func @transform_2(%arg0: i32, %arg1: i32, %arg2: i32) -> (i32, i32) {
    %c0_i32 = arith.constant 0 : i32
    %c0_i32_0 = arith.constant 0 : i32
    return %c0_i32, %arg1 : i32, i32
  }
  func.func @transform_3(%arg0: i32, %arg1: i32, %arg2: i32) -> (i32, i32) {
    %c0_i32 = arith.constant 0 : i32
    return %arg0, %arg1 : i32, i32
  }
}

module attributes {stable_mosaic.version = 11 : i64} {
  func.func @kernel(%arg0: i32, %arg1: i32, %arg2: i32, %arg3: memref<2x16xbf16, #tpu.memory_space<vmem>>, %arg4: memref<16x384xbf16, #tpu.memory_space<vmem>>, %arg5: memref<1x384xf32, #tpu.memory_space<vmem>>, %arg6: memref<2x384xf32, #tpu.memory_space<vmem>>, %arg7: memref<2x384xf32, #tpu.memory_space<vmem>>) attributes {dimension_semantics = [#tpu.dimension_semantics<parallel>, #tpu.dimension_semantics<parallel>, #tpu.dimension_semantics<arbitrary>], iteration_bounds = array<i64: 1, 2, 1>, scalar_prefetch = 0 : i64, scratch_operands = 1 : i64, tpu.core_type = #tpu.core_type<tc>, window_params = [{transform_indices = @transform_0, window_bounds = array<i64: 2, 16>}, {transform_indices = @transform_1, window_bounds = array<i64: 16, 384>}, {transform_indices = @transform_2, window_bounds = array<i64: 1, 384>}, {transform_indices = @transform_3, window_bounds = array<i64: 2, 384>}]} {
    %c0_i32 = arith.constant 0 : i32
    %0 = arith.cmpi eq, %arg2, %c0_i32 : i32
    %1 = arith.extui %0 : i1 to i32
    %c0_i32_0 = arith.constant 0 : i32
    %2 = arith.cmpi ne, %1, %c0_i32_0 : i32
    scf.if %2 {
      %cst_10 = arith.constant 0.000000e+00 : f32
      %12 = vector.broadcast %cst_10 : f32 to vector<2x384xf32>
      %c0_11 = arith.constant 0 : index
      %c0_12 = arith.constant 0 : index
      %13 = vector.load %arg7[%c0_11, %c0_12] : memref<2x384xf32, #tpu.memory_space<vmem>>, vector<2x384xf32>
      tpu.vector_store %arg7[%c0_11, %c0_12], %12 {strides = array<i32>} : memref<2x384xf32, #tpu.memory_space<vmem>>, vector<2x384xf32>,
    } else {
    }
    %c0 = arith.constant 0 : index
    %c0_1 = arith.constant 0 : index
    %3 = vector.load %arg7[%c0, %c0_1] : memref<2x384xf32, #tpu.memory_space<vmem>>, vector<2x384xf32>
    %c0_2 = arith.constant 0 : index
    %c0_3 = arith.constant 0 : index
    %4 = vector.load %arg3[%c0_2, %c0_3] : memref<2x16xbf16, #tpu.memory_space<vmem>>, vector<2x16xbf16>
    %c0_4 = arith.constant 0 : index
    %c0_5 = arith.constant 0 : index
    %5 = vector.load %arg4[%c0_4, %c0_5] : memref<16x384xbf16, #tpu.memory_space<vmem>>, vector<16x384xbf16>
    %cst = arith.constant dense<0.000000e+00> : vector<2x384xf32>
    %6 = tpu.matmul %4, %5, %cst {dimension_numbers = #tpu.dot_dimension_numbers<[1], [0], [0], [1], [0, 0, 1, 1], [], []>} : vector<2x16xbf16>, vector<16x384xbf16>, vector<2x384xf32> -> vector<2x384xf32>
    %7 = arith.addf %3, %6 : vector<2x384xf32>
    %c0_6 = arith.constant 0 : index
    %c0_7 = arith.constant 0 : index
    %8 = vector.load %arg7[%c0_6, %c0_7] : memref<2x384xf32, #tpu.memory_space<vmem>>, vector<2x384xf32>
    tpu.vector_store %arg7[%c0_6, %c0_7], %7 {strides = array<i32>} : memref<2x384xf32, #tpu.memory_space<vmem>>, vector<2x384xf32>,
    %c0_i32_8 = arith.constant 0 : i32
    %9 = arith.cmpi eq, %arg2, %c0_i32_8 : i32
    %10 = arith.extui %9 : i1 to i32
    %c0_i32_9 = arith.constant 0 : i32
    %11 = arith.cmpi ne, %10, %c0_i32_9 : i32
    scf.if %11 {
      %c0_10 = arith.constant 0 : index
      %c0_11 = arith.constant 0 : index
      %12 = vector.load %arg7[%c0_10, %c0_11] : memref<2x384xf32, #tpu.memory_space<vmem>>, vector<2x384xf32>
      %c0_12 = arith.constant 0 : index
      %c0_13 = arith.constant 0 : index
      %13 = vector.load %arg5[%c0_12, %c0_13] : memref<1x384xf32, #tpu.memory_space<vmem>>, vector<1x384xf32>
      %14 = vector.broadcast %13 : vector<1x384xf32> to vector<2x384xf32>
      %15 = arith.addf %12, %14 : vector<2x384xf32>
      %c0_14 = arith.constant 0 : index
      %c0_15 = arith.constant 0 : index
      %16 = vector.load %arg6[%c0_14, %c0_15] : memref<2x384xf32, #tpu.memory_space<vmem>>, vector<2x384xf32>
      tpu.vector_store %arg6[%c0_14, %c0_15], %15 {strides = array<i32>} : memref<2x384xf32, #tpu.memory_space<vmem>>, vector<2x384xf32>,
    } else {
    }
    return
  }
  func.func @transform_0(%arg0: i32, %arg1: i32, %arg2: i32) -> (i32, i32) {
    %c0_i32 = arith.constant 0 : i32
    return %arg0, %arg2 : i32, i32
  }
  func.func @transform_1(%arg0: i32, %arg1: i32, %arg2: i32) -> (i32, i32) {
    %c0_i32 = arith.constant 0 : i32
    return %arg2, %arg1 : i32, i32
  }
  func.func @transform_2(%arg0: i32, %arg1: i32, %arg2: i32) -> (i32, i32) {
    %c0_i32 = arith.constant 0 : i32
    %c0_i32_0 = arith.constant 0 : i32
    return %c0_i32, %arg1 : i32, i32
  }
  func.func @transform_3(%arg0: i32, %arg1: i32, %arg2: i32) -> (i32, i32) {
    %c0_i32 = arith.constant 0 : i32
    return %arg0, %arg1 : i32, i32
  }
}

module attributes {stable_mosaic.version = 11 : i64} {
  func.func @kernel(%arg0: i32, %arg1: memref<12x32xf32, #tpu.memory_space<vmem>>, %arg2: memref<1x32xf32, #tpu.memory_space<vmem>>, %arg3: memref<1x32xf32, #tpu.memory_space<vmem>>, %arg4: memref<12x32xf32, #tpu.memory_space<vmem>>) attributes {dimension_semantics = [#tpu.dimension_semantics<parallel>], iteration_bounds = array<i64: 1>, scalar_prefetch = 0 : i64, scratch_operands = 0 : i64, tpu.core_type = #tpu.core_type<tc>, window_params = [{transform_indices = @transform_0, window_bounds = array<i64: 12, 32>}, {pipeline_mode = #tpu.pipeline_mode<synchronous>, transform_indices = @transform_1, window_bounds = array<i64: 1, 32>}, {pipeline_mode = #tpu.pipeline_mode<synchronous>, transform_indices = @transform_2, window_bounds = array<i64: 1, 32>}, {transform_indices = @transform_3, window_bounds = array<i64: 12, 32>}]} {
    %c0 = arith.constant 0 : index
    %c0_0 = arith.constant 0 : index
    %0 = vector.load %arg1[%c0, %c0_0] : memref<12x32xf32, #tpu.memory_space<vmem>>, vector<12x32xf32>
    %cst = arith.constant dense<0.000000e+00> : vector<12xf32>
    %1 = vector.multi_reduction <add>, %0, %cst [1] : vector<12x32xf32> to vector<12xf32>
    %2 = vector.shape_cast %1 : vector<12xf32> to vector<12x1xf32>
    %cst_1 = arith.constant 3.200000e+01 : f32
    %3 = vector.broadcast %cst_1 : f32 to vector<12x1xf32>
    %4 = arith.divf %2, %3 : vector<12x1xf32>
    %5 = vector.broadcast %4 : vector<12x1xf32> to vector<12x32xf32>
    %6 = arith.subf %0, %5 : vector<12x32xf32>
    %7 = arith.mulf %6, %6 : vector<12x32xf32>
    %cst_2 = arith.constant dense<0.000000e+00> : vector<12xf32>
    %8 = vector.multi_reduction <add>, %7, %cst_2 [1] : vector<12x32xf32> to vector<12xf32>
    %9 = vector.shape_cast %8 : vector<12xf32> to vector<12x1xf32>
    %cst_3 = arith.constant 3.200000e+01 : f32
    %10 = vector.broadcast %cst_3 : f32 to vector<12x1xf32>
    %11 = arith.divf %9, %10 : vector<12x1xf32>
    %12 = vector.broadcast %4 : vector<12x1xf32> to vector<12x32xf32>
    %13 = arith.subf %0, %12 : vector<12x32xf32>
    %cst_4 = arith.constant 9.99999974E-6 : f32
    %14 = vector.broadcast %cst_4 : f32 to vector<12x1xf32>
    %15 = arith.addf %11, %14 : vector<12x1xf32>
    %16 = math.rsqrt %15 : vector<12x1xf32>
    %17 = vector.broadcast %16 : vector<12x1xf32> to vector<12x32xf32>
    %18 = arith.mulf %13, %17 : vector<12x32xf32>
    %c0_5 = arith.constant 0 : index
    %c0_6 = arith.constant 0 : index
    %19 = vector.load %arg2[%c0_5, %c0_6] : memref<1x32xf32, #tpu.memory_space<vmem>>, vector<1x32xf32>
    %20 = vector.broadcast %19 : vector<1x32xf32> to vector<12x32xf32>
    %21 = arith.mulf %18, %20 : vector<12x32xf32>
    %c0_7 = arith.constant 0 : index
    %c0_8 = arith.constant 0 : index
    %22 = vector.load %arg3[%c0_7, %c0_8] : memref<1x32xf32, #tpu.memory_space<vmem>>, vector<1x32xf32>
    %23 = vector.broadcast %22 : vector<1x32xf32> to vector<12x32xf32>
    %24 = arith.addf %21, %23 : vector<12x32xf32>
    %c0_9 = arith.constant 0 : index
    %c0_10 = arith.constant 0 : index
    %25 = vector.load %arg4[%c0_9, %c0_10] : memref<12x32xf32, #tpu.memory_space<vmem>>, vector<12x32xf32>
    tpu.vector_store %arg4[%c0_9, %c0_10], %24 {strides = array<i32>} : memref<12x32xf32, #tpu.memory_space<vmem>>, vector<12x32xf32>,
    return
  }
  func.func @transform_0(%arg0: i32) -> (i32, i32) {
    %c0_i32 = arith.constant 0 : i32
    %c0_i32_0 = arith.constant 0 : i32
    return %arg0, %c0_i32 : i32, i32
  }
  func.func @transform_1(%arg0: i32) -> (i32, i32) {
    %c0_i32 = arith.constant 0 : i32
    %c0_i32_0 = arith.constant 0 : i32
    %c0_i32_1 = arith.constant 0 : i32
    return %c0_i32, %c0_i32_0 : i32, i32
  }
  func.func @transform_2(%arg0: i32) -> (i32, i32) {
    %c0_i32 = arith.constant 0 : i32
    %c0_i32_0 = arith.constant 0 : i32
    %c0_i32_1 = arith.constant 0 : i32
    return %c0_i32, %c0_i32_0 : i32, i32
  }
  func.func @transform_3(%arg0: i32) -> (i32, i32) {
    %c0_i32 = arith.constant 0 : i32
    %c0_i32_0 = arith.constant 0 : i32
    return %arg0, %c0_i32 : i32, i32
  }
}

module attributes {stable_mosaic.version = 11 : i64} {
  func.func @kernel(%arg0: i32, %arg1: i32, %arg2: memref<1x14x32xf32, #tpu.memory_space<vmem>>, %arg3: memref<1x1x6x32xf32, #tpu.memory_space<vmem>>, %arg4: memref<1x1x6x32xf32, #tpu.memory_space<vmem>>, %arg5: memref<14x16xf32, #tpu.memory_space<vmem>>, %arg6: memref<14x16xf32, #tpu.memory_space<vmem>>, %arg7: memref<1x1x32xf32, #tpu.memory_space<vmem>>, %arg8: memref<1x1x32xf32, #tpu.memory_space<vmem>>, %arg9: memref<1x32x32xbf16, #tpu.memory_space<vmem>>, %arg10: memref<1x1x32xf32, #tpu.memory_space<vmem>>, %arg11: memref<1x32x32xbf16, #tpu.memory_space<vmem>>, %arg12: memref<1x1x32xf32, #tpu.memory_space<vmem>>, %arg13: memref<1x32x32xbf16, #tpu.memory_space<vmem>>, %arg14: memref<1x1x32xf32, #tpu.memory_space<vmem>>, %arg15: memref<1x1x16xf32, #tpu.memory_space<vmem>>, %arg16: memref<1x1x16xf32, #tpu.memory_space<vmem>>, %arg17: memref<1x1x16xf32, #tpu.memory_space<vmem>>, %arg18: memref<1x1x16xf32, #tpu.memory_space<vmem>>, %arg19: memref<1x32x32xbf16, #tpu.memory_space<vmem>>, %arg20: memref<1x1x32xf32, #tpu.memory_space<vmem>>, %arg21: memref<1x1x32xf32, #tpu.memory_space<vmem>>, %arg22: memref<1x1x32xf32, #tpu.memory_space<vmem>>, %arg23: memref<1x32x128xbf16, #tpu.memory_space<vmem>>, %arg24: memref<1x1x128xf32, #tpu.memory_space<vmem>>, %arg25: memref<1x128x32xbf16, #tpu.memory_space<vmem>>, %arg26: memref<1x1x32xf32, #tpu.memory_space<vmem>>, %arg27: memref<1x14x32xf32, #tpu.memory_space<vmem>>) attributes {dimension_semantics = [#tpu.dimension_semantics<parallel>, #tpu.dimension_semantics<arbitrary>], iteration_bounds = array<i64: 2, 4>, scalar_prefetch = 0 : i64, scratch_operands = 0 : i64, tpu.core_type = #tpu.core_type<tc>, window_params = [{transform_indices = @transform_0, window_bounds = array<i64: 1, 14, 32>}, {transform_indices = @transform_1, window_bounds = array<i64: 1, 1, 6, 32>}, {transform_indices = @transform_2, window_bounds = array<i64: 1, 1, 6, 32>}, {pipeline_mode = #tpu.pipeline_mode<synchronous>, transform_indices = @transform_3, window_bounds = array<i64: 14, 16>}, {pipeline_mode = #tpu.pipeline_mode<synchronous>, transform_indices = @transform_4, window_bounds = array<i64: 14, 16>}, {transform_indices = @transform_5, window_bounds = array<i64: 1, 1, 32>}, {transform_indices = @transform_6, window_bounds = array<i64: 1, 1, 32>}, {transform_indices = @transform_7, window_bounds = array<i64: 1, 32, 32>}, {transform_indices = @transform_8, window_bounds = array<i64: 1, 1, 32>}, {transform_indices = @transform_9, window_bounds = array<i64: 1, 32, 32>}, {transform_indices = @transform_10, window_bounds = array<i64: 1, 1, 32>}, {transform_indices = @transform_11, window_bounds = array<i64: 1, 32, 32>}, {transform_indices = @transform_12, window_bounds = array<i64: 1, 1, 32>}, {transform_indices = @transform_13, window_bounds = array<i64: 1, 1, 16>}, {transform_indices = @transform_14, window_bounds = array<i64: 1, 1, 16>}, {transform_indices = @transform_15, window_bounds = array<i64: 1, 1, 16>}, {transform_indices = @transform_16, window_bounds = array<i64: 1, 1, 16>}, {transform_indices = @transform_17, window_bounds = array<i64: 1, 32, 32>}, {transform_indices = @transform_18, window_bounds = array<i64: 1, 1, 32>}, {transform_indices = @transform_19, window_bounds = array<i64: 1, 1, 32>}, {transform_indices = @transform_20, window_bounds = array<i64: 1, 1, 32>}, {transform_indices = @transform_21, window_bounds = array<i64: 1, 32, 128>}, {transform_indices = @transform_22, window_bounds = array<i64: 1, 1, 128>}, {transform_indices = @transform_23, window_bounds = array<i64: 1, 128, 32>}, {transform_indices = @transform_24, window_bounds = array<i64: 1, 1, 32>}, {transform_indices = @transform_25, window_bounds = array<i64: 1, 14, 32>}]} {
    %c0_i32 = arith.constant 0 : i32
    %0 = arith.cmpi eq, %arg1, %c0_i32 : i32
    %1 = arith.extui %0 : i1 to i32
    %c0_i32_0 = arith.constant 0 : i32
    %2 = arith.cmpi ne, %1, %c0_i32_0 : i32
    scf.if %2 {
      %c0_117 = arith.constant 0 : index
      %c0_118 = arith.constant 0 : index
      %c0_119 = arith.constant 0 : index
      %312 = vector.load %arg2[%c0_117, %c0_118, %c0_119] : memref<1x14x32xf32, #tpu.memory_space<vmem>>, vector<1x14x32xf32>
      %c0_120 = arith.constant 0 : index
      %c0_121 = arith.constant 0 : index
      %c0_122 = arith.constant 0 : index
      %313 = vector.load %arg27[%c0_120, %c0_121, %c0_122] : memref<1x14x32xf32, #tpu.memory_space<vmem>>, vector<1x14x32xf32>
      tpu.vector_store %arg27[%c0_120, %c0_121, %c0_122], %312 {strides = array<i32>} : memref<1x14x32xf32, #tpu.memory_space<vmem>>, vector<1x14x32xf32>,
    } else {
    }
    %c0 = arith.constant 0 : index
    %c0_1 = arith.constant 0 : index
    %c0_2 = arith.constant 0 : index
    %3 = vector.load %arg27[%c0, %c0_1, %c0_2] : memref<1x14x32xf32, #tpu.memory_space<vmem>>, vector<1x14x32xf32>
    %4 = vector.shape_cast %3 : vector<1x14x32xf32> to vector<14x32xf32>
    %5 = tpu.iota {dimensions = array<i32: 0>} : vector<14x1xi32>
    %c8_i32 = arith.constant 8 : i32
    %6 = vector.broadcast %c8_i32 : i32 to vector<14x1xi32>
    %7 = arith.cmpi slt, %5, %6 : vector<14x1xi32>
    %c0_3 = arith.constant 0 : index
    %c0_4 = arith.constant 0 : index
    %8 = vector.load %arg5[%c0_3, %c0_4] : memref<14x16xf32, #tpu.memory_space<vmem>>, vector<14x16xf32>
    %c0_5 = arith.constant 0 : index
    %c0_6 = arith.constant 0 : index
    %9 = vector.load %arg6[%c0_5, %c0_6] : memref<14x16xf32, #tpu.memory_space<vmem>>, vector<14x16xf32>
    %c0_7 = arith.constant 0 : index
    %c0_8 = arith.constant 0 : index
    %c0_9 = arith.constant 0 : index
    %c0_10 = arith.constant 0 : index
    %10 = vector.load %arg3[%c0_7, %c0_8, %c0_9, %c0_10] : memref<1x1x6x32xf32, #tpu.memory_space<vmem>>, vector<1x1x6x32xf32>
    %11 = vector.shape_cast %10 : vector<1x1x6x32xf32> to vector<6x32xf32>
    %12 = vector.extract_strided_slice %11 {offsets = [3, 0], sizes = [1, 32], strides = [1, 1]} : vector<6x32xf32> to vector<1x32xf32>
    %13 = vector.extract_strided_slice %11 {offsets = [0, 0], sizes = [1, 32], strides = [1, 1]} : vector<6x32xf32> to vector<1x32xf32>
    %14 = vector.shape_cast %7 : vector<14x1xi1> to vector<14x1xi1>
    %15 = vector.broadcast %14 : vector<14x1xi1> to vector<14x32xi1>
    %16 = vector.shape_cast %12 : vector<1x32xf32> to vector<1x32xf32>
    %17 = vector.broadcast %16 : vector<1x32xf32> to vector<14x32xf32>
    %18 = vector.shape_cast %13 : vector<1x32xf32> to vector<1x32xf32>
    %19 = vector.broadcast %18 : vector<1x32xf32> to vector<14x32xf32>
    %20 = arith.select %15, %17, %19 : vector<14x32xi1>, vector<14x32xf32>
    %21 = vector.extract_strided_slice %11 {offsets = [4, 0], sizes = [1, 32], strides = [1, 1]} : vector<6x32xf32> to vector<1x32xf32>
    %22 = vector.extract_strided_slice %11 {offsets = [1, 0], sizes = [1, 32], strides = [1, 1]} : vector<6x32xf32> to vector<1x32xf32>
    %23 = vector.shape_cast %7 : vector<14x1xi1> to vector<14x1xi1>
    %24 = vector.broadcast %23 : vector<14x1xi1> to vector<14x32xi1>
    %25 = vector.shape_cast %21 : vector<1x32xf32> to vector<1x32xf32>
    %26 = vector.broadcast %25 : vector<1x32xf32> to vector<14x32xf32>
    %27 = vector.shape_cast %22 : vector<1x32xf32> to vector<1x32xf32>
    %28 = vector.broadcast %27 : vector<1x32xf32> to vector<14x32xf32>
    %29 = arith.select %24, %26, %28 : vector<14x32xi1>, vector<14x32xf32>
    %30 = vector.extract_strided_slice %11 {offsets = [5, 0], sizes = [1, 32], strides = [1, 1]} : vector<6x32xf32> to vector<1x32xf32>
    %31 = vector.extract_strided_slice %11 {offsets = [2, 0], sizes = [1, 32], strides = [1, 1]} : vector<6x32xf32> to vector<1x32xf32>
    %32 = vector.shape_cast %7 : vector<14x1xi1> to vector<14x1xi1>
    %33 = vector.broadcast %32 : vector<14x1xi1> to vector<14x32xi1>
    %34 = vector.shape_cast %30 : vector<1x32xf32> to vector<1x32xf32>
    %35 = vector.broadcast %34 : vector<1x32xf32> to vector<14x32xf32>
    %36 = vector.shape_cast %31 : vector<1x32xf32> to vector<1x32xf32>
    %37 = vector.broadcast %36 : vector<1x32xf32> to vector<14x32xf32>
    %38 = arith.select %33, %35, %37 : vector<14x32xi1>, vector<14x32xf32>
    %c0_11 = arith.constant 0 : index
    %c0_12 = arith.constant 0 : index
    %c0_13 = arith.constant 0 : index
    %39 = vector.load %arg7[%c0_11, %c0_12, %c0_13] : memref<1x1x32xf32, #tpu.memory_space<vmem>>, vector<1x1x32xf32>
    %40 = vector.shape_cast %39 : vector<1x1x32xf32> to vector<1x32xf32>
    %c0_14 = arith.constant 0 : index
    %c0_15 = arith.constant 0 : index
    %c0_16 = arith.constant 0 : index
    %41 = vector.load %arg8[%c0_14, %c0_15, %c0_16] : memref<1x1x32xf32, #tpu.memory_space<vmem>>, vector<1x1x32xf32>
    %42 = vector.shape_cast %41 : vector<1x1x32xf32> to vector<1x32xf32>
    %cst = arith.constant dense<0.000000e+00> : vector<14xf32>
    %43 = vector.multi_reduction <add>, %4, %cst [1] : vector<14x32xf32> to vector<14xf32>
    %44 = vector.shape_cast %43 : vector<14xf32> to vector<14x1xf32>
    %cst_17 = arith.constant 3.200000e+01 : f32
    %45 = vector.broadcast %cst_17 : f32 to vector<14x1xf32>
    %46 = arith.divf %44, %45 : vector<14x1xf32>
    %47 = vector.broadcast %46 : vector<14x1xf32> to vector<14x32xf32>
    %48 = arith.subf %4, %47 : vector<14x32xf32>
    %49 = arith.mulf %48, %48 : vector<14x32xf32>
    %cst_18 = arith.constant dense<0.000000e+00> : vector<14xf32>
    %50 = vector.multi_reduction <add>, %49, %cst_18 [1] : vector<14x32xf32> to vector<14xf32>
    %51 = vector.shape_cast %50 : vector<14xf32> to vector<14x1xf32>
    %cst_19 = arith.constant 3.200000e+01 : f32
    %52 = vector.broadcast %cst_19 : f32 to vector<14x1xf32>
    %53 = arith.divf %51, %52 : vector<14x1xf32>
    %54 = vector.broadcast %46 : vector<14x1xf32> to vector<14x32xf32>
    %55 = arith.subf %4, %54 : vector<14x32xf32>
    %cst_20 = arith.constant 9.99999974E-6 : f32
    %56 = vector.broadcast %cst_20 : f32 to vector<14x1xf32>
    %57 = arith.addf %53, %56 : vector<14x1xf32>
    %58 = math.rsqrt %57 : vector<14x1xf32>
    %59 = vector.broadcast %58 : vector<14x1xf32> to vector<14x32xf32>
    %60 = arith.mulf %55, %59 : vector<14x32xf32>
    %61 = vector.broadcast %40 : vector<1x32xf32> to vector<14x32xf32>
    %62 = arith.mulf %60, %61 : vector<14x32xf32>
    %63 = vector.broadcast %42 : vector<1x32xf32> to vector<14x32xf32>
    %64 = arith.addf %62, %63 : vector<14x32xf32>
    %cst_21 = arith.constant 1.000000e+00 : f32
    %65 = vector.broadcast %cst_21 : f32 to vector<14x32xf32>
    %66 = arith.addf %65, %29 : vector<14x32xf32>
    %67 = arith.mulf %64, %66 : vector<14x32xf32>
    %68 = arith.addf %67, %20 : vector<14x32xf32>
    %69 = arith.truncf %68 : vector<14x32xf32> to vector<14x32xbf16>
    %c0_22 = arith.constant 0 : index
    %c0_23 = arith.constant 0 : index
    %c0_24 = arith.constant 0 : index
    %70 = vector.load %arg9[%c0_22, %c0_23, %c0_24] : memref<1x32x32xbf16, #tpu.memory_space<vmem>>, vector<1x32x32xbf16>
    %71 = vector.shape_cast %70 : vector<1x32x32xbf16> to vector<32x32xbf16>
    %cst_25 = arith.constant dense<0.000000e+00> : vector<14x32xf32>
    %72 = tpu.matmul %69, %71, %cst_25 {dimension_numbers = #tpu.dot_dimension_numbers<[1], [0], [0], [1], [0, 0, 1, 1], [], []>} : vector<14x32xbf16>, vector<32x32xbf16>, vector<14x32xf32> -> vector<14x32xf32>
    %c0_26 = arith.constant 0 : index
    %c0_27 = arith.constant 0 : index
    %c0_28 = arith.constant 0 : index
    %73 = vector.load %arg10[%c0_26, %c0_27, %c0_28] : memref<1x1x32xf32, #tpu.memory_space<vmem>>, vector<1x1x32xf32>
    %74 = vector.shape_cast %73 : vector<1x1x32xf32> to vector<1x32xf32>
    %75 = vector.broadcast %74 : vector<1x32xf32> to vector<14x32xf32>
    %76 = arith.addf %72, %75 : vector<14x32xf32>
    %c0_29 = arith.constant 0 : index
    %c0_30 = arith.constant 0 : index
    %c0_31 = arith.constant 0 : index
    %77 = vector.load %arg11[%c0_29, %c0_30, %c0_31] : memref<1x32x32xbf16, #tpu.memory_space<vmem>>, vector<1x32x32xbf16>
    %78 = vector.shape_cast %77 : vector<1x32x32xbf16> to vector<32x32xbf16>
    %cst_32 = arith.constant dense<0.000000e+00> : vector<14x32xf32>
    %79 = tpu.matmul %69, %78, %cst_32 {dimension_numbers = #tpu.dot_dimension_numbers<[1], [0], [0], [1], [0, 0, 1, 1], [], []>} : vector<14x32xbf16>, vector<32x32xbf16>, vector<14x32xf32> -> vector<14x32xf32>
    %c0_33 = arith.constant 0 : index
    %c0_34 = arith.constant 0 : index
    %c0_35 = arith.constant 0 : index
    %80 = vector.load %arg12[%c0_33, %c0_34, %c0_35] : memref<1x1x32xf32, #tpu.memory_space<vmem>>, vector<1x1x32xf32>
    %81 = vector.shape_cast %80 : vector<1x1x32xf32> to vector<1x32xf32>
    %82 = vector.broadcast %81 : vector<1x32xf32> to vector<14x32xf32>
    %83 = arith.addf %79, %82 : vector<14x32xf32>
    %c0_36 = arith.constant 0 : index
    %c0_37 = arith.constant 0 : index
    %c0_38 = arith.constant 0 : index
    %84 = vector.load %arg13[%c0_36, %c0_37, %c0_38] : memref<1x32x32xbf16, #tpu.memory_space<vmem>>, vector<1x32x32xbf16>
    %85 = vector.shape_cast %84 : vector<1x32x32xbf16> to vector<32x32xbf16>
    %cst_39 = arith.constant dense<0.000000e+00> : vector<14x32xf32>
    %86 = tpu.matmul %69, %85, %cst_39 {dimension_numbers = #tpu.dot_dimension_numbers<[1], [0], [0], [1], [0, 0, 1, 1], [], []>} : vector<14x32xbf16>, vector<32x32xbf16>, vector<14x32xf32> -> vector<14x32xf32>
    %c0_40 = arith.constant 0 : index
    %c0_41 = arith.constant 0 : index
    %c0_42 = arith.constant 0 : index
    %87 = vector.load %arg14[%c0_40, %c0_41, %c0_42] : memref<1x1x32xf32, #tpu.memory_space<vmem>>, vector<1x1x32xf32>
    %88 = vector.shape_cast %87 : vector<1x1x32xf32> to vector<1x32xf32>
    %89 = vector.broadcast %88 : vector<1x32xf32> to vector<14x32xf32>
    %90 = arith.addf %86, %89 : vector<14x32xf32>
    %91 = vector.extract_strided_slice %76 {offsets = [0, 0], sizes = [14, 16], strides = [1, 1]} : vector<14x32xf32> to vector<14x16xf32>
    %92 = vector.extract_strided_slice %76 {offsets = [0, 16], sizes = [14, 16], strides = [1, 1]} : vector<14x32xf32> to vector<14x16xf32>
    %93 = vector.shape_cast %91 : vector<14x16xf32> to vector<1x14x16xf32>
    %94 = vector.shape_cast %92 : vector<14x16xf32> to vector<1x14x16xf32>
    %95 = tpu.concatenate %93, %94 in 0 : vector<1x14x16xf32>, vector<1x14x16xf32> -> vector<2x14x16xf32>
    %96 = vector.extract_strided_slice %83 {offsets = [0, 0], sizes = [14, 16], strides = [1, 1]} : vector<14x32xf32> to vector<14x16xf32>
    %97 = vector.extract_strided_slice %83 {offsets = [0, 16], sizes = [14, 16], strides = [1, 1]} : vector<14x32xf32> to vector<14x16xf32>
    %98 = vector.shape_cast %96 : vector<14x16xf32> to vector<1x14x16xf32>
    %99 = vector.shape_cast %97 : vector<14x16xf32> to vector<1x14x16xf32>
    %100 = tpu.concatenate %98, %99 in 0 : vector<1x14x16xf32>, vector<1x14x16xf32> -> vector<2x14x16xf32>
    %101 = vector.extract_strided_slice %90 {offsets = [0, 0], sizes = [14, 16], strides = [1, 1]} : vector<14x32xf32> to vector<14x16xf32>
    %102 = vector.extract_strided_slice %90 {offsets = [0, 16], sizes = [14, 16], strides = [1, 1]} : vector<14x32xf32> to vector<14x16xf32>
    %103 = vector.shape_cast %101 : vector<14x16xf32> to vector<1x14x16xf32>
    %104 = vector.shape_cast %102 : vector<14x16xf32> to vector<1x14x16xf32>
    %105 = tpu.concatenate %103, %104 in 0 : vector<1x14x16xf32>, vector<1x14x16xf32> -> vector<2x14x16xf32>
    %c0_43 = arith.constant 0 : index
    %c0_44 = arith.constant 0 : index
    %c0_45 = arith.constant 0 : index
    %106 = vector.load %arg15[%c0_43, %c0_44, %c0_45] : memref<1x1x16xf32, #tpu.memory_space<vmem>>, vector<1x1x16xf32>
    %107 = vector.shape_cast %106 : vector<1x1x16xf32> to vector<1x16xf32>
    %c0_46 = arith.constant 0 : index
    %c0_47 = arith.constant 0 : index
    %c0_48 = arith.constant 0 : index
    %108 = vector.load %arg16[%c0_46, %c0_47, %c0_48] : memref<1x1x16xf32, #tpu.memory_space<vmem>>, vector<1x1x16xf32>
    %109 = vector.shape_cast %108 : vector<1x1x16xf32> to vector<1x16xf32>
    %cst_49 = arith.constant dense<0.000000e+00> : vector<2x14xf32>
    %110 = vector.multi_reduction <add>, %95, %cst_49 [2] : vector<2x14x16xf32> to vector<2x14xf32>
    %111 = vector.shape_cast %110 : vector<2x14xf32> to vector<2x14x1xf32>
    %cst_50 = arith.constant 1.600000e+01 : f32
    %112 = vector.broadcast %cst_50 : f32 to vector<2x14x1xf32>
    %113 = arith.divf %111, %112 : vector<2x14x1xf32>
    %114 = vector.broadcast %113 : vector<2x14x1xf32> to vector<2x14x16xf32>
    %115 = arith.subf %95, %114 : vector<2x14x16xf32>
    %116 = arith.mulf %115, %115 : vector<2x14x16xf32>
    %cst_51 = arith.constant dense<0.000000e+00> : vector<2x14xf32>
    %117 = vector.multi_reduction <add>, %116, %cst_51 [2] : vector<2x14x16xf32> to vector<2x14xf32>
    %118 = vector.shape_cast %117 : vector<2x14xf32> to vector<2x14x1xf32>
    %cst_52 = arith.constant 1.600000e+01 : f32
    %119 = vector.broadcast %cst_52 : f32 to vector<2x14x1xf32>
    %120 = arith.divf %118, %119 : vector<2x14x1xf32>
    %121 = vector.broadcast %113 : vector<2x14x1xf32> to vector<2x14x16xf32>
    %122 = arith.subf %95, %121 : vector<2x14x16xf32>
    %cst_53 = arith.constant 9.99999997E-7 : f32
    %123 = vector.broadcast %cst_53 : f32 to vector<2x14x1xf32>
    %124 = arith.addf %120, %123 : vector<2x14x1xf32>
    %125 = math.rsqrt %124 : vector<2x14x1xf32>
    %126 = vector.broadcast %125 : vector<2x14x1xf32> to vector<2x14x16xf32>
    %127 = arith.mulf %122, %126 : vector<2x14x16xf32>
    %128 = vector.shape_cast %107 : vector<1x16xf32> to vector<1x1x16xf32>
    %129 = vector.broadcast %128 : vector<1x1x16xf32> to vector<2x14x16xf32>
    %130 = arith.mulf %127, %129 : vector<2x14x16xf32>
    %131 = vector.shape_cast %109 : vector<1x16xf32> to vector<1x1x16xf32>
    %132 = vector.broadcast %131 : vector<1x1x16xf32> to vector<2x14x16xf32>
    %133 = arith.addf %130, %132 : vector<2x14x16xf32>
    %134 = vector.extract_strided_slice %133 {offsets = [0, 0, 8], sizes = [2, 14, 8], strides = [1, 1, 1]} : vector<2x14x16xf32> to vector<2x14x8xf32>
    %135 = vector.extract_strided_slice %133 {offsets = [0, 0, 0], sizes = [2, 14, 8], strides = [1, 1, 1]} : vector<2x14x16xf32> to vector<2x14x8xf32>
    %136 = tpu.concatenate %134, %135 in 2 : vector<2x14x8xf32>, vector<2x14x8xf32> -> vector<2x14x16xf32>
    %137 = vector.shape_cast %8 : vector<14x16xf32> to vector<1x14x16xf32>
    %138 = vector.broadcast %137 : vector<1x14x16xf32> to vector<2x14x16xf32>
    %139 = arith.mulf %133, %138 : vector<2x14x16xf32>
    %140 = vector.shape_cast %9 : vector<14x16xf32> to vector<1x14x16xf32>
    %141 = vector.broadcast %140 : vector<1x14x16xf32> to vector<2x14x16xf32>
    %142 = arith.mulf %136, %141 : vector<2x14x16xf32>
    %143 = arith.addf %139, %142 : vector<2x14x16xf32>
    %cst_54 = arith.constant 2.500000e-01 : f32
    %144 = vector.broadcast %cst_54 : f32 to vector<2x14x16xf32>
    %145 = arith.mulf %143, %144 : vector<2x14x16xf32>
    %c0_55 = arith.constant 0 : index
    %c0_56 = arith.constant 0 : index
    %c0_57 = arith.constant 0 : index
    %146 = vector.load %arg17[%c0_55, %c0_56, %c0_57] : memref<1x1x16xf32, #tpu.memory_space<vmem>>, vector<1x1x16xf32>
    %147 = vector.shape_cast %146 : vector<1x1x16xf32> to vector<1x16xf32>
    %c0_58 = arith.constant 0 : index
    %c0_59 = arith.constant 0 : index
    %c0_60 = arith.constant 0 : index
    %148 = vector.load %arg18[%c0_58, %c0_59, %c0_60] : memref<1x1x16xf32, #tpu.memory_space<vmem>>, vector<1x1x16xf32>
    %149 = vector.shape_cast %148 : vector<1x1x16xf32> to vector<1x16xf32>
    %cst_61 = arith.constant dense<0.000000e+00> : vector<2x14xf32>
    %150 = vector.multi_reduction <add>, %100, %cst_61 [2] : vector<2x14x16xf32> to vector<2x14xf32>
    %151 = vector.shape_cast %150 : vector<2x14xf32> to vector<2x14x1xf32>
    %cst_62 = arith.constant 1.600000e+01 : f32
    %152 = vector.broadcast %cst_62 : f32 to vector<2x14x1xf32>
    %153 = arith.divf %151, %152 : vector<2x14x1xf32>
    %154 = vector.broadcast %153 : vector<2x14x1xf32> to vector<2x14x16xf32>
    %155 = arith.subf %100, %154 : vector<2x14x16xf32>
    %156 = arith.mulf %155, %155 : vector<2x14x16xf32>
    %cst_63 = arith.constant dense<0.000000e+00> : vector<2x14xf32>
    %157 = vector.multi_reduction <add>, %156, %cst_63 [2] : vector<2x14x16xf32> to vector<2x14xf32>
    %158 = vector.shape_cast %157 : vector<2x14xf32> to vector<2x14x1xf32>
    %cst_64 = arith.constant 1.600000e+01 : f32
    %159 = vector.broadcast %cst_64 : f32 to vector<2x14x1xf32>
    %160 = arith.divf %158, %159 : vector<2x14x1xf32>
    %161 = vector.broadcast %153 : vector<2x14x1xf32> to vector<2x14x16xf32>
    %162 = arith.subf %100, %161 : vector<2x14x16xf32>
    %cst_65 = arith.constant 9.99999997E-7 : f32
    %163 = vector.broadcast %cst_65 : f32 to vector<2x14x1xf32>
    %164 = arith.addf %160, %163 : vector<2x14x1xf32>
    %165 = math.rsqrt %164 : vector<2x14x1xf32>
    %166 = vector.broadcast %165 : vector<2x14x1xf32> to vector<2x14x16xf32>
    %167 = arith.mulf %162, %166 : vector<2x14x16xf32>
    %168 = vector.shape_cast %147 : vector<1x16xf32> to vector<1x1x16xf32>
    %169 = vector.broadcast %168 : vector<1x1x16xf32> to vector<2x14x16xf32>
    %170 = arith.mulf %167, %169 : vector<2x14x16xf32>
    %171 = vector.shape_cast %149 : vector<1x16xf32> to vector<1x1x16xf32>
    %172 = vector.broadcast %171 : vector<1x1x16xf32> to vector<2x14x16xf32>
    %173 = arith.addf %170, %172 : vector<2x14x16xf32>
    %174 = vector.extract_strided_slice %173 {offsets = [0, 0, 8], sizes = [2, 14, 8], strides = [1, 1, 1]} : vector<2x14x16xf32> to vector<2x14x8xf32>
    %175 = vector.extract_strided_slice %173 {offsets = [0, 0, 0], sizes = [2, 14, 8], strides = [1, 1, 1]} : vector<2x14x16xf32> to vector<2x14x8xf32>
    %176 = tpu.concatenate %174, %175 in 2 : vector<2x14x8xf32>, vector<2x14x8xf32> -> vector<2x14x16xf32>
    %177 = vector.shape_cast %8 : vector<14x16xf32> to vector<1x14x16xf32>
    %178 = vector.broadcast %177 : vector<1x14x16xf32> to vector<2x14x16xf32>
    %179 = arith.mulf %173, %178 : vector<2x14x16xf32>
    %180 = vector.shape_cast %9 : vector<14x16xf32> to vector<1x14x16xf32>
    %181 = vector.broadcast %180 : vector<1x14x16xf32> to vector<2x14x16xf32>
    %182 = arith.mulf %176, %181 : vector<2x14x16xf32>
    %183 = arith.addf %179, %182 : vector<2x14x16xf32>
    %184 = arith.truncf %145 : vector<2x14x16xf32> to vector<2x14x16xbf16>
    %185 = arith.truncf %183 : vector<2x14x16xf32> to vector<2x14x16xbf16>
    %cst_66 = arith.constant dense<0.000000e+00> : vector<2x14x14xf32>
    %186 = tpu.matmul %184, %185, %cst_66 {dimension_numbers = #tpu.dot_dimension_numbers<[2], [2], [1], [1], [0, 0, 0, 1, 1, 1], [0], [0]>} : vector<2x14x16xbf16>, vector<2x14x16xbf16>, vector<2x14x14xf32> -> vector<2x14x14xf32>
    %cst_67 = arith.constant dense<0xFF800000> : vector<2x14xf32>
    %187 = vector.multi_reduction <maximumf>, %186, %cst_67 [2] : vector<2x14x14xf32> to vector<2x14xf32>
    %188 = vector.shape_cast %187 : vector<2x14xf32> to vector<2x14x1xf32>
    %189 = vector.broadcast %188 : vector<2x14x1xf32> to vector<2x14x14xf32>
    %190 = arith.subf %186, %189 : vector<2x14x14xf32>
    %191 = math.exp %190 : vector<2x14x14xf32>
    %cst_68 = arith.constant dense<0.000000e+00> : vector<2x14xf32>
    %192 = vector.multi_reduction <add>, %191, %cst_68 [2] : vector<2x14x14xf32> to vector<2x14xf32>
    %193 = vector.shape_cast %192 : vector<2x14xf32> to vector<2x14x1xf32>
    %194 = tpu.reciprocal %193 {approx = true} : vector<2x14x1xf32> -> vector<2x14x1xf32>
    %195 = vector.broadcast %194 : vector<2x14x1xf32> to vector<2x14x14xf32>
    %196 = arith.mulf %191, %195 : vector<2x14x14xf32>
    %197 = arith.truncf %196 : vector<2x14x14xf32> to vector<2x14x14xbf16>
    %198 = arith.truncf %105 : vector<2x14x16xf32> to vector<2x14x16xbf16>
    %cst_69 = arith.constant dense<0.000000e+00> : vector<2x14x16xf32>
    %199 = tpu.matmul %197, %198, %cst_69 {dimension_numbers = #tpu.dot_dimension_numbers<[2], [1], [1], [2], [0, 0, 0, 1, 1, 2], [0], [0]>} : vector<2x14x14xbf16>, vector<2x14x16xbf16>, vector<2x14x16xf32> -> vector<2x14x16xf32>
    %200 = vector.extract_strided_slice %199 {offsets = [0, 0, 0], sizes = [1, 14, 16], strides = [1, 1, 1]} : vector<2x14x16xf32> to vector<1x14x16xf32>
    %201 = vector.shape_cast %200 : vector<1x14x16xf32> to vector<14x16xf32>
    %202 = arith.truncf %201 : vector<14x16xf32> to vector<14x16xbf16>
    %c0_70 = arith.constant 0 : index
    %c0_71 = arith.constant 0 : index
    %c0_72 = arith.constant 0 : index
    %203 = vector.load %arg19[%c0_70, %c0_71, %c0_72] : memref<1x32x32xbf16, #tpu.memory_space<vmem>>, vector<1x16x32xbf16>
    %204 = vector.shape_cast %203 : vector<1x16x32xbf16> to vector<16x32xbf16>
    %cst_73 = arith.constant dense<0.000000e+00> : vector<14x32xf32>
    %205 = tpu.matmul %202, %204, %cst_73 {dimension_numbers = #tpu.dot_dimension_numbers<[1], [0], [0], [1], [0, 0, 1, 1], [], []>} : vector<14x16xbf16>, vector<16x32xbf16>, vector<14x32xf32> -> vector<14x32xf32>
    %206 = vector.extract_strided_slice %199 {offsets = [1, 0, 0], sizes = [1, 14, 16], strides = [1, 1, 1]} : vector<2x14x16xf32> to vector<1x14x16xf32>
    %207 = vector.shape_cast %206 : vector<1x14x16xf32> to vector<14x16xf32>
    %208 = arith.truncf %207 : vector<14x16xf32> to vector<14x16xbf16>
    %c0_74 = arith.constant 0 : index
    %c16 = arith.constant 16 : index
    %c0_75 = arith.constant 0 : index
    %209 = vector.load %arg19[%c0_74, %c16, %c0_75] : memref<1x32x32xbf16, #tpu.memory_space<vmem>>, vector<1x16x32xbf16>
    %210 = vector.shape_cast %209 : vector<1x16x32xbf16> to vector<16x32xbf16>
    %cst_76 = arith.constant dense<0.000000e+00> : vector<14x32xf32>
    %211 = tpu.matmul %208, %210, %cst_76 {dimension_numbers = #tpu.dot_dimension_numbers<[1], [0], [0], [1], [0, 0, 1, 1], [], []>} : vector<14x16xbf16>, vector<16x32xbf16>, vector<14x32xf32> -> vector<14x32xf32>
    %212 = arith.addf %205, %211 : vector<14x32xf32>
    %c0_77 = arith.constant 0 : index
    %c0_78 = arith.constant 0 : index
    %c0_79 = arith.constant 0 : index
    %213 = vector.load %arg20[%c0_77, %c0_78, %c0_79] : memref<1x1x32xf32, #tpu.memory_space<vmem>>, vector<1x1x32xf32>
    %214 = vector.shape_cast %213 : vector<1x1x32xf32> to vector<1x32xf32>
    %215 = vector.broadcast %214 : vector<1x32xf32> to vector<14x32xf32>
    %216 = arith.addf %212, %215 : vector<14x32xf32>
    %217 = arith.mulf %38, %216 : vector<14x32xf32>
    %218 = arith.addf %4, %217 : vector<14x32xf32>
    %c0_80 = arith.constant 0 : index
    %c0_81 = arith.constant 0 : index
    %c0_82 = arith.constant 0 : index
    %c0_83 = arith.constant 0 : index
    %219 = vector.load %arg4[%c0_80, %c0_81, %c0_82, %c0_83] : memref<1x1x6x32xf32, #tpu.memory_space<vmem>>, vector<1x1x6x32xf32>
    %220 = vector.shape_cast %219 : vector<1x1x6x32xf32> to vector<6x32xf32>
    %221 = vector.extract_strided_slice %220 {offsets = [3, 0], sizes = [1, 32], strides = [1, 1]} : vector<6x32xf32> to vector<1x32xf32>
    %222 = vector.extract_strided_slice %220 {offsets = [0, 0], sizes = [1, 32], strides = [1, 1]} : vector<6x32xf32> to vector<1x32xf32>
    %223 = vector.shape_cast %7 : vector<14x1xi1> to vector<14x1xi1>
    %224 = vector.broadcast %223 : vector<14x1xi1> to vector<14x32xi1>
    %225 = vector.shape_cast %221 : vector<1x32xf32> to vector<1x32xf32>
    %226 = vector.broadcast %225 : vector<1x32xf32> to vector<14x32xf32>
    %227 = vector.shape_cast %222 : vector<1x32xf32> to vector<1x32xf32>
    %228 = vector.broadcast %227 : vector<1x32xf32> to vector<14x32xf32>
    %229 = arith.select %224, %226, %228 : vector<14x32xi1>, vector<14x32xf32>
    %230 = vector.extract_strided_slice %220 {offsets = [4, 0], sizes = [1, 32], strides = [1, 1]} : vector<6x32xf32> to vector<1x32xf32>
    %231 = vector.extract_strided_slice %220 {offsets = [1, 0], sizes = [1, 32], strides = [1, 1]} : vector<6x32xf32> to vector<1x32xf32>
    %232 = vector.shape_cast %7 : vector<14x1xi1> to vector<14x1xi1>
    %233 = vector.broadcast %232 : vector<14x1xi1> to vector<14x32xi1>
    %234 = vector.shape_cast %230 : vector<1x32xf32> to vector<1x32xf32>
    %235 = vector.broadcast %234 : vector<1x32xf32> to vector<14x32xf32>
    %236 = vector.shape_cast %231 : vector<1x32xf32> to vector<1x32xf32>
    %237 = vector.broadcast %236 : vector<1x32xf32> to vector<14x32xf32>
    %238 = arith.select %233, %235, %237 : vector<14x32xi1>, vector<14x32xf32>
    %239 = vector.extract_strided_slice %220 {offsets = [5, 0], sizes = [1, 32], strides = [1, 1]} : vector<6x32xf32> to vector<1x32xf32>
    %240 = vector.extract_strided_slice %220 {offsets = [2, 0], sizes = [1, 32], strides = [1, 1]} : vector<6x32xf32> to vector<1x32xf32>
    %241 = vector.shape_cast %7 : vector<14x1xi1> to vector<14x1xi1>
    %242 = vector.broadcast %241 : vector<14x1xi1> to vector<14x32xi1>
    %243 = vector.shape_cast %239 : vector<1x32xf32> to vector<1x32xf32>
    %244 = vector.broadcast %243 : vector<1x32xf32> to vector<14x32xf32>
    %245 = vector.shape_cast %240 : vector<1x32xf32> to vector<1x32xf32>
    %246 = vector.broadcast %245 : vector<1x32xf32> to vector<14x32xf32>
    %247 = arith.select %242, %244, %246 : vector<14x32xi1>, vector<14x32xf32>
    %c0_84 = arith.constant 0 : index
    %c0_85 = arith.constant 0 : index
    %c0_86 = arith.constant 0 : index
    %248 = vector.load %arg21[%c0_84, %c0_85, %c0_86] : memref<1x1x32xf32, #tpu.memory_space<vmem>>, vector<1x1x32xf32>
    %249 = vector.shape_cast %248 : vector<1x1x32xf32> to vector<1x32xf32>
    %c0_87 = arith.constant 0 : index
    %c0_88 = arith.constant 0 : index
    %c0_89 = arith.constant 0 : index
    %250 = vector.load %arg22[%c0_87, %c0_88, %c0_89] : memref<1x1x32xf32, #tpu.memory_space<vmem>>, vector<1x1x32xf32>
    %251 = vector.shape_cast %250 : vector<1x1x32xf32> to vector<1x32xf32>
    %cst_90 = arith.constant dense<0.000000e+00> : vector<14xf32>
    %252 = vector.multi_reduction <add>, %218, %cst_90 [1] : vector<14x32xf32> to vector<14xf32>
    %253 = vector.shape_cast %252 : vector<14xf32> to vector<14x1xf32>
    %cst_91 = arith.constant 3.200000e+01 : f32
    %254 = vector.broadcast %cst_91 : f32 to vector<14x1xf32>
    %255 = arith.divf %253, %254 : vector<14x1xf32>
    %256 = vector.broadcast %255 : vector<14x1xf32> to vector<14x32xf32>
    %257 = arith.subf %218, %256 : vector<14x32xf32>
    %258 = arith.mulf %257, %257 : vector<14x32xf32>
    %cst_92 = arith.constant dense<0.000000e+00> : vector<14xf32>
    %259 = vector.multi_reduction <add>, %258, %cst_92 [1] : vector<14x32xf32> to vector<14xf32>
    %260 = vector.shape_cast %259 : vector<14xf32> to vector<14x1xf32>
    %cst_93 = arith.constant 3.200000e+01 : f32
    %261 = vector.broadcast %cst_93 : f32 to vector<14x1xf32>
    %262 = arith.divf %260, %261 : vector<14x1xf32>
    %263 = vector.broadcast %255 : vector<14x1xf32> to vector<14x32xf32>
    %264 = arith.subf %218, %263 : vector<14x32xf32>
    %cst_94 = arith.constant 9.99999974E-6 : f32
    %265 = vector.broadcast %cst_94 : f32 to vector<14x1xf32>
    %266 = arith.addf %262, %265 : vector<14x1xf32>
    %267 = math.rsqrt %266 : vector<14x1xf32>
    %268 = vector.broadcast %267 : vector<14x1xf32> to vector<14x32xf32>
    %269 = arith.mulf %264, %268 : vector<14x32xf32>
    %270 = vector.broadcast %249 : vector<1x32xf32> to vector<14x32xf32>
    %271 = arith.mulf %269, %270 : vector<14x32xf32>
    %272 = vector.broadcast %251 : vector<1x32xf32> to vector<14x32xf32>
    %273 = arith.addf %271, %272 : vector<14x32xf32>
    %cst_95 = arith.constant 1.000000e+00 : f32
    %274 = vector.broadcast %cst_95 : f32 to vector<14x32xf32>
    %275 = arith.addf %274, %238 : vector<14x32xf32>
    %276 = arith.mulf %273, %275 : vector<14x32xf32>
    %277 = arith.addf %276, %229 : vector<14x32xf32>
    %278 = arith.truncf %277 : vector<14x32xf32> to vector<14x32xbf16>
    %c0_96 = arith.constant 0 : index
    %c0_97 = arith.constant 0 : index
    %c0_98 = arith.constant 0 : index
    %279 = vector.load %arg23[%c0_96, %c0_97, %c0_98] : memref<1x32x128xbf16, #tpu.memory_space<vmem>>, vector<1x32x128xbf16>
    %280 = vector.shape_cast %279 : vector<1x32x128xbf16> to vector<32x128xbf16>
    %cst_99 = arith.constant dense<0.000000e+00> : vector<14x128xf32>
    %281 = tpu.matmul %278, %280, %cst_99 {dimension_numbers = #tpu.dot_dimension_numbers<[1], [0], [0], [1], [0, 0, 1, 1], [], []>} : vector<14x32xbf16>, vector<32x128xbf16>, vector<14x128xf32> -> vector<14x128xf32>
    %c0_100 = arith.constant 0 : index
    %c0_101 = arith.constant 0 : index
    %c0_102 = arith.constant 0 : index
    %282 = vector.load %arg24[%c0_100, %c0_101, %c0_102] : memref<1x1x128xf32, #tpu.memory_space<vmem>>, vector<1x1x128xf32>
    %283 = vector.shape_cast %282 : vector<1x1x128xf32> to vector<1x128xf32>
    %284 = vector.broadcast %283 : vector<1x128xf32> to vector<14x128xf32>
    %285 = arith.addf %281, %284 : vector<14x128xf32>
    %286 = arith.mulf %285, %285 : vector<14x128xf32>
    %287 = arith.mulf %285, %286 : vector<14x128xf32>
    %cst_103 = arith.constant 4.471500e-02 : f32
    %288 = vector.broadcast %cst_103 : f32 to vector<14x128xf32>
    %289 = arith.mulf %288, %287 : vector<14x128xf32>
    %290 = arith.addf %285, %289 : vector<14x128xf32>
    %cst_104 = arith.constant 0.797884583 : f32
    %291 = vector.broadcast %cst_104 : f32 to vector<14x128xf32>
    %292 = arith.mulf %291, %290 : vector<14x128xf32>
    %293 = math.tanh %292 : vector<14x128xf32>
    %cst_105 = arith.constant 1.000000e+00 : f32
    %294 = vector.broadcast %cst_105 : f32 to vector<14x128xf32>
    %295 = arith.addf %294, %293 : vector<14x128xf32>
    %cst_106 = arith.constant 5.000000e-01 : f32
    %296 = vector.broadcast %cst_106 : f32 to vector<14x128xf32>
    %297 = arith.mulf %296, %295 : vector<14x128xf32>
    %298 = arith.mulf %285, %297 : vector<14x128xf32>
    %299 = arith.truncf %298 : vector<14x128xf32> to vector<14x128xbf16>
    %c0_107 = arith.constant 0 : index
    %c0_108 = arith.constant 0 : index
    %c0_109 = arith.constant 0 : index
    %300 = vector.load %arg25[%c0_107, %c0_108, %c0_109] : memref<1x128x32xbf16, #tpu.memory_space<vmem>>, vector<1x128x32xbf16>
    %301 = vector.shape_cast %300 : vector<1x128x32xbf16> to vector<128x32xbf16>
    %cst_110 = arith.constant dense<0.000000e+00> : vector<14x32xf32>
    %302 = tpu.matmul %299, %301, %cst_110 {dimension_numbers = #tpu.dot_dimension_numbers<[1], [0], [0], [1], [0, 0, 1, 1], [], []>} : vector<14x128xbf16>, vector<128x32xbf16>, vector<14x32xf32> -> vector<14x32xf32>
    %c0_111 = arith.constant 0 : index
    %c0_112 = arith.constant 0 : index
    %c0_113 = arith.constant 0 : index
    %303 = vector.load %arg26[%c0_111, %c0_112, %c0_113] : memref<1x1x32xf32, #tpu.memory_space<vmem>>, vector<1x1x32xf32>
    %304 = vector.shape_cast %303 : vector<1x1x32xf32> to vector<1x32xf32>
    %305 = vector.broadcast %304 : vector<1x32xf32> to vector<14x32xf32>
    %306 = arith.addf %302, %305 : vector<14x32xf32>
    %307 = arith.mulf %247, %306 : vector<14x32xf32>
    %308 = arith.addf %218, %307 : vector<14x32xf32>
    %c0_114 = arith.constant 0 : index
    %c0_115 = arith.constant 0 : index
    %c0_116 = arith.constant 0 : index
    %309 = vector.load %arg27[%c0_114, %c0_115, %c0_116] : memref<1x14x32xf32, #tpu.memory_space<vmem>>, vector<1x14x32xf32>
    %310 = vector.shape_cast %309 : vector<1x14x32xf32> to vector<14x32xf32>
    %311 = vector.shape_cast %308 : vector<14x32xf32> to vector<1x14x32xf32>
    tpu.vector_store %arg27[%c0_114, %c0_115, %c0_116], %311 {strides = array<i32>} : memref<1x14x32xf32, #tpu.memory_space<vmem>>, vector<1x14x32xf32>,
    return
  }
  func.func @transform_0(%arg0: i32, %arg1: i32) -> (i32, i32, i32) {
    %c0_i32 = arith.constant 0 : i32
    %c0_i32_0 = arith.constant 0 : i32
    %c0_i32_1 = arith.constant 0 : i32
    return %arg0, %c0_i32, %c0_i32_0 : i32, i32, i32
  }
  func.func @transform_1(%arg0: i32, %arg1: i32) -> (i32, i32, i32, i32) {
    %c0_i32 = arith.constant 0 : i32
    %c0_i32_0 = arith.constant 0 : i32
    %c0_i32_1 = arith.constant 0 : i32
    return %arg0, %arg1, %c0_i32, %c0_i32_0 : i32, i32, i32, i32
  }
  func.func @transform_2(%arg0: i32, %arg1: i32) -> (i32, i32, i32, i32) {
    %c0_i32 = arith.constant 0 : i32
    %c0_i32_0 = arith.constant 0 : i32
    %c0_i32_1 = arith.constant 0 : i32
    return %arg0, %arg1, %c0_i32, %c0_i32_0 : i32, i32, i32, i32
  }
  func.func @transform_3(%arg0: i32, %arg1: i32) -> (i32, i32) {
    %c0_i32 = arith.constant 0 : i32
    %c0_i32_0 = arith.constant 0 : i32
    %c0_i32_1 = arith.constant 0 : i32
    return %c0_i32, %c0_i32_0 : i32, i32
  }
  func.func @transform_4(%arg0: i32, %arg1: i32) -> (i32, i32) {
    %c0_i32 = arith.constant 0 : i32
    %c0_i32_0 = arith.constant 0 : i32
    %c0_i32_1 = arith.constant 0 : i32
    return %c0_i32, %c0_i32_0 : i32, i32
  }
  func.func @transform_5(%arg0: i32, %arg1: i32) -> (i32, i32, i32) {
    %c0_i32 = arith.constant 0 : i32
    %c0_i32_0 = arith.constant 0 : i32
    %c0_i32_1 = arith.constant 0 : i32
    return %arg1, %c0_i32, %c0_i32_0 : i32, i32, i32
  }
  func.func @transform_6(%arg0: i32, %arg1: i32) -> (i32, i32, i32) {
    %c0_i32 = arith.constant 0 : i32
    %c0_i32_0 = arith.constant 0 : i32
    %c0_i32_1 = arith.constant 0 : i32
    return %arg1, %c0_i32, %c0_i32_0 : i32, i32, i32
  }
  func.func @transform_7(%arg0: i32, %arg1: i32) -> (i32, i32, i32) {
    %c0_i32 = arith.constant 0 : i32
    %c0_i32_0 = arith.constant 0 : i32
    %c0_i32_1 = arith.constant 0 : i32
    return %arg1, %c0_i32, %c0_i32_0 : i32, i32, i32
  }
  func.func @transform_8(%arg0: i32, %arg1: i32) -> (i32, i32, i32) {
    %c0_i32 = arith.constant 0 : i32
    %c0_i32_0 = arith.constant 0 : i32
    %c0_i32_1 = arith.constant 0 : i32
    return %arg1, %c0_i32, %c0_i32_0 : i32, i32, i32
  }
  func.func @transform_9(%arg0: i32, %arg1: i32) -> (i32, i32, i32) {
    %c0_i32 = arith.constant 0 : i32
    %c0_i32_0 = arith.constant 0 : i32
    %c0_i32_1 = arith.constant 0 : i32
    return %arg1, %c0_i32, %c0_i32_0 : i32, i32, i32
  }
  func.func @transform_10(%arg0: i32, %arg1: i32) -> (i32, i32, i32) {
    %c0_i32 = arith.constant 0 : i32
    %c0_i32_0 = arith.constant 0 : i32
    %c0_i32_1 = arith.constant 0 : i32
    return %arg1, %c0_i32, %c0_i32_0 : i32, i32, i32
  }
  func.func @transform_11(%arg0: i32, %arg1: i32) -> (i32, i32, i32) {
    %c0_i32 = arith.constant 0 : i32
    %c0_i32_0 = arith.constant 0 : i32
    %c0_i32_1 = arith.constant 0 : i32
    return %arg1, %c0_i32, %c0_i32_0 : i32, i32, i32
  }
  func.func @transform_12(%arg0: i32, %arg1: i32) -> (i32, i32, i32) {
    %c0_i32 = arith.constant 0 : i32
    %c0_i32_0 = arith.constant 0 : i32
    %c0_i32_1 = arith.constant 0 : i32
    return %arg1, %c0_i32, %c0_i32_0 : i32, i32, i32
  }
  func.func @transform_13(%arg0: i32, %arg1: i32) -> (i32, i32, i32) {
    %c0_i32 = arith.constant 0 : i32
    %c0_i32_0 = arith.constant 0 : i32
    %c0_i32_1 = arith.constant 0 : i32
    return %arg1, %c0_i32, %c0_i32_0 : i32, i32, i32
  }
  func.func @transform_14(%arg0: i32, %arg1: i32) -> (i32, i32, i32) {
    %c0_i32 = arith.constant 0 : i32
    %c0_i32_0 = arith.constant 0 : i32
    %c0_i32_1 = arith.constant 0 : i32
    return %arg1, %c0_i32, %c0_i32_0 : i32, i32, i32
  }
  func.func @transform_15(%arg0: i32, %arg1: i32) -> (i32, i32, i32) {
    %c0_i32 = arith.constant 0 : i32
    %c0_i32_0 = arith.constant 0 : i32
    %c0_i32_1 = arith.constant 0 : i32
    return %arg1, %c0_i32, %c0_i32_0 : i32, i32, i32
  }
  func.func @transform_16(%arg0: i32, %arg1: i32) -> (i32, i32, i32) {
    %c0_i32 = arith.constant 0 : i32
    %c0_i32_0 = arith.constant 0 : i32
    %c0_i32_1 = arith.constant 0 : i32
    return %arg1, %c0_i32, %c0_i32_0 : i32, i32, i32
  }
  func.func @transform_17(%arg0: i32, %arg1: i32) -> (i32, i32, i32) {
    %c0_i32 = arith.constant 0 : i32
    %c0_i32_0 = arith.constant 0 : i32
    %c0_i32_1 = arith.constant 0 : i32
    return %arg1, %c0_i32, %c0_i32_0 : i32, i32, i32
  }
  func.func @transform_18(%arg0: i32, %arg1: i32) -> (i32, i32, i32) {
    %c0_i32 = arith.constant 0 : i32
    %c0_i32_0 = arith.constant 0 : i32
    %c0_i32_1 = arith.constant 0 : i32
    return %arg1, %c0_i32, %c0_i32_0 : i32, i32, i32
  }
  func.func @transform_19(%arg0: i32, %arg1: i32) -> (i32, i32, i32) {
    %c0_i32 = arith.constant 0 : i32
    %c0_i32_0 = arith.constant 0 : i32
    %c0_i32_1 = arith.constant 0 : i32
    return %arg1, %c0_i32, %c0_i32_0 : i32, i32, i32
  }
  func.func @transform_20(%arg0: i32, %arg1: i32) -> (i32, i32, i32) {
    %c0_i32 = arith.constant 0 : i32
    %c0_i32_0 = arith.constant 0 : i32
    %c0_i32_1 = arith.constant 0 : i32
    return %arg1, %c0_i32, %c0_i32_0 : i32, i32, i32
  }
  func.func @transform_21(%arg0: i32, %arg1: i32) -> (i32, i32, i32) {
    %c0_i32 = arith.constant 0 : i32
    %c0_i32_0 = arith.constant 0 : i32
    %c0_i32_1 = arith.constant 0 : i32
    return %arg1, %c0_i32, %c0_i32_0 : i32, i32, i32
  }
  func.func @transform_22(%arg0: i32, %arg1: i32) -> (i32, i32, i32) {
    %c0_i32 = arith.constant 0 : i32
    %c0_i32_0 = arith.constant 0 : i32
    %c0_i32_1 = arith.constant 0 : i32
    return %arg1, %c0_i32, %c0_i32_0 : i32, i32, i32
  }
  func.func @transform_23(%arg0: i32, %arg1: i32) -> (i32, i32, i32) {
    %c0_i32 = arith.constant 0 : i32
    %c0_i32_0 = arith.constant 0 : i32
    %c0_i32_1 = arith.constant 0 : i32
    return %arg1, %c0_i32, %c0_i32_0 : i32, i32, i32
  }
  func.func @transform_24(%arg0: i32, %arg1: i32) -> (i32, i32, i32) {
    %c0_i32 = arith.constant 0 : i32
    %c0_i32_0 = arith.constant 0 : i32
    %c0_i32_1 = arith.constant 0 : i32
    return %arg1, %c0_i32, %c0_i32_0 : i32, i32, i32
  }
  func.func @transform_25(%arg0: i32, %arg1: i32) -> (i32, i32, i32) {
    %c0_i32 = arith.constant 0 : i32
    %c0_i32_0 = arith.constant 0 : i32
    %c0_i32_1 = arith.constant 0 : i32
    return %arg0, %c0_i32, %c0_i32_0 : i32, i32, i32
  }
}

</mosaic_0001>

<bundles_post_ra>
// kernel: _lambda_.10
= control target key start
LH: loop header
LB: loop body
LE: loop exit
PB: predicated region body
PF: predicated region fallthrough
CT: control target
= control target key end

     0   :  { %8 = vsyncpa [#allocation3], 0  ;;  %s629_s0 = inlined_call_operand.hbm [shape: f32[6,16,16], index: 0, kind: input, shape index: {}]   ;;  %s630_s1 = inlined_call_operand.vmem [shape: f32[32,16], index: 1, kind: input, shape index: {}]   ;;  %s631_s2 = inlined_call_operand.vmem [shape: f32[16,48], index: 2, kind: input, shape index: {}]   ;;  %s632_s3 = inlined_call_operand.vmem [shape: f32[6,32,48], index: 3, kind: output, shape index: {}]  }
   0x1   :  { %10 = vsyncpa [#allocation3 + $0x1], 0  ;;  %s511_s12 = smov 0   ;;  %s513_s13 = smov 0  }
   0x2   :  { %s515_s14 = smov 0   ;;  %s517_s15 = smov 0  }
   0x3 LB: > { %s530_s16 = sadd.s32 4294967295, %s487_s15   ;;  %s533_s17 = sadd.s32 1, %s487_s15   ;;  %s487_s15 = sphi %s517_s15, %s639_s15   ;;  %s483_s14 = sphi %s515_s14, %s638_s14   ;;  %s479_s13 = sphi %s513_s13, %s637_s13   ;;  %s475_s12 = sphi %s511_s12, %s636_s12  }
   0x4   : > { %s20_s18 = ssub.s32 %s487_s15, %s533_s17  ;;  %s23_s19 = sadd.s32 1, %s483_s14 }
   0x5   : > { %p21_p0 = scmp.eq.s32.totalorder %s20_s18, 0  ;;  %p30_p1 = scmp.ne.s32.totalorder %s483_s14, %s479_s13 }
   0x6   : > { %p31_p2 = scmp.eq.s32.totalorder %s487_s15, 0  ;;  %p36_p3 = scmp.ne.s32.totalorder %s479_s13, %s475_s12 }
   0x7   : > { %s543_s20 = scalar_select %p21_p0, %s483_s14, %s23_s19  }
   0x8   : > { %p545_p4 = por %p31_p2, %p30_p1  ;;  %p37_p5 = scmp.eq.s32.totalorder %s530_s16, 0 }
   0x9   : > { %p388_p6 = scmp.lt.s32.totalorder %s487_s15, 6  ;;  %s134_s23 = sand.u32 1, %s483_s14  }
   0xa   : > { %p551_p7 = por %p37_p5, %p36_p3  ;;  %s359_s24 = sshll.u32 %s134_s23, 4 }
   0xb   : > { %s376_s25 = sshll.u32 %s487_s15, 4  ;;  %s138_s29 = scalar_lea.vmem [#allocation2], %s359_s24 }
   0xc   : > { %s143_s28 = scalar_lea.hbm %s629_s0, %s376_s25  ;;  %s146_s30 = sshll.u32 %s138_s29, 4  ;;  %s147_s30 = int_to_ptr.vmem [resolvable:$true] %s146_s30 }
   0xd   : > { %s144_s4 = sshll.u32 %s143_s28, 4  ;;  %p562_p8 = pnand %p388_p6, %p545_p4  ;;  %s145_s4 = int_to_ptr.hbm [resolvable:$true] %s144_s4 }
   0xe   : > { %p362_p9 = scmp.ge.s32.totalorder %s487_s15, 1  ;;  %s135_s6 = scalar_lea.sflag [#allocation3], %s134_s23 }
   0xf   : > { %s423_s7 = sshra.s32 %s145_s4, 4  ;;  %p427_p11 = pneg %p562_p8  ;;  %s424_s7 = int_to_ptr.hbm [resolvable:$true] %s423_s7 }
  0x10   : > { %s425_s8 = scalar_lea.hbm %s424_s7, 16  ;;  %s430_s11 = scalar_lea.hbm %s629_s0, 96 }
  0x11   : > { %p426_p10 = scmp.ne.s32.totalorder %s424_s7, %s425_s8  ;;  %p431_p0 = scmp.lt.s32.totalorder %s424_s7, %s629_s0 }
  0x12   : > { %p432_p1 = scmp.lt.s32.totalorder %s430_s11, %s425_s8 }
  0x13   : > { %p428_p12 = pnand %p427_p11, %p426_p10 }
  0x14   : > { %p433_p2 = por %p432_p1, %p431_p0 }
  0x15   : > { %p429_p13 = pneg %p428_p12 }
  0x17   : > { %p434_p3 = pnand %p433_p2, %p429_p13 }
  0x19   : > { %437 = shalt.err (!%p434_p3)
}
  0x1a   : > { %s489_s19 = smov 128   ;;  %s490_s21 = smov 8  }
  0x1b   : > { %387 = dma.hbm_to_vmem [thread:$0]  (!%p562_p8), %s145_s4, 256, %s147_s30, %s135_s6, %s489_s19, %s489_s19, %s490_s21  }
  0x1c   : > { %p154_p4 = scmp.lt.s32.totalorder %s487_s15, 7 }
  0x1e   : > { %p155_p5 = pnand %p362_p9, %p154_p4 }
  0x1f   : > { %s160_s23 = sand.u32 (!%p155_p5), 1, %s479_s13  }
  0x20   : > { %158 = sbr.rel (%p155_p5) target bundleno = 315 (0x13b), region = 32  ;;  %s363_s24 = sshll.u32 (!%p155_p5), %s160_s23, 4 }
  0x21   : > { %s161_s25 = scalar_lea.sflag (!%p155_p5), [#allocation3], %s160_s23  ;;  %s164_s26 = scalar_lea.vmem (!%p155_p5), [#allocation2], %s363_s24 }
  0x25   : > { %470 = dma.done.wait (%p551_p7), %s161_s25, 256  }
  0x26   : > { %472 = vsyncadd (%p551_p7), %s161_s25, 4294967040  ;;  %v198_v0 = vld [vmem:[%s164_s26 + $0x8] sm:$0xff]  ;;  %v197_v1 = vld [vmem:[%s164_s26] sm:$0xff]  ;;  %vm199_vm0 = vcmask 130048   ;;  %p188_p6 = scmp.lt.s32.totalorder %s530_s16, 5  ;;  %vm284_vm1 = vcmask 392192  }
  0x27   : > { %378 = vmatpush.msra.mxu2 %v198_v0  ;;  %v195_v2 = vld [vmem:[%s630_s1 + $0x10] sm:$0xff]  ;;  %226 = vmatpush.msra.mxu0 %v198_v0  ;;  %v193_v3 = vld [vmem:[%s630_s1] sm:$0xff]  ;;  %v242_v4 = vld [vmem:[%s631_s2 + $0x8] sm:$0xff] }
  0x28   : > { %380 = vmatpush.msra.mxu3 %v242_v4  ;;  %269 = vmatpush.msra.mxu1 %v242_v4  ;;  %v196_v5 = vld [vmem:[%s630_s1 + $0x18] sm:$0xff]  ;;  %v194_v6 = vld [vmem:[%s630_s1 + $0x8] sm:$0xff]  ;;  %v241_v7 = vld [vmem:[%s631_s2] sm:$0xff]  ;;  %s641_s16 = smov (!%p188_p6, %s530_s16), 5 }
  0x29   : > { %379 = vmatpush.msra.mxu2 %v197_v1  ;;  %227 = vmatpush.msra.mxu0 %v197_v1  ;;  %s377_s10 = sshll.u32 %s641_s16, 5 }
  0x2a   : > { %368 = vmatmul.msk.f32.vlgmr.msra.gmra.mxu2 %vm199_vm0, %v195_v2  ;;  %366 = vmatmul.msk.f32.vlgmr.msra.gmra.mxu0 %vm199_vm0, %v193_v3  ;;  %s192_s18 = scalar_lea.vmem %s632_s3, %s377_s10 }
  0x2b   : > { %381 = vmatpush.msra.mxu3 %v241_v7  ;;  %270 = vmatpush.msra.mxu1 %v241_v7 }
  0x32   : > { %369 = vmatmul.msk.f32.gmra.mxu2 %vm199_vm0, %v196_v5  ;;  %367 = vmatmul.msk.f32.gmra.mxu0 %vm199_vm0, %v194_v6 }
  0xa7   : > { %v229_v8 = vpop.f32.mrf.mxu0 }
  0xa8   : > { %370 = vmatmul.msk.f32.vlgmr.msra.gmra.mxu1 %vm199_vm0, %v229_v8 }
  0xad   : > { %v235_v9 = vpop.f32.mrf.mxu2 }
  0xae   : > { %372 = vmatmul.msk.f32.vlgmr.msra.gmra.mxu3 %vm199_vm0, %v235_v9 }
  0xaf   : > { %v232_v10 = vpop.f32.mrf.mxu0 }
  0xb0   : > { %371 = vmatmul.msk.f32.gmra.mxu1 %vm199_vm0, %v232_v10 }
  0xb5   : > { %v238_v11 = vpop.f32.mrf.mxu2 }
  0xb6   : > { %373 = vmatmul.msk.f32.gmra.mxu3 %vm199_vm0, %v238_v11 }
 0x125   : > { %v272_v12 = vpop.f32.mrf.mxu1 }
 0x126   : > { %285 = vst.msk [vmem:[%s192_s18] sm:$0xff] %vm284_vm1, %v272_v12 }
 0x12d   : > { %v275_v13 = vpop.f32.mrf.mxu1 }
 0x12e   : > { %286 = vst.msk [vmem:[%s192_s18 + $0x8] sm:$0xff] %vm284_vm1, %v275_v13 }
 0x131   : > { %v278_v14 = vpop.f32.mrf.mxu3 }
 0x132   : > { %287 = vst.msk [vmem:[%s192_s18 + $0x10] sm:$0xff] %vm284_vm1, %v278_v14 }
 0x139   : > { %v281_v15 = vpop.f32.mrf.mxu3 }
 0x13a   : > { %288 = vst.msk [vmem:[%s192_s18 + $0x18] sm:$0xff] %vm284_vm1, %v281_v15 }
 0x13b PF: > { %p13_p7 = scmp.ge.s32.totalorder %s533_s17, 8   ;;  %s636_s12 = smov %s479_s13 }
 0x13c   : > { %s637_s13 = smov %s483_s14  ;;  %s638_s14 = smov %s543_s20 }
 0x13d   : > { %s639_s15 = smov %s533_s17  ;;  %15 = sbr.rel (!%p13_p7) target bundleno = 3 (0x3), region = 72 }
 0x142   :  { %310 = vsyncpa [#allocation3], 1 }
 0x143   :  { %312 = vsyncpa [#allocation3 + $0x1], 1 }

// kernel: _lambda_.11
= control target key start
LH: loop header
LB: loop body
LE: loop exit
PB: predicated region body
PF: predicated region fallthrough
CT: control target
= control target key end

     0   :  { %vm161_vm0 = vcmask 523264   ;;  %vm19_vm1 = vcmask 64512   ;;  %v368_v30 = vmov 0.0   ;;  %s503_s1 = inlined_call_operand.vmem [shape: bf16[192,8], index: 1, kind: input, shape index: {}]   ;;  %s504_s0 = inlined_call_operand.vmem [shape: bf16[48,192], index: 0, kind: input, shape index: {}]   ;;  %s505_s2 = inlined_call_operand.vmem [shape: f32[1,8], index: 2, kind: input, shape index: {}]   ;;  %s506_s3 = inlined_call_operand.vmem [shape: f32[48,8], index: 3, kind: output, shape index: {}]  }
   0x1   :  { %v349_v0 = vld [vmem:[%s503_s1 + $0x38] sm:$0xff]  ;;  %v348_v2 = vld [vmem:[%s503_s1 + $0x30] sm:$0xff]  ;;  %v347_v4 = vld [vmem:[%s503_s1 + $0x28] sm:$0xff]  ;;  %22 = vst.msk [vmem:[#allocation2 + $0x10] sm:$0xff] %vm19_vm1, %v368_v30 }
   0x2   :  { %v353_v1 = vld [vmem:[%s503_s1 + $0x58] sm:$0xff]  ;;  %354 = vmatpush.bf16.msra.mxu2 %v349_v0  ;;  %171 = vmatpush.bf16.msra.mxu0 %v349_v0  ;;  %v352_v3 = vld [vmem:[%s503_s1 + $0x50] sm:$0xff]  ;;  %v351_v5 = vld [vmem:[%s503_s1 + $0x48] sm:$0xff]  ;;  %20 = vst.msk [vmem:[#allocation2] sm:$0xff] %vm19_vm1, %v368_v30 }
   0x3   :  { %362 = vmatpush.bf16.msra.mxu3 %v353_v1  ;;  %199 = vmatpush.bf16.msra.mxu1 %v353_v1  ;;  %v346_v6 = vld [vmem:[%s503_s1 + $0x20] sm:$0xff]  ;;  %v338_v8 = vld [vmem:[%s504_s0 + $0x14] sm:$0xf]  ;;  %v273_v9 = vld [vmem:[%s504_s0 + $0x18] sm:$0xf0]  ;;  %21 = vst.msk [vmem:[#allocation2 + $0x8] sm:$0xff] %vm19_vm1, %v368_v30 }
   0x4   :  { %v350_v7 = vld [vmem:[%s503_s1 + $0x40] sm:$0xff]  ;;  %v265_v11 = vld [vmem:[%s504_s0 + $0x8] sm:$0xf0]  ;;  %v345_v12 = vld [vmem:[%s503_s1 + $0x18] sm:$0xff]  ;;  %v276_v13 = vor.u32 %v338_v8, %v273_v9  ;;  %23 = vst.msk [vmem:[#allocation2 + $0x18] sm:$0xff] %vm19_vm1, %v368_v30 }
   0x5   :  { %v336_v10 = vld [vmem:[%s504_s0 + $0x4] sm:$0xf]  ;;  %v344_v15 = vld [vmem:[%s503_s1 + $0x10] sm:$0xff]  ;;  %v343_v16 = vld [vmem:[%s503_s1 + $0x8] sm:$0xff]  ;;  %24 = vst.msk [vmem:[#allocation2 + $0x20] sm:$0xff] %vm19_vm1, %v368_v30 }
   0x6   :  { %355 = vmatpush.bf16.msra.mxu2 %v348_v2  ;;  %172 = vmatpush.bf16.msra.mxu0 %v348_v2  ;;  %v268_v14 = vor.u32 %v336_v10, %v265_v11  ;;  %v342_v17 = vld [vmem:[%s503_s1] sm:$0xff]  ;;  %v271_v18 = vld [vmem:[%s504_s0 + $0x10] sm:$0xf]  ;;  %v339_v19 = vld [vmem:[%s504_s0 + $0x14] sm:$0xf0]  ;;  %25 = vst.msk [vmem:[#allocation2 + $0x28] sm:$0xff] %vm19_vm1, %v368_v30 }
   0x7   :  { %363 = vmatpush.bf16.msra.mxu3 %v352_v3  ;;  %200 = vmatpush.bf16.msra.mxu1 %v352_v3  ;;  %v340_v20 = vld [vmem:[%s504_s0 + $0x24] sm:$0xf]  ;;  %v281_v21 = vld [vmem:[%s504_s0 + $0x28] sm:$0xf0]  ;;  %v263_v22 = vld [vmem:[%s504_s0] sm:$0xf]  ;;  %v272_v24 = vor.u32 %v339_v19, %v271_v18 }
   0x8   :  { %v337_v23 = vld [vmem:[%s504_s0 + $0x4] sm:$0xf0]  ;;  %v284_v25 = vor.u32 %v340_v20, %v281_v21  ;;  %v279_v27 = vld [vmem:[%s504_s0 + $0x20] sm:$0xf]  ;;  %v28_v37 = vld [vmem:[#allocation2 + $0x10] sm:$0xff] }
   0x9   :  { %v264_v26 = vor.u32 %v337_v23, %v263_v22  ;;  %v341_v28 = vld [vmem:[%s504_s0 + $0x24] sm:$0xf0]  ;;  %v26_v34 = vld [vmem:[#allocation2] sm:$0xff] }
   0xa   :  { %356 = vmatpush.bf16.msra.mxu2 %v347_v4  ;;  %173 = vmatpush.bf16.msra.mxu0 %v347_v4  ;;  %v280_v29 = vor.u32 %v341_v28, %v279_v27  ;;  %v27_v43 = vld [vmem:[#allocation2 + $0x8] sm:$0xff]  ;;  %v367_v46 = vld [vmem:[%s505_s2] ss:$0 sm:$0xff] }
   0xb   :  { %364 = vmatpush.bf16.msra.mxu3 %v351_v5  ;;  %201 = vmatpush.bf16.msra.mxu1 %v351_v5  ;;  %v29_v49 = vld [vmem:[#allocation2 + $0x18] sm:$0xff] }
   0xc   :  { %v30_v58 = vld [vmem:[#allocation2 + $0x20] sm:$0xff] }
   0xd   :  { %v31_v2 = vld [vmem:[#allocation2 + $0x28] sm:$0xff] }
   0xe   :  { %357 = vmatpush.bf16.msra.mxu2 %v346_v6  ;;  %174 = vmatpush.bf16.msra.mxu0 %v346_v6 }
   0xf   :  { %365 = vmatpush.bf16.msra.mxu3 %v350_v7  ;;  %202 = vmatpush.bf16.msra.mxu1 %v350_v7 }
  0x12   :  { %358 = vmatpush.bf16.msra.mxu2 %v345_v12  ;;  %334 = vmatmul.msk.bf16.vlgmr.msra.gmra.mxu3 %vm161_vm0, %v276_v13 }
  0x13   :  { %175 = vmatpush.bf16.msra.mxu0 %v345_v12  ;;  %333 = vmatmul.msk.bf16.vlgmr.msra.gmra.mxu1 %vm161_vm0, %v268_v14 }
  0x16   :  { %359 = vmatpush.bf16.msra.mxu2 %v344_v15 }
  0x17   :  { %176 = vmatpush.bf16.msra.mxu0 %v344_v15 }
  0x1a   :  { %360 = vmatpush.bf16.msra.mxu2 %v343_v16 }
  0x1b   :  { %177 = vmatpush.bf16.msra.mxu0 %v343_v16 }
  0x1e   :  { %361 = vmatpush.bf16.msra.mxu2 %v342_v17 }
  0x1f   :  { %178 = vmatpush.bf16.msra.mxu0 %v342_v17 }
  0x21   :  { %184 = vmatmul.bf16.vlgmr.msra.gmra.mxu2 %v272_v24 }
  0x22   :  { %335 = vmatmul.msk.bf16.gmra.mxu3 %vm161_vm0, %v284_v25  ;;  %179 = vmatmul.bf16.vlgmr.msra.gmra.mxu0 %v264_v26 }
  0x31   :  { %189 = vmatmul.bf16.gmra.mxu2 %v280_v29 }
  0x90   :  { %v204_v31 = vpop.f32.mrf.mxu1 }
  0x95   :  { %v209_v32 = vpop.f32.mrf.mxu3 }
  0x98   :  { %v206_v40 = vpop.f32.mrf.mxu1 }
  0x9d   :  { %v211_v44 = vpop.f32.mrf.mxu3 }
  0x9f   :  { %v180_v33 = vpop.f32.mrf.mxu0 }
  0xa0   :  { %v205_v35 = vadd.f32 %v204_v31, %v180_v33 }
  0xa2   :  { %v219_v36 = vadd.f32 %v205_v35, %v26_v34 }
  0xa4   :  { %v185_v38 = vpop.f32.mrf.mxu2  ;;  %226 = vst.msk [vmem:[#allocation2] sm:$0xff] %vm19_vm1, %v219_v36 }
  0xa5   :  { %v210_v39 = vadd.f32 %v209_v32, %v185_v38  ;;  %v214_v56 = vpop.f32.mrf.mxu3 }
  0xa7   :  { %v221_v41 = vadd.f32 %v210_v39, %v28_v37  ;;  %v182_v42 = vpop.f32.mrf.mxu0 }
  0xa8   :  { %v207_v45 = vadd.f32 %v206_v40, %v182_v42 }
  0xa9   :  { %228 = vst.msk [vmem:[#allocation2 + $0x10] sm:$0xff] %vm19_vm1, %v221_v41 }
  0xaa   :  { %v220_v47 = vadd.f32 %v207_v45, %v27_v43 }
  0xab   :  { %v235_v48 = vld [vmem:[#allocation2] sm:$0xff] }
  0xac   :  { %v187_v50 = vpop.f32.mrf.mxu2  ;;  %v245_v51 = vadd.f32 %v367_v46, %v235_v48  ;;  %227 = vst.msk [vmem:[#allocation2 + $0x8] sm:$0xff] %vm19_vm1, %v220_v47 }
  0xad   :  { %v212_v52 = vadd.f32 %v211_v44, %v187_v50  ;;  %v216_v1 = vpop.f32.mrf.mxu3 }
  0xae   :  { %251 = vst.msk [vmem:[%s506_s3] sm:$0xff] %vm19_vm1, %v245_v51 }
  0xaf   :  { %v222_v53 = vadd.f32 %v212_v52, %v29_v49 }
  0xb0   :  { %v237_v54 = vld [vmem:[#allocation2 + $0x10] sm:$0xff] }
  0xb1   :  { %v247_v55 = vadd.f32 %v367_v46, %v237_v54  ;;  %229 = vst.msk [vmem:[#allocation2 + $0x18] sm:$0xff] %vm19_vm1, %v222_v53 }
  0xb3   :  { %253 = vst.msk [vmem:[%s506_s3 + $0x10] sm:$0xff] %vm19_vm1, %v247_v55  ;;  %v236_v57 = vld [vmem:[#allocation2 + $0x8] sm:$0xff] }
  0xb4   :  { %v190_v59 = vpop.f32.mrf.mxu2  ;;  %v246_v60 = vadd.f32 %v367_v46, %v236_v57 }
  0xb5   :  { %v215_v61 = vadd.f32 %v214_v56, %v190_v59 }
  0xb6   :  { %252 = vst.msk [vmem:[%s506_s3 + $0x8] sm:$0xff] %vm19_vm1, %v246_v60 }
  0xb7   :  { %v223_v62 = vadd.f32 %v215_v61, %v30_v58 }
  0xb8   :  { %v238_v63 = vld [vmem:[#allocation2 + $0x18] sm:$0xff] }
  0xb9   :  { %v248_v0 = vadd.f32 %v367_v46, %v238_v63  ;;  %230 = vst.msk [vmem:[#allocation2 + $0x20] sm:$0xff] %vm19_vm1, %v223_v62 }
  0xbb   :  { %254 = vst.msk [vmem:[%s506_s3 + $0x18] sm:$0xff] %vm19_vm1, %v248_v0 }
  0xbc   :  { %v192_v3 = vpop.f32.mrf.mxu2 }
  0xbd   :  { %v217_v4 = vadd.f32 %v216_v1, %v192_v3 }
  0xbf   :  { %v224_v5 = vadd.f32 %v217_v4, %v31_v2 }
  0xc0   :  { %v239_v6 = vld [vmem:[#allocation2 + $0x20] sm:$0xff] }
  0xc1   :  { %v249_v7 = vadd.f32 %v367_v46, %v239_v6  ;;  %231 = vst.msk [vmem:[#allocation2 + $0x28] sm:$0xff] %vm19_vm1, %v224_v5 }
  0xc3   :  { %255 = vst.msk [vmem:[%s506_s3 + $0x20] sm:$0xff] %vm19_vm1, %v249_v7 }
  0xc8   :  { %v240_v8 = vld [vmem:[#allocation2 + $0x28] sm:$0xff] }
  0xc9   :  { %v250_v9 = vadd.f32 %v367_v46, %v240_v8 }
  0xcb   :  { %256 = vst.msk [vmem:[%s506_s3 + $0x28] sm:$0xff] %vm19_vm1, %v250_v9 }

// kernel: _lambda_.13
= control target key start
LH: loop header
LB: loop body
LE: loop exit
PB: predicated region body
PF: predicated region fallthrough
CT: control target
= control target key end

     0   :  { %vm19_vm0 = vcmask 261120   ;;  %v118_v1 = vmov 0.0   ;;  %vm55_vm1 = vcmask 392192   ;;  %s166_s1 = inlined_call_operand.vmem [shape: bf16[48,32], index: 1, kind: input, shape index: {}]   ;;  %s167_s2 = inlined_call_operand.vmem [shape: f32[1,32], index: 2, kind: input, shape index: {}]   ;;  %s168_s0 = inlined_call_operand.vmem [shape: bf16[16,48], index: 0, kind: input, shape index: {}]   ;;  %s169_s3 = inlined_call_operand.vmem [shape: f32[16,32], index: 3, kind: output, shape index: {}]  }
   0x1   :  { %v115_v0 = vld [vmem:[%s166_s1 + $0x10] sm:$0xff]  ;;  %20 = vst.msk [vmem:[#allocation2] sm:$0xff] %vm19_vm0, %v118_v1  ;;  %v114_v2 = vld [vmem:[%s166_s1 + $0x8] sm:$0xff]  ;;  %v113_v3 = vld [vmem:[%s166_s1] sm:$0xff] }
   0x2   :  { %21 = vst.msk [vmem:[#allocation2 + $0x8] sm:$0xff] %vm19_vm0, %v118_v1  ;;  %64 = vmatpush.bf16.msra.mxu0 %v115_v0  ;;  %v112_v4 = vld [vmem:[%s168_s0] sm:$0xff] }
   0x3   :  { %v117_v9 = vld [vmem:[%s167_s2] ss:$0 sm:$0xff] }
   0x6   :  { %65 = vmatpush.bf16.msra.mxu0 %v114_v2 }
   0x8   :  { %v22_v5 = vld [vmem:[#allocation2] sm:$0xff] }
   0x9   :  { %v23_v8 = vld [vmem:[#allocation2 + $0x8] sm:$0xff] }
   0xa   :  { %66 = vmatpush.bf16.msra.mxu0 %v113_v3 }
   0xd   :  { %111 = vmatmul.msk.bf16.vlgmr.msra.gmra.mxu0 %vm55_vm1, %v112_v4 }
  0x8a   :  { %v68_v6 = vpop.f32.mrf.mxu0 }
  0x8b   :  { %v73_v7 = vadd.f32 %v68_v6, %v22_v5 }
  0x8d   :  { %76 = vst.msk [vmem:[#allocation2] sm:$0xff] %vm19_vm0, %v73_v7 }
  0x92   :  { %v70_v10 = vpop.f32.mrf.mxu0 }
  0x93   :  { %v74_v11 = vadd.f32 %v70_v10, %v23_v8 }
  0x94   :  { %v81_v12 = vld [vmem:[#allocation2] sm:$0xff] }
  0x95   :  { %v87_v13 = vadd.f32 %v117_v9, %v81_v12  ;;  %77 = vst.msk [vmem:[#allocation2 + $0x8] sm:$0xff] %vm19_vm0, %v74_v11 }
  0x97   :  { %89 = vst.msk [vmem:[%s169_s3] sm:$0xff] %vm19_vm0, %v87_v13 }
  0x9c   :  { %v82_v14 = vld [vmem:[#allocation2 + $0x8] sm:$0xff] }
  0x9d   :  { %v88_v15 = vadd.f32 %v117_v9, %v82_v14 }
  0x9f   :  { %90 = vst.msk [vmem:[%s169_s3 + $0x8] sm:$0xff] %vm19_vm0, %v88_v15 }

// kernel: _lambda_.12
= control target key start
LH: loop header
LB: loop body
LE: loop exit
PB: predicated region body
PF: predicated region fallthrough
CT: control target
= control target key end

     0   :  { %vm19_vm0 = vcmask 261120   ;;  %v94_v3 = vmov 0.0   ;;  %vm40_vm1 = vcmask 130048   ;;  %vm21_vm2 = vcmask 257024   ;;  %s139_s1 = inlined_call_operand.vmem [shape: bf16[16,32], index: 1, kind: input, shape index: {}]   ;;  %s140_s0 = inlined_call_operand.vmem [shape: bf16[12,16], index: 0, kind: input, shape index: {}]   ;;  %s141_s2 = inlined_call_operand.vmem [shape: f32[1,32], index: 2, kind: input, shape index: {}]   ;;  %s142_s3 = inlined_call_operand.vmem [shape: f32[12,32], index: 3, kind: output, shape index: {}]  }
   0x1   :  { %v91_v0 = vld [vmem:[%s139_s1] sm:$0xff]  ;;  %20 = vst.msk [vmem:[#allocation2] sm:$0xff] %vm19_vm0, %v94_v3 }
   0x2   :  { %v83_v1 = vld [vmem:[%s140_s0] sm:$0xf]  ;;  %v90_v2 = vld [vmem:[%s140_s0] sm:$0x30]  ;;  %51 = vmatpush.bf16.msra.mxu0 %v91_v0  ;;  %22 = vst.msk [vmem:[#allocation2 + $0x8] sm:$0xf] %vm21_vm2, %v94_v3 }
   0x3   :  { %v84_v4 = vor.u32 %v90_v2, %v83_v1  ;;  %v93_v9 = vld [vmem:[%s141_s2] ss:$0 sm:$0xff] }
   0x5   :  { %89 = vmatmul.msk.bf16.vlgmr.msra.gmra.mxu0 %vm40_vm1, %v84_v4 }
   0x8   :  { %v23_v5 = vld [vmem:[#allocation2] sm:$0xff] }
   0x9   :  { %v24_v8 = vld [vmem:[#allocation2 + $0x8] sm:$0xf] }
  0x82   :  { %v53_v6 = vpop.f32.mrf.mxu0 }
  0x83   :  { %v58_v7 = vadd.f32 %v53_v6, %v23_v5 }
  0x85   :  { %61 = vst.msk [vmem:[#allocation2] sm:$0xff] %vm19_vm0, %v58_v7 }
  0x8a   :  { %v55_v10 = vpop.f32.mrf.mxu0 }
  0x8b   :  { %v59_v11 = vadd.f32 %v55_v10, %v24_v8 }
  0x8c   :  { %v67_v12 = vld [vmem:[#allocation2] sm:$0xff] }
  0x8d   :  { %v73_v13 = vadd.f32 %v93_v9, %v67_v12  ;;  %63 = vst.msk [vmem:[#allocation2 + $0x8] sm:$0xf] %vm21_vm2, %v59_v11 }
  0x8f   :  { %75 = vst.msk [vmem:[%s142_s3] sm:$0xff] %vm19_vm0, %v73_v13 }
  0x94   :  { %v68_v14 = vld [vmem:[#allocation2 + $0x8] sm:$0xf] }
  0x95   :  { %v74_v15 = vadd.f32 %v93_v9, %v68_v14 }
  0x97   :  { %76 = vst.msk [vmem:[%s142_s3 + $0x8] sm:$0xf] %vm21_vm2, %v74_v15 }

// kernel: _lambda_.15
= control target key start
LH: loop header
LB: loop body
LE: loop exit
PB: predicated region body
PF: predicated region fallthrough
CT: control target
= control target key end

     0   :  { %vm19_vm0 = vcmask 123904   ;;  %v98_v1 = vmov 0.0   ;;  %vm31_vm1 = vcmask 130048   ;;  %s134_s1 = inlined_call_operand.vmem [shape: bf16[16,16], index: 1, kind: input, shape index: {}]   ;;  %s135_s0 = inlined_call_operand.vmem [shape: bf16[2,16], index: 0, kind: input, shape index: {}]   ;;  %s136_s2 = inlined_call_operand.vmem [shape: f32[1,16], index: 2, kind: input, shape index: {}]   ;;  %s137_s3 = inlined_call_operand.vmem [shape: f32[2,16], index: 3, kind: output, shape index: {}]  }
   0x1   :  { %v91_v0 = vld [vmem:[%s134_s1] sm:$0xff]  ;;  %20 = vst.msk [vmem:[#allocation2] sm:$0x3] %vm19_vm0, %v98_v1 }
   0x2   :  { %42 = vmatpush.bf16.msra.mxu0 %v91_v0  ;;  %v22_v2 = vld [vmem:[%s135_s0] sm:$0x1] }
   0x3   :  { %v93_v6 = vld [vmem:[%s136_s2] ss:$0 sm:$0xff] }
   0x5   :  { %89 = vmatmul.msk.bf16.vlgmr.msra.gmra.mxu0 %vm31_vm1, %v22_v2 }
   0x8   :  { %v21_v3 = vld [vmem:[#allocation2] sm:$0x3] }
  0x82   :  { %v44_v4 = vpop.f32.mrf.mxu0 }
  0x83   :  { %v48_v5 = vadd.f32 %v44_v4, %v21_v3 }
  0x85   :  { %50 = vst.msk [vmem:[#allocation2] sm:$0x3] %vm19_vm0, %v48_v5 }
  0x8a   :  { %v46_v7 = vpop.f32.mrf.mxu0 }
  0x8c   :  { %v54_v8 = vld [vmem:[#allocation2] sm:$0x3] }
  0x8d   :  { %v59_v9 = vadd.f32 %v93_v6, %v54_v8 }
  0x8f   :  { %v90_v10 = vmul.f32 -1.442695, %v59_v9 }
  0x91   :  { %94 = vpow2.f32 %v90_v10 }
  0x97   :  { %v95_v11 = vpop.eup %94 }
  0x98   :  { %v63_v12 = vadd.f32 1.0, %v95_v11 }
  0x9a   :  { %96 = vrcp.f32 %v63_v12  ;;  %v75_v16 = vand.u32 2147483648, %v63_v12  ;;  %v73_v18 = vand.u32 2147483647, %v63_v12  ;;  %vm69_vm3 = vweird.f32 %v63_v12 }
  0x9c   :  { %v76_v20 = vor.u32 1.1754944e-38, %v75_v16  ;;  %vm74_vm5 = vcmp.eq.f32.partialorder %v73_v18, 8.507059e+37 }
  0xa0   :  { %v97_v13 = vpop.eup %96 }
  0xa1   :  { %v65_v14 = vmul.f32 %v97_v13, %v63_v12  ;;  %vm70_vm2 = vweird.f32 %v97_v13 }
  0xa2   :  { %vm71_vm4 = vmor %vm69_vm3, %vm70_vm2 }
  0xa3   :  { %v66_v15 = vsub.f32 1.0, %v65_v14 }
  0xa5   :  { %v67_v17 = vmul.f32 %v97_v13, %v66_v15 }
  0xa7   :  { %v68_v19 = vadd.f32 %v97_v13, %v67_v17 }
  0xa9   :  { %v72_v21 = vsel %vm71_vm4, %v97_v13, %v68_v19 }
  0xaa   :  { %v77_v22 = vsel %vm74_vm5, %v76_v20, %v72_v21 }
  0xab   :  { %v79_v23 = vmul.f32 %v77_v22, %v59_v9 }
  0xad   :  { %80 = vst.msk [vmem:[%s137_s3] sm:$0x3] %vm19_vm0, %v79_v23 }

// kernel: _lambda_.14
= control target key start
LH: loop header
LB: loop body
LE: loop exit
PB: predicated region body
PF: predicated region fallthrough
CT: control target
= control target key end

     0   :  { %vm19_vm0 = vcmask 123904   ;;  %v111_v1 = vmov 0.0   ;;  %vm39_vm1 = vcmask 261120   ;;  %s150_s1 = inlined_call_operand.vmem [shape: bf16[32,16], index: 1, kind: input, shape index: {}]   ;;  %s151_s2 = inlined_call_operand.vmem [shape: f32[1,16], index: 2, kind: input, shape index: {}]   ;;  %s152_s0 = inlined_call_operand.vmem [shape: bf16[2,32], index: 0, kind: input, shape index: {}]   ;;  %s153_s3 = inlined_call_operand.vmem [shape: f32[2,16], index: 3, kind: output, shape index: {}]  }
   0x1   :  { %v104_v0 = vld [vmem:[%s150_s1 + $0x8] sm:$0xff]  ;;  %20 = vst.msk [vmem:[#allocation2] sm:$0x3] %vm19_vm0, %v111_v1  ;;  %v103_v2 = vld [vmem:[%s150_s1] sm:$0xff] }
   0x2   :  { %49 = vmatpush.bf16.msra.mxu0 %v104_v0  ;;  %v22_v3 = vld [vmem:[%s152_s0] sm:$0x1] }
   0x3   :  { %v106_v7 = vld [vmem:[%s151_s2] ss:$0 sm:$0xff] }
   0x6   :  { %50 = vmatpush.bf16.msra.mxu0 %v103_v2 }
   0x8   :  { %v21_v4 = vld [vmem:[#allocation2] sm:$0x3] }
   0x9   :  { %101 = vmatmul.msk.bf16.vlgmr.msra.gmra.mxu0 %vm39_vm1, %v22_v3 }
  0x86   :  { %v52_v5 = vpop.f32.mrf.mxu0 }
  0x87   :  { %v56_v6 = vadd.f32 %v52_v5, %v21_v4 }
  0x89   :  { %58 = vst.msk [vmem:[#allocation2] sm:$0x3] %vm19_vm0, %v56_v6 }
  0x8e   :  { %v54_v8 = vpop.f32.mrf.mxu0 }
  0x90   :  { %v62_v9 = vld [vmem:[#allocation2] sm:$0x3] }
  0x91   :  { %v67_v10 = vadd.f32 %v106_v7, %v62_v9 }
  0x93   :  { %v102_v11 = vmul.f32 -1.442695, %v67_v10 }
  0x95   :  { %107 = vpow2.f32 %v102_v11 }
  0x9b   :  { %v108_v12 = vpop.eup %107 }
  0x9c   :  { %v71_v13 = vadd.f32 1.0, %v108_v12 }
  0x9e   :  { %109 = vrcp.f32 %v71_v13  ;;  %v83_v17 = vand.u32 2147483648, %v71_v13  ;;  %v81_v19 = vand.u32 2147483647, %v71_v13  ;;  %vm77_vm3 = vweird.f32 %v71_v13 }
  0xa0   :  { %v84_v21 = vor.u32 1.1754944e-38, %v83_v17  ;;  %vm82_vm5 = vcmp.eq.f32.partialorder %v81_v19, 8.507059e+37 }
  0xa4   :  { %v110_v14 = vpop.eup %109 }
  0xa5   :  { %v73_v15 = vmul.f32 %v110_v14, %v71_v13  ;;  %vm78_vm2 = vweird.f32 %v110_v14 }
  0xa6   :  { %vm79_vm4 = vmor %vm77_vm3, %vm78_vm2 }
  0xa7   :  { %v74_v16 = vsub.f32 1.0, %v73_v15 }
  0xa9   :  { %v75_v18 = vmul.f32 %v110_v14, %v74_v16 }
  0xab   :  { %v76_v20 = vadd.f32 %v110_v14, %v75_v18 }
  0xad   :  { %v80_v22 = vsel %vm79_vm4, %v110_v14, %v76_v20 }
  0xae   :  { %v85_v23 = vsel %vm82_vm5, %v84_v21, %v80_v22 }
  0xaf   :  { %v87_v24 = vmul.f32 %v85_v23, %v67_v10 }
  0xb1   :  { %88 = vst.msk [vmem:[%s153_s3] sm:$0x3] %vm19_vm0, %v87_v24 }

// kernel: neg.1
= control target key start
LH: loop header
LB: loop body
LE: loop exit
PB: predicated region body
PF: predicated region fallthrough
CT: control target
= control target key end

     0   :  { %s24_s0 = inlined_call_operand.vmem [shape: f32[6,8], index: 0, kind: input, shape index: {}]   ;;  %s25_s1 = inlined_call_operand.vmem [shape: f32[6,8], index: 1, kind: output, shape index: {}]  }
   0x1   :  { %v2_v0 = vld [vmem:[%s24_s0] sm:$0x3f] }
   0x2   :  { %v5_v1 = vxor.u32 2147483648, %v2_v0 }
   0x4   :  { %7 = vst [vmem:[%s25_s1] sm:$0xff] %v5_v1 }

// kernel: _lambda_.16
= control target key start
LH: loop header
LB: loop body
LE: loop exit
PB: predicated region body
PF: predicated region fallthrough
CT: control target
= control target key end

     0   :  { %s645_s12 = smov 0   ;;  %s647_s13 = smov 0   ;;  %s718_s0 = inlined_call_operand.vmem [shape: bf16[2,16], index: 0, kind: input, shape index: {}]   ;;  %s719_s1 = inlined_call_operand.vmem [shape: bf16[16,768], index: 1, kind: input, shape index: {}]   ;;  %s720_s2 = inlined_call_operand.vmem [shape: f32[1,768], index: 2, kind: input, shape index: {}]   ;;  %s721_s3 = inlined_call_operand.vmem [shape: f32[2,768], index: 3, kind: output, shape index: {}]  }
   0x1   :  { %s649_s14 = smov 0   ;;  %s651_s15 = smov 0  }
   0x2   :  { %s653_s16 = smov 0  }
   0x3 LB: > { %s28_s17 = sadd.s32 1, %s618_s15  ;;  %p76_p1 = scmp.ne.s32.totalorder %s610_s13, %s606_s12  ;;  %s622_s16 = sphi %s653_s16, %s13_s16   ;;  %s618_s15 = sphi %s651_s15, %s725_s15   ;;  %s614_s14 = sphi %s649_s14, %s724_s14   ;;  %s610_s13 = sphi %s647_s13, %s723_s13   ;;  %s606_s12 = sphi %s645_s12, %s722_s12  }
   0x4   : > { %p30_p0 = scmp.ge.s32.totalorder %s28_s17, 2  ;;  %p77_p2 = scmp.eq.s32.totalorder %s622_s16, 0 }
   0x5   : > { %s69_s19 = sadd.s32 1, %s610_s13  ;;  %p512_p5 = scmp.ge.s32.totalorder %s622_s16, 2 }
   0x6   : > { %s727_s17 = smov (%p30_p0, %s28_s17), 0  ;;  %p78_p3 = por %p77_p2, %p76_p1 }
   0x7   : > { %s65_s18 = ssub.s32 %s618_s15, %s727_s17  ;;  %165 = sbr.rel (%p512_p5) target bundleno = 21 (0x15), region = 20 }
   0x8   : > { %p67_p4 = scmp.eq.s32.totalorder %s65_s18, 0 }
   0xa   : > { %s680_s20 = scalar_select %p67_p4, %s610_s13, %s69_s19  }
   0xc   : > { %168 = sbr.rel (!%p78_p3) target bundleno = 21 (0x15), region = 24  ;;  %s170_s21 = sand.u32 (%p78_p3), 1, %s610_s13  }
   0xd   : > { %s537_s22 = smul.u32 (%p78_p3), 12, %s618_s15 }
   0xe   : > { %s541_s23 = smul.u32 (%p78_p3), 24, %s170_s21 }
   0xf   : > { %s178_s26 = scalar_lea.vmem (%p78_p3), %s719_s1, %s537_s22 }
  0x10   : > { %v193_v0 = vld [vmem:[%s178_s26] sm:$0xff] (%p78_p3)  ;;  %v195_v1 = vld [vmem:[%s178_s26 + $0x18] sm:$0xff] (%p78_p3)  ;;  %v514_v2 = vld [vmem:[%s178_s26 + $0x8] sm:$0xf] (%p78_p3)  ;;  %s172_s27 = scalar_lea.vmem (%p78_p3), [#allocation3], %s541_s23 }
  0x11   : > { %194 = vst [vmem:[%s172_s27] sm:$0xff] %v193_v0  ;;  %v516_v3 = vld [vmem:[%s178_s26 + $0x20] sm:$0xf] }
  0x12   : > { %196 = vst [vmem:[%s172_s27 + $0xc] sm:$0xff] %v195_v1 }
  0x13   : > { %515 = vst [vmem:[%s172_s27 + $0x8] sm:$0xf] %v514_v2 }
  0x14   : > { %517 = vst [vmem:[%s172_s27 + $0x14] sm:$0xf] %v516_v3 }
  0x15 PF: > { %p518_p6 = scmp.ge.s32.totalorder %s622_s16, 1  ;;  %p221_p7 = scmp.lt.s32.totalorder %s622_s16, 3 }
  0x17   : > { %p222_p8 = pnand %p518_p6, %p221_p7 }
  0x18   : > { %s228_s28 = sand.u32 (!%p222_p8), 1, %s606_s12   ;;  %s273_s6 = smul.u32 (!%p222_p8), 3, %s614_s14 }
  0x19   : > { %225 = sbr.rel (%p222_p8) target bundleno = 185 (0xb9), region = 54 }
  0x1a   : > { %s542_s29 = smul.u32 (!%p222_p8), 24, %s228_s28  ;;  %p274_p9 = scmp.lt.s32.totalorder (!%p222_p8), %s273_s6, 5 }
  0x1c   : > { %s230_s30 = scalar_lea.vmem (!%p222_p8), [#allocation3], %s542_s29 }
  0x1e   : > { %v522_v4 = vld [vmem:[%s230_s30] sm:$0xf]  ;;  %v539_v5 = vld [vmem:[%s230_s30 + $0x8] sm:$0xf0]  ;;  %v538_v6 = vld [vmem:[%s230_s30 + $0x4] sm:$0xf] }
  0x1f   : > { %v523_v7 = vor.u32 %v539_v5, %v522_v4  ;;  %v524_v8 = vld [vmem:[%s230_s30 + $0xc] sm:$0xf0]  ;;  %v530_v9 = vld [vmem:[%s230_s30 + $0x8] sm:$0xf]  ;;  %v540_v10 = vld [vmem:[%s230_s30 + $0x10] sm:$0xf0] }
  0x20   : > { %v527_v11 = vor.u32 %v538_v6, %v524_v8  ;;  %v531_v12 = vor.u32 %v540_v10, %v530_v9  ;;  %v295_v13 = vld [vmem:[%s718_s0] sm:$0x1]  ;;  %vm316_vm0 = vcmask 130048   ;;  %v624_v14 = vmov 0.0   ;;  %s729_s6 = smov (!%p274_p9, %s273_s6), 5 }
  0x21   : > { %327 = vmatpush.bf16.msra.mxu0 %v523_v7  ;;  %293 = vst [vmem:[#allocation2] sm:$0x3f] %v624_v14  ;;  %s276_s9 = scalar_lea.vmem %s720_s2, %s729_s6  ;;  %vm364_vm1 = vcmask 1041408   ;;  %vm366_vm2 = vcmask 1043456   ;;  %s519_s10 = sshll.u32 %s729_s6, 1 }
  0x22   : > { %340 = vmatpush.bf16.msra.mxu1 %v527_v11  ;;  %353 = vmatpush.bf16.msra.mxu2 %v531_v12  ;;  %v375_v18 = vld [vmem:[%s276_s9] sm:$0x7]  ;;  %s286_s14 = scalar_lea.vmem %s721_s3, %s519_s10 }
  0x23   : > { %v378_v20 = vperm.slane %v375_v18, 1  ;;  %v379_v27 = vperm.slane %v375_v18, 2  ;;  %v377_v28 = vperm.slane %v375_v18, 0 }
  0x24   : > { %532 = vmatmul.msk.bf16.vlgmr.msra.gmra.mxu0 %vm316_vm0, %v295_v13 }
  0x25   : > { %533 = vmatmul.msk.bf16.vlgmr.msra.gmra.mxu1 %vm316_vm0, %v295_v13  ;;  %534 = vmatmul.msk.bf16.vlgmr.msra.gmra.mxu2 %vm316_vm0, %v295_v13  ;;  %v380_v29 = vrot.slane %v378_v20, 6  ;;  %v381_v31 = vrot.slane %v379_v27, 4 }
  0x27   : > { %v382_v32 = vsel %vm364_vm1, %v377_v28, %v380_v29 }
  0x28   : > { %v294_v22 = vld [vmem:[#allocation2] sm:$0x3f]  ;;  %v383_v34 = vsel %vm366_vm2, %v382_v32, %v381_v31 }
  0xa1   : > { %v329_v15 = vpop.f32.mrf.mxu0 }
  0xa2   : > { %v342_v16 = vpop.f32.mrf.mxu1 }
  0xa3   : > { %v362_v17 = vrot.slane %v342_v16, 6 }
  0xa5   : > { %v365_v19 = vsel %vm364_vm1, %v329_v15, %v362_v17 }
  0xa8   : > { %v355_v21 = vpop.f32.mrf.mxu2 }
  0xa9   : > { %v363_v23 = vrot.slane %v355_v21, 4  ;;  %v331_v24 = vpop.f32.mrf.mxu0 }
  0xaa   : > { %v344_v25 = vpop.f32.mrf.mxu1 }
  0xab   : > { %v367_v26 = vsel %vm366_vm2, %v365_v19, %v363_v23 }
  0xac   : > { %v369_v30 = vadd.f32 %v367_v26, %v294_v22 }
  0xae   : > { %370 = vst [vmem:[#allocation2] sm:$0x3f] %v369_v30 }
  0xb0   : > { %v357_v33 = vpop.f32.mrf.mxu2 }
  0xb5   : > { %v374_v35 = vld [vmem:[#allocation2] sm:$0x3f] }
  0xb6   : > { %v385_v36 = vadd.f32 %v383_v34, %v374_v35 }
  0xb8   : > { %386 = vst [vmem:[%s286_s14] sm:$0x3f] %v385_v36 }
  0xb9 PF: > { %s13_s16 = sadd.s32 1, %s622_s16   ;;  %s722_s12 = smov %s610_s13 }
  0xba   : > { %p10_p10 = scmp.ge.s32.totalorder %s13_s16, 4   ;;  %s723_s13 = smov %s680_s20 }
  0xbb   : > { %s724_s14 = smov %s618_s15  ;;  %s725_s15 = smov %s727_s17 }
  0xbc   :  { %12 = sbr.rel (!%p10_p10) target bundleno = 3 (0x3), region = 113 }

// kernel: _lambda_.19
= control target key start
LH: loop header
LB: loop body
LE: loop exit
PB: predicated region body
PF: predicated region fallthrough
CT: control target
= control target key end

     0   :  { %vm16_vm0 = vcmask 261120   ;;  %vm20_vm1 = vcmask 257024   ;;  %v96_v4 = vmov 32.0   ;;  %s141_s0 = inlined_call_operand.vmem [shape: f32[12,32], index: 0, kind: input, shape index: {}]   ;;  %s142_s1 = inlined_call_operand.vmem [shape: f32[1,32], index: 1, kind: input, shape index: {}]   ;;  %s143_s2 = inlined_call_operand.vmem [shape: f32[1,32], index: 2, kind: input, shape index: {}]   ;;  %s144_s3 = inlined_call_operand.vmem [shape: f32[12,32], index: 3, kind: output, shape index: {}]  }
   0x1   :  { %v14_v0 = vld [vmem:[%s141_s0] sm:$0xff]  ;;  %v15_v2 = vld [vmem:[%s141_s0 + $0x8] sm:$0xf]  ;;  %90 = vrcp.f32 %v96_v4 }
   0x2   :  { %v17_v1 = vsel %vm16_vm0, %v14_v0, 0.0  ;;  %v21_v3 = vsel %vm20_vm1, %v15_v2, 0.0  ;;  %v88_v35 = vld [vmem:[%s142_s1] ss:$0 sm:$0xff] }
   0x3   :  { %18 = vadd.xlane.f32.xlu0 %v17_v1  ;;  %v89_v38 = vld [vmem:[%s143_s2] ss:$0 sm:$0xff] }
   0x7   :  { %v91_v5 = vpop.eup %90 }
   0x8   :  { %v25_v6 = vmul.f32 32.0, %v91_v5  ;;  %vm29_vm2 = vweird.f32 %v91_v5 }
   0xa   :  { %v26_v7 = vsub.f32 1.0, %v25_v6 }
   0xb   :  { %22 = vadd.xlane.f32.xlu0 %v21_v3 }
   0xc   :  { %v27_v8 = vmul.f32 %v91_v5, %v26_v7 }
   0xe   :  { %v28_v9 = vadd.f32 %v91_v5, %v27_v8 }
  0x10   :  { %v30_v10 = vsel %vm29_vm2, %v91_v5, %v28_v9 }
  0x76   :  { %v19_v11 = vpop.xlane.xlu0 %18 }
  0x77   :  { %v31_v12 = vmul.f32 %v30_v10, %v19_v11 }
  0x79   :  { %v33_v13 = vsub.f32 %v14_v0, %v31_v12 }
  0x7b   :  { %v35_v14 = vmul.f32 %v33_v13, %v33_v13 }
  0x7d   :  { %v37_v15 = vsel %vm16_vm0, %v35_v14, 0.0 }
  0x7e   :  { %38 = vadd.xlane.f32.xlu1 %v37_v15  ;;  %v23_v16 = vpop.xlane.xlu0 %22 }
  0x7f   :  { %v32_v17 = vmul.f32 %v30_v10, %v23_v16 }
  0x81   :  { %v34_v18 = vsub.f32 %v15_v2, %v32_v17 }
  0x83   :  { %v36_v19 = vmul.f32 %v34_v18, %v34_v18 }
  0x85   :  { %v40_v20 = vsel %vm20_vm1, %v36_v19, 0.0 }
  0x86   :  { %41 = vadd.xlane.f32.xlu1 %v40_v20 }
  0xf1   :  { %v39_v21 = vpop.xlane.xlu1 %38 }
  0xf2   :  { %v43_v22 = vmul.f32 %v39_v21, %v30_v10 }
  0xf4   :  { %v45_v23 = vadd.f32 1e-05, %v43_v22 }
  0xf6   :  { %92 = vrsqrt.f32 %v45_v23  ;;  %vm53_vm4 = vweird.f32 %v45_v23 }
  0xf9   :  { %v42_v24 = vpop.xlane.xlu1 %41 }
  0xfa   :  { %v44_v25 = vmul.f32 %v42_v24, %v30_v10 }
  0xfc   :  { %v93_v26 = vpop.eup %92  ;;  %v46_v27 = vadd.f32 1e-05, %v44_v25 }
  0xfd   :  { %v48_v28 = vmul.f32 %v93_v26, %v45_v23  ;;  %vm54_vm3 = vweird.f32 %v93_v26 }
  0xfe   :  { %94 = vrsqrt.f32 %v46_v27  ;;  %vm55_vm5 = vmor %vm53_vm4, %vm54_vm3  ;;  %vm63_vm7 = vweird.f32 %v46_v27 }
  0xff   :  { %v49_v29 = vmul.f32 %v93_v26, %v48_v28 }
 0x101   :  { %v50_v30 = vmul.f32 0.5, %v49_v29 }
 0x103   :  { %v51_v31 = vsub.f32 1.5, %v50_v30 }
 0x104   :  { %v95_v32 = vpop.eup %94 }
 0x105   :  { %v52_v33 = vmul.f32 %v93_v26, %v51_v31  ;;  %v58_v34 = vmul.f32 %v95_v32, %v46_v27  ;;  %vm64_vm6 = vweird.f32 %v95_v32 }
 0x106   :  { %vm65_vm8 = vmor %vm63_vm7, %vm64_vm6 }
 0x107   :  { %v56_v36 = vsel %vm55_vm5, %v93_v26, %v52_v33  ;;  %v59_v37 = vmul.f32 %v95_v32, %v58_v34 }
 0x108   :  { %v67_v39 = vmul.f32 %v56_v36, %v33_v13 }
 0x109   :  { %v60_v40 = vmul.f32 0.5, %v59_v37 }
 0x10a   :  { %v73_v41 = vmul.f32 %v88_v35, %v67_v39 }
 0x10b   :  { %v61_v42 = vsub.f32 1.5, %v60_v40 }
 0x10c   :  { %v79_v43 = vadd.f32 %v89_v38, %v73_v41 }
 0x10d   :  { %v62_v44 = vmul.f32 %v95_v32, %v61_v42 }
 0x10e   :  { %81 = vst.msk [vmem:[%s144_s3] sm:$0xff] %vm16_vm0, %v79_v43 }
 0x10f   :  { %v66_v45 = vsel %vm65_vm8, %v95_v32, %v62_v44 }
 0x110   :  { %v68_v46 = vmul.f32 %v66_v45, %v34_v18 }
 0x112   :  { %v74_v47 = vmul.f32 %v88_v35, %v68_v46 }
 0x114   :  { %v80_v48 = vadd.f32 %v89_v38, %v74_v47 }
 0x116   :  { %82 = vst.msk [vmem:[%s144_s3 + $0x8] sm:$0xf] %vm20_vm1, %v80_v48 }

// kernel: _lambda_.18
= control target key start
LH: loop header
LB: loop body
LE: loop exit
PB: predicated region body
PF: predicated region fallthrough
CT: control target
= control target key end

     0   :  { %s2895_s29 = smov 0   ;;  %s2901_s30 = smov 0   ;;  %s3457_s0 = inlined_call_operand.vmem [shape: f32[2,14,32], index: 0, kind: input, shape index: {}]   ;;  %s3458_s1 = inlined_call_operand.vmem [shape: f32[2,4,6,32], index: 1, kind: input, shape index: {}]   ;;  %s3459_s2 = inlined_call_operand.vmem [shape: f32[2,4,6,32], index: 2, kind: input, shape index: {}]   ;;  %s3460_s3 = inlined_call_operand.vmem [shape: f32[14,16], index: 3, kind: input, shape index: {}]   ;;  %s3461_s4 = inlined_call_operand.vmem [shape: f32[14,16], index: 4, kind: input, shape index: {}]   ;;  %s3462_s5 = inlined_call_operand.vmem [shape: f32[4,1,32], index: 5, kind: input, shape index: {}, may-alias: {5,19}]   ;;  %s3463_s6 = inlined_call_operand.vmem [shape: f32[4,1,32], index: 6, kind: input, shape index: {}, may-alias: {6,8,10,12,18,20,24}]   ;;  %s3464_s7 = inlined_call_operand.vmem [shape: bf16[4,32,32], index: 7, kind: input, shape index: {}]   ;;  %s3465_s8 = inlined_call_operand.vmem [shape: f32[4,1,32], index: 8, kind: input, shape index: {}, may-alias: {6,8,10,12,18,20,24}]   ;;  %s3466_s9 = inlined_call_operand.vmem [shape: bf16[4,32,32], index: 9, kind: input, shape index: {}]   ;;  %s3467_s10 = inlined_call_operand.vmem [shape: f32[4,1,32], index: 10, kind: input, shape index: {}, may-alias: {6,8,10,12,18,20,24}]   ;;  %s3468_s11 = inlined_call_operand.vmem [shape: bf16[4,32,32], index: 11, kind: input, shape index: {}]   ;;  %s3469_s12 = inlined_call_operand.vmem [shape: f32[4,1,32], index: 12, kind: input, shape index: {}, may-alias: {6,8,10,12,18,20,24}]   ;;  %s3470_s13 = inlined_call_operand.vmem [shape: f32[4,1,16], index: 13, kind: input, shape index: {}, may-alias: {13,15}]   ;;  %s3471_s14 = inlined_call_operand.vmem [shape: f32[4,1,16], index: 14, kind: input, shape index: {}, may-alias: {14,16}]   ;;  %s3472_s15 = inlined_call_operand.vmem [shape: f32[4,1,16], index: 15, kind: input, shape index: {}, may-alias: {13,15}]   ;;  %s3473_s16 = inlined_call_operand.vmem [shape: f32[4,1,16], index: 16, kind: input, shape index: {}, may-alias: {14,16}]   ;;  %s3474_s17 = inlined_call_operand.vmem [shape: bf16[4,32,32], index: 17, kind: input, shape index: {}]   ;;  %s3475_s18 = inlined_call_operand.vmem [shape: f32[4,1,32], index: 18, kind: input, shape index: {}, may-alias: {6,8,10,12,18,20,24}]   ;;  %s3476_s19 = inlined_call_operand.vmem [shape: f32[4,1,32], index: 19, kind: input, shape index: {}, may-alias: {5,19}]   ;;  %s3477_s20 = inlined_call_operand.vmem [shape: f32[4,1,32], index: 20, kind: input, shape index: {}, may-alias: {6,8,10,12,18,20,24}]   ;;  %s3478_s21 = inlined_call_operand.vmem [shape: bf16[4,32,128], index: 21, kind: input, shape index: {}]   ;;  %s3479_s22 = inlined_call_operand.vmem [shape: f32[4,1,128], index: 22, kind: input, shape index: {}]   ;;  %s3480_s23 = inlined_call_operand.vmem [shape: bf16[4,128,32], index: 23, kind: input, shape index: {}]   ;;  %s3481_s24 = inlined_call_operand.vmem [shape: f32[4,1,32], index: 24, kind: input, shape index: {}, may-alias: {6,8,10,12,18,20,24}]   ;;  %s3482_s25 = inlined_call_operand.vmem [shape: f32[2,14,32], index: 25, kind: output, shape index: {}]  }
   0x1   :  { %3493 = sst [smem:[#allocation13_spill]] %s3457_s0 }
   0x2   :  { %3494 = sst [smem:[#allocation14_spill]] %s3458_s1 }
   0x3   :  { %3495 = sst [smem:[#allocation15_spill]] %s3459_s2  ;;  %s2897_s2 = smov 0  }
   0x4   :  { %3496 = sst [smem:[#allocation16_spill]] %s3460_s3 }
   0x5   :  { %3497 = sst [smem:[#allocation17_spill]] %s3461_s4 }
   0x6   :  { %3498 = sst [smem:[#allocation18_spill]] %s3462_s5 }
   0x7   :  { %3499 = sst [smem:[#allocation19_spill]] %s3463_s6  ;;  %s2899_s6 = smov 0  }
   0x8   :  { %3500 = sst [smem:[#allocation20_spill]] %s3464_s7  ;;  %s2903_s7 = smov 0  }
   0x9   :  { %3501 = sst [smem:[#allocation21_spill]] %s3465_s8 }
   0xa   :  { %3502 = sst [smem:[#allocation22_spill]] %s3466_s9 }
   0xb   :  { %3503 = sst [smem:[#allocation23_spill]] %s3467_s10 }
   0xc   :  { %3504 = sst [smem:[#allocation24_spill]] %s3468_s11 }
   0xd   :  { %3505 = sst [smem:[#allocation25_spill]] %s3474_s17 }
   0xe   :  { %3506 = sst [smem:[#allocation26_spill]] %s3475_s18 }
   0xf   :  { %3507 = sst [smem:[#allocation27_spill]] %s3476_s19 }
  0x10   :  { %3508 = sst [smem:[#allocation28_spill]] %s3478_s21 }
  0x11   :  { %3509 = sst [smem:[#allocation29_spill]] %s3479_s22 }
  0x12   :  { %3510 = sst [smem:[#allocation30_spill]] %s3480_s23 }
  0x13   :  { %3511 = sst [smem:[#allocation31_spill]] %s3481_s24 }
  0x14   :  { %3512 = sst [smem:[#allocation32_spill]] %s3482_s25 }
  0x15 LB: > { %3513 = sst [smem:[#allocation2_spill]] %s2742_s29  ;;  %s44_s3 = sadd.s32 1, %s2750_s6  ;;  %s2758_s7 = sphi %s2903_s7, %s35_s7   ;;  %s2754_s30 = sphi %s2901_s30, %s3578_s30   ;;  %s2750_s6 = sphi %s2899_s6, %s3577_s6   ;;  %s2746_s2 = sphi %s2897_s2, %s3576_s2   ;;  %s2742_s29 = sphi %s2895_s29, %s3575_s29  }
  0x16   : > { %3514 = sst [smem:[#allocation3_spill]] %s2750_s6  ;;  %s47_s26 = sadd.s32 1, %s2754_s30 }
  0x17   : > { %3515 = sst [smem:[#allocation4_spill]] %s2754_s30  ;;  %p45_p0 = scmp.ge.s32.totalorder %s44_s3, 4 }
  0x18   : > { %3516 = sst [smem:[#allocation5_spill]] %s2758_s7  ;;  %p2474_p1 = scmp.ge.s32.totalorder %s2758_s7, 1 }
  0x19   : > { %p901_p2 = scmp.lt.s32.totalorder %s2758_s7, 9  ;;  %s3580_s3 = smov (%p45_p0, %s44_s3), 0 }
  0x1a   : > { %3517 = sst [smem:[#allocation6_spill]] %s3580_s3  ;;  %s3582_s26 = smov (!%p45_p0, %s47_s26), %s2754_s30 }
  0x1b   : > { %p902_p3 = pnand %p2474_p1, %p901_p2  ;;  %p49_p4 = scmp.ge.s32.totalorder %s3582_s26, 2 }
  0x1d   : > { %s3584_s26 = smov (%p49_p4, %s3582_s26), 0  ;;  %905 = sbr.rel (%p902_p3) target bundleno = 2283 (0x8eb), region = 120 }
  0x1e   : > { %3518 = sst [smem:[#allocation7_spill]] %s3584_s26 }
  0x22   : > { %p1057_p5 = scmp.lt.s32.totalorder %s2746_s2, 1  ;;  %p1064_p6 = scmp.lt.s32.totalorder %s2742_s29, 3 }
  0x23   : > { %s3519_s9 = sld [smem:[#allocation13_spill]] }
  0x24   : > { %s3586_s2 = smov (!%p1057_p5, %s2746_s2), 1  ;;  %s3522_s23 = sld [smem:[#allocation14_spill]] }
  0x25   : > { %s2931_s1 = scalar_select %p1064_p6, %s2742_s29, 3 }
  0x26   : > { %s3489_s8 = sshll.u32 %s3586_s2, 4  ;;  %s2477_s27 = sshll.u32 %s3586_s2, 2 }
  0x27   : > { %s1067_s0 = sadd.s32 %s2477_s27, %s2931_s1  ;;  %s3524_s4 = sld [smem:[#allocation15_spill]] }
  0x28   : > { %s2478_s26 = sshll.u32 %s1067_s0, 3  ;;  %s3527_s3 = sld [smem:[#allocation20_spill]] }
  0x29   : > { %s2940_s5 = scalar_lea.vmem %s3519_s9, %s3489_s8  ;;  %s3531_s11 = sld [smem:[#allocation24_spill]] }
  0x2a   : > { %3520 = sst [smem:[#allocation8_spill]] %s2940_s5  ;;  %s2950_s24 = scalar_lea.vmem %s3522_s23, %s2478_s26 }
  0x2b   : > { %3523 = sst [smem:[#allocation9_spill]] %s2950_s24  ;;  %s2581_s5 = sshll.u32 %s2931_s1, 4 }
  0x2c   : > { %s3533_s17 = sld [smem:[#allocation25_spill]]  ;;  %s3541_s24 = sshll.u32 %s3586_s2, 4 }
  0x2d   : > { %s2955_s28 = scalar_lea.vmem %s3524_s4, %s2478_s26  ;;  %s3529_s4 = sld [smem:[#allocation22_spill]] }
  0x2e   : > { %3525 = sst [smem:[#allocation10_spill]] %s2955_s28  ;;  %s2965_s25 = scalar_lea.vmem %s3527_s3, %s2581_s5 }
  0x2f   : > { %s2983_s6 = scalar_lea.vmem %s3531_s11, %s2581_s5  ;;  %s3537_s30 = sld [smem:[#allocation28_spill]] }
  0x30   : > { %3532 = sst [smem:[#allocation11_spill]] %s2983_s6 }
  0x31   : > { %s3538_s7 = sld [smem:[#allocation29_spill]] }
  0x32   : > { %s3008_s3 = scalar_lea.vmem %s3533_s17, %s2581_s5  ;;  %s3539_s29 = sld [smem:[#allocation31_spill]] }
  0x33   : > { %s2974_s28 = scalar_lea.vmem %s3529_s4, %s2581_s5  ;;  %3534 = sst [smem:[#allocation12_spill]] %s3008_s3 }
  0x34   : > { %s2586_s3 = sshll.u32 %s2931_s1, 6  ;;  %s3540_s4 = sld [smem:[#allocation30_spill]] }
  0x35   : > { %s3025_s11 = scalar_lea.vmem %s3537_s30, %s2581_s5  ;;  %s3542_s27 = sld [smem:[#allocation32_spill]] }
  0x36   : > { %s3543_s0 = sld [smem:[#allocation2_spill]] }
  0x37   : > { %s1141_s17 = scalar_lea.vmem %s3538_s7, %s2931_s1 }
  0x38   : > { %s1149_s18 = scalar_lea.vmem %s3539_s29, %s2931_s1 }
  0x3a   : > { %s3039_s19 = scalar_lea.vmem %s3540_s4, %s2586_s3 }
  0x3b   : > { %s3046_s5 = scalar_lea.vmem %s3542_s27, %s3541_s24 }
  0x3c   : > { %p2495_p7 = scmp.ne.s32.totalorder %s3543_s0, 0 }
  0x3d   : > { %s3544_s7 = sld [smem:[#allocation8_spill]] (!%p2495_p7) }
  0x3e   : > { %1159 = sbr.rel (%p2495_p7) target bundleno = 70 (0x46), region = 124 }
  0x43   : > { %v1160_v0 = vld [vmem:[%s3544_s7] sm:$0xff]  ;;  %vm1162_vm0 = vcmask 261120   ;;  %v1161_v1 = vld [vmem:[%s3544_s7 + $0x8] sm:$0x3f]  ;;  %vm1164_vm1 = vcmask 259072  }
  0x44   : > { %1163 = vst.msk [vmem:[%s3046_s5] sm:$0xff] %vm1162_vm0, %v1160_v0 }
  0x45   : > { %1165 = vst.msk [vmem:[%s3046_s5 + $0x8] sm:$0x3f] %vm1164_vm1, %v1161_v1 }
  0x46 PF: > { %vm1196_vm2 = vcmask 261120   ;;  %vm1200_vm3 = vcmask 259072   ;;  %v2760_v6 = vmov 32.0   ;;  %s3545_s2 = sld [smem:[#allocation11_spill]]  ;;  %v2589_v25 = vld [vmem:[%s2965_s25 + $0x8] sm:$0xff]  ;;  %v2588_v29 = vld [vmem:[%s2965_s25] sm:$0xff]  ;;  %s3571_s25 = scalar_lea.vmem %s3477_s20, %s2931_s1 }
  0x47   : > { %2670 = vrcp.f32 %v2760_v6  ;;  %v2591_v26 = vld [vmem:[%s2974_s28 + $0x8] sm:$0xff]  ;;  %1295 = vmatpush.bf16.msra.mxu0 %v2589_v25  ;;  %v2590_v30 = vld [vmem:[%s2974_s28] sm:$0xff]  ;;  %s3546_s3 = sld [smem:[#allocation9_spill]]  ;;  %s2761_s7 = smov 112   ;;  %vm1840_vm11 = vcmask 1046528   ;;  %vm1397_vm12 = vcmask 130048  }
  0x48   : > { %1329 = vmatpush.bf16.msra.mxu1 %v2591_v26  ;;  %s3547_s29 = sld [smem:[#allocation18_spill]]  ;;  %s3555_s28 = scalar_lea.vmem %s3469_s12, %s2931_s1  ;;  %vm1401_vm13 = vcmask 128000  }
  0x49   : > { %s3549_s10 = sld [smem:[#allocation19_spill]]  ;;  %s2764_s23 = smov 120  }
  0x4a   : > { %s3551_s22 = sld [smem:[#allocation21_spill]] }
  0x4b   : > { %v1166_v2 = vld [vmem:[%s3046_s5] sm:$0xff]  ;;  %1296 = vmatpush.bf16.msra.mxu0 %v2588_v29  ;;  %s3553_s27 = sld [smem:[#allocation23_spill]] }
  0x4c   : > { %v1197_v3 = vsel %vm1196_vm2, %v1166_v2, 0.0  ;;  %v1167_v4 = vld [vmem:[%s3046_s5 + $0x8] sm:$0x3f]  ;;  %v2592_v31 = vld [vmem:[%s3545_s2] sm:$0xff]  ;;  %1330 = vmatpush.bf16.msra.mxu1 %v2590_v30  ;;  %s3568_s24 = sld [smem:[#allocation10_spill]] }
  0x4d   : > { %1198 = vadd.xlane.f32.xlu0 %v1197_v3  ;;  %v1201_v5 = vsel %vm1200_vm3, %v1167_v4, 0.0  ;;  %v2671_v7 = vpop.eup %2670  ;;  %v2593_v27 = vld [vmem:[%s3545_s2 + $0x8] sm:$0xff]  ;;  %v3077_v48 = vld [vmem:[%s3546_s3] sm:$0x3f]  ;;  %s3562_s3 = sld [smem:[#allocation17_spill]] }
  0x4e   : > { %v1205_v8 = vmul.f32 32.0, %v2671_v7  ;;  %vm1209_vm4 = vweird.f32 %v2671_v7  ;;  %1363 = vmatpush.bf16.msra.mxu3 %v2593_v27  ;;  %s3548_s4 = scalar_lea.vmem %s3547_s29, %s2931_s1  ;;  %v1186_v51 = vperm.slane %v3077_v48, 4  ;;  %v1187_v54 = vperm.slane %v3077_v48, 1  ;;  %s3563_s29 = sld [smem:[#allocation16_spill]] }
  0x4f   : > { %v2656_v45 = vld [vmem:[%s3548_s4] ss:$0 sm:$0xff]  ;;  %s3550_s6 = scalar_lea.vmem %s3549_s10, %s2931_s1  ;;  %v1182_v61 = vperm.slane %v3077_v48, 3  ;;  %v1183_v62 = vperm.slane %v3077_v48, 0  ;;  %s3556_s4 = scalar_lea.vmem %s3472_s15, %s2931_s1 }
  0x50   : > { %v1206_v9 = vsub.f32 1.0, %v1205_v8  ;;  %v2657_v52 = vld [vmem:[%s3550_s6] ss:$0 sm:$0xff]  ;;  %v1259_v58 = vadd.f32 1.0, %v1186_v51  ;;  %v1260_v60 = vadd.f32 1.0, %v1187_v54  ;;  %s3552_s26 = scalar_lea.vmem %s3551_s22, %s2931_s1  ;;  %s3557_s10 = scalar_lea.vmem %s3473_s16, %s2931_s1 }
  0x51   : > { %s3554_s0 = scalar_lea.vmem %s3553_s27, %s2931_s1  ;;  %s2763_s6 = smov 8  }
  0x52   : > { %v1207_v10 = vmul.f32 %v2671_v7, %v1206_v9  ;;  %1364 = vmatpush.bf16.msra.mxu3 %v2592_v31  ;;  %v2659_v6 = vld [vmem:[%s3554_s0] ss:$0 sm:$0xff]  ;;  %s3561_s27 = scalar_lea.vmem %s3471_s14, %s2931_s1  ;;  %s3566_s22 = sld [smem:[#allocation26_spill]] }
  0x54   : > { %v1208_v11 = vadd.f32 %v2671_v7, %v1207_v10 }
  0x55   : > { %1202 = vadd.xlane.f32.xlu0 %v1201_v5  ;;  %v2658_v5 = vld [vmem:[%s3552_s26] ss:$0 sm:$0xff]  ;;  %s3560_s26 = scalar_lea.vmem %s3470_s13, %s2931_s1 }
  0x56   : > { %v3057_v12 = vsel %vm1209_vm4, %v2671_v7, %v1208_v11 }
  0xc0   : > { %v1199_v13 = vpop.xlane.xlu0 %1198 }
  0xc1   : > { %v1211_v14 = vmul.f32 %v3057_v12, %v1199_v13  ;;  %v2660_v13 = vld [vmem:[%s3555_s28] ss:$0 sm:$0xff] }
  0xc3   : > { %v1213_v15 = vsub.f32 %v1166_v2, %v1211_v14 }
  0xc5   : > { %v1215_v16 = vmul.f32 %v1213_v15, %v1213_v15 }
  0xc7   : > { %v1217_v17 = vsel %vm1196_vm2, %v1215_v16, 0.0 }
  0xc8   : > { %1218 = vadd.xlane.f32.xlu1 %v1217_v17  ;;  %v1203_v18 = vpop.xlane.xlu0 %1202 }
  0xc9   : > { %v1212_v19 = vmul.f32 %v3057_v12, %v1203_v18 }
  0xcb   : > { %v1214_v20 = vsub.f32 %v1167_v4, %v1212_v19 }
  0xcd   : > { %v1216_v21 = vmul.f32 %v1214_v20, %v1214_v20 }
  0xcf   : > { %v1220_v22 = vsel %vm1200_vm3, %v1216_v21, 0.0 }
  0xd0   : > { %1221 = vadd.xlane.f32.xlu1 %v1220_v22 }
 0x13b   : > { %v1219_v23 = vpop.xlane.xlu1 %1218 }
 0x13c   : > { %v1223_v24 = vmul.f32 %v1219_v23, %v3057_v12 }
 0x13e   : > { %v1225_v28 = vadd.f32 1e-05, %v1223_v24 }
 0x140   : > { %2672 = vrsqrt.f32 %v1225_v28  ;;  %vm1233_vm6 = vweird.f32 %v1225_v28 }
 0x143   : > { %v1222_v32 = vpop.xlane.xlu1 %1221 }
 0x144   : > { %v1224_v33 = vmul.f32 %v1222_v32, %v3057_v12 }
 0x146   : > { %v2673_v34 = vpop.eup %2672  ;;  %v1226_v35 = vadd.f32 1e-05, %v1224_v33 }
 0x147   : > { %v1228_v36 = vmul.f32 %v2673_v34, %v1225_v28  ;;  %vm1234_vm5 = vweird.f32 %v2673_v34 }
 0x148   : > { %2674 = vrsqrt.f32 %v1226_v35  ;;  %vm1235_vm7 = vmor %vm1233_vm6, %vm1234_vm5  ;;  %vm1243_vm9 = vweird.f32 %v1226_v35 }
 0x149   : > { %v1229_v37 = vmul.f32 %v2673_v34, %v1228_v36 }
 0x14b   : > { %v1230_v38 = vmul.f32 0.5, %v1229_v37 }
 0x14d   : > { %v1231_v39 = vsub.f32 1.5, %v1230_v38 }
 0x14e   : > { %v2675_v40 = vpop.eup %2674 }
 0x14f   : > { %v1232_v41 = vmul.f32 %v2673_v34, %v1231_v39  ;;  %v1238_v42 = vmul.f32 %v2675_v40, %v1226_v35  ;;  %vm1244_vm8 = vweird.f32 %v2675_v40 }
 0x150   : > { %vm1245_vm10 = vmor %vm1243_vm9, %vm1244_vm8 }
 0x151   : > { %v1236_v43 = vsel %vm1235_vm7, %v2673_v34, %v1232_v41  ;;  %v1239_v44 = vmul.f32 %v2675_v40, %v1238_v42 }
 0x152   : > { %v1247_v46 = vmul.f32 %v1236_v43, %v1213_v15 }
 0x153   : > { %v1240_v47 = vmul.f32 0.5, %v1239_v44 }
 0x154   : > { %v1252_v50 = vmul.f32 %v2656_v45, %v1247_v46 }
 0x155   : > { %v1241_v49 = vsub.f32 1.5, %v1240_v47 }
 0x156   : > { %v1257_v57 = vadd.f32 %v2657_v52, %v1252_v50 }
 0x157   : > { %v1242_v53 = vmul.f32 %v2675_v40, %v1241_v49 }
 0x158   : > { %v1261_v0 = vmul.f32 %v1259_v58, %v1257_v57 }
 0x159   : > { %v1246_v55 = vsel %vm1245_vm10, %v2675_v40, %v1242_v53  ;;  %v2762_v40 = vmov 16.0  }
 0x15a   : > { %v1248_v56 = vmul.f32 %v1246_v55, %v1214_v20  ;;  %v1263_v2 = vadd.f32 %v1261_v0, %v1182_v61  ;;  %2676 = vrcp.f32 %v2762_v40 }
 0x15c   : > { %v1253_v59 = vmul.f32 %v2656_v45, %v1248_v56 }
 0x15e   : > { %v1258_v63 = vadd.f32 %v2657_v52, %v1253_v59 }
 0x160   : > { %v1262_v1 = vmul.f32 %v1260_v60, %v1258_v63  ;;  %v2677_v41 = vpop.eup %2676 }
 0x161   : > { %v1412_v42 = vmul.f32 16.0, %v2677_v41  ;;  %vm1416_vm14 = vweird.f32 %v2677_v41 }
 0x162   : > { %v1264_v3 = vadd.f32 %v1262_v1, %v1183_v62 }
 0x163   : > { %v1413_v43 = vsub.f32 1.0, %v1412_v42 }
 0x164   : > { %v1265_v4 = vpack.c.bf16 %v1264_v3, %v1263_v2 }
 0x165   : > { %v1414_v44 = vmul.f32 %v2677_v41, %v1413_v43 }
 0x166   : > { %2504 = vmatmul.msk.bf16.vlgmr.msra.gmra.mxu0 %vm1196_vm2, %v1265_v4  ;;  %2513 = vmatmul.msk.bf16.vlgmr.msra.gmra.mxu1 %vm1196_vm2, %v1265_v4 }
 0x167   : > { %2522 = vmatmul.msk.bf16.vlgmr.msra.gmra.mxu3 %vm1196_vm2, %v1265_v4  ;;  %v1415_v46 = vadd.f32 %v2677_v41, %v1414_v44 }
 0x169   : > { %v3137_v47 = vsel %vm1416_vm14, %v2677_v41, %v1415_v46 }
 0x1e3   : > { %v1298_v7 = vpop.f32.mrf.mxu0  ;;  %v1332_v8 = vpop.f32.mrf.mxu1 }
 0x1e4   : > { %v3101_v9 = vadd.f32 %v2658_v5, %v1298_v7  ;;  %v1333_v10 = vadd.f32 %v2659_v6, %v1332_v8 }
 0x1e6   : > { %1381 = vrot.lane.b32.xlu2 %v1333_v10, %s2761_s7  ;;  %1373 = vrot.lane.b32.xlu0 %v3101_v9, %s2761_s7  ;;  %v1559_v31 = vsel %vm1397_vm12, %v1333_v10, 0.0  ;;  %v1398_v34 = vsel %vm1397_vm12, %v3101_v9, 0.0 }
 0x1ea   : > { %v1366_v11 = vpop.f32.mrf.mxu3 }
 0x1eb   : > { %v1300_v14 = vpop.f32.mrf.mxu0  ;;  %v1334_v15 = vpop.f32.mrf.mxu1  ;;  %v3116_v18 = vadd.f32 %v2660_v13, %v1366_v11 }
 0x1ec   : > { %v3111_v16 = vadd.f32 %v2658_v5, %v1300_v14  ;;  %v1335_v17 = vadd.f32 %v2659_v6, %v1334_v15 }
 0x1ed   : > { %v1823_v20 = vpack.c.bf16 %v3116_v18, %v3116_v18 }
 0x1ee   : > { %1383 = vrot.lane.b32.xlu2 %v1335_v17, %s2761_s7  ;;  %1375 = vrot.lane.b32.xlu1 %v3111_v16, %s2761_s7  ;;  %v1562_v33 = vsel %vm1401_vm13, %v1335_v17, 0.0  ;;  %v1402_v39 = vsel %vm1401_vm13, %v3111_v16, 0.0 }
 0x1ef   : > { %v1834_v24 = vunpack.c.l.b16 %v1823_v20 }
 0x1f2   : > { %v1368_v19 = vpop.f32.mrf.mxu3 }
 0x1f3   : > { %v3120_v21 = vadd.f32 %v2660_v13, %v1368_v19 }
 0x1f5   : > { %v1824_v22 = vpack.c.bf16 %v3120_v21, %v3120_v21  ;;  %v2651_v23 = vpack.i.bf16 %v3120_v21, %v3116_v18 }
 0x1f7   : > { %v1835_v25 = vunpack.c.l.b16 %v1824_v22 }
 0x1f9   : > { %v1836_v26 = vpack.c.b16 %v1835_v25, %v1834_v24 }
 0x1fb   : > { %v1842_v27 = vsel %vm1840_vm11, %v1836_v26, 0 }
 0x1fc   : > { %1851 = vmatpush.bf16.msrb.mxu1 %v1842_v27 }
 0x240   : > { %v1382_v28 = vpop.permute.xlu2 %1381 }
 0x241   : > { %v1565_v29 = vsel %vm1397_vm12, %v1382_v28, 0.0 }
 0x242   : > { %1566 = vadd.xlane.f32.xlu2 %v1565_v29 }
 0x248   : > { %v1384_v30 = vpop.permute.xlu2 %1383 }
 0x249   : > { %v1568_v32 = vsel %vm1401_vm13, %v1384_v30, 0.0 }
 0x24a   : > { %1560 = vadd.xlane.f32.xlu2 %v1559_v31  ;;  %1569 = vadd.xlane.f32.xlu0 %v1568_v32 }
 0x252   : > { %1563 = vadd.xlane.f32.xlu2 %v1562_v33  ;;  %1399 = vadd.xlane.f32.xlu0 %v1398_v34 }
 0x258   : > { %v1374_v35 = vpop.permute.xlu0 %1373 }
 0x259   : > { %v1405_v36 = vsel %vm1397_vm12, %v1374_v35, 0.0 }
 0x25a   : > { %1406 = vadd.xlane.f32.xlu1 %v1405_v36 }
 0x260   : > { %v1376_v37 = vpop.permute.xlu1 %1375 }
 0x261   : > { %v1408_v38 = vsel %vm1401_vm13, %v1376_v37, 0.0 }
 0x262   : > { %1409 = vadd.xlane.f32.xlu2 %v1408_v38 }
 0x26a   : > { %1403 = vadd.xlane.f32.xlu2 %v1402_v39 }
 0x2b5   : > { %v1567_v45 = vpop.xlane.xlu2 %1566 }
 0x2b6   : > { %v1573_v0 = vmul.f32 %v1567_v45, %v3137_v47 }
 0x2b8   : > { %v3165_v6 = vsub.f32 %v1382_v28, %v1573_v0 }
 0x2bd   : > { %v1561_v49 = vpop.xlane.xlu2 %1560  ;;  %v1570_v50 = vpop.xlane.xlu0 %1569 }
 0x2be   : > { %v1571_v51 = vmul.f32 %v1561_v49, %v3137_v47  ;;  %v1574_v53 = vmul.f32 %v1570_v50, %v3137_v47 }
 0x2c0   : > { %v3140_v52 = vsub.f32 %v1333_v10, %v1571_v51  ;;  %v3145_v55 = vsub.f32 %v1384_v30, %v1574_v53  ;;  %v1581_v10 = vmul.f32 %v3165_v6, %v3165_v6 }
 0x2c2   : > { %v1579_v54 = vmul.f32 %v3140_v52, %v3140_v52  ;;  %v1582_v63 = vmul.f32 %v3145_v55, %v3145_v55  ;;  %v1589_v15 = vsel %vm1397_vm12, %v1581_v10, 0.0 }
 0x2c4   : > { %v1583_v56 = vsel %vm1397_vm12, %v1579_v54, 0.0  ;;  %v1592_v4 = vsel %vm1401_vm13, %v1582_v63, 0.0 }
 0x2c5   : > { %v1564_v57 = vpop.xlane.xlu2 %1563  ;;  %1584 = vadd.xlane.f32.xlu0 %v1583_v56  ;;  %v1400_v58 = vpop.xlane.xlu0 %1399 }
 0x2c6   : > { %v1572_v59 = vmul.f32 %v1564_v57, %v3137_v47  ;;  %v1418_v60 = vmul.f32 %v3137_v47, %v1400_v58 }
 0x2c8   : > { %v3150_v61 = vsub.f32 %v1335_v17, %v1572_v59  ;;  %v3153_v62 = vsub.f32 %v3101_v9, %v1418_v60  ;;  %v3207_v59 = vld [vmem:[%s3556_s4] ss:$0 sm:$0xff]  ;;  %s3564_s4 = smov %s3563_s29 }
 0x2ca   : > { %v1580_v1 = vmul.f32 %v3150_v61, %v3150_v61  ;;  %v1426_v2 = vmul.f32 %v3153_v62, %v3153_v62 }
 0x2cc   : > { %v1586_v3 = vsel %vm1401_vm13, %v1580_v1, 0.0  ;;  %v1430_v5 = vsel %vm1397_vm12, %v1426_v2, 0.0  ;;  %v3217_v2 = vld [vmem:[%s3557_s10] ss:$0 sm:$0xff] }
 0x2cd   : > { %1587 = vadd.xlane.f32.xlu2 %v1586_v3  ;;  %v1407_v7 = vpop.xlane.xlu1 %1406  ;;  %1593 = vadd.xlane.f32.xlu0 %v1592_v4 }
 0x2ce   : > { %v1420_v8 = vmul.f32 %v3137_v47, %v1407_v7  ;;  %1431 = vadd.xlane.f32.xlu1 %v1430_v5 }
 0x2d0   : > { %v3168_v9 = vsub.f32 %v1374_v35, %v1420_v8 }
 0x2d2   : > { %v1428_v11 = vmul.f32 %v3168_v9, %v3168_v9 }
 0x2d4   : > { %v1436_v13 = vsel %vm1397_vm12, %v1428_v11, 0.0 }
 0x2d5   : > { %v1410_v14 = vpop.xlane.xlu2 %1409  ;;  %1437 = vadd.xlane.f32.xlu2 %v1436_v13 }
 0x2d6   : > { %v1421_v17 = vmul.f32 %v3137_v47, %v1410_v14  ;;  %1590 = vadd.xlane.f32.xlu1 %v1589_v15 }
 0x2d8   : > { %v3177_v19 = vsub.f32 %v1376_v37, %v1421_v17 }
 0x2da   : > { %v1429_v20 = vmul.f32 %v3177_v19, %v3177_v19 }
 0x2dc   : > { %v1439_v22 = vsel %vm1401_vm13, %v1429_v20, 0.0 }
 0x2dd   : > { %v1404_v24 = vpop.xlane.xlu2 %1403 }
 0x2de   : > { %v1419_v25 = vmul.f32 %v3137_v47, %v1404_v24  ;;  %1440 = vadd.xlane.f32.xlu1 %v1439_v22 }
 0x2e0   : > { %v3184_v26 = vsub.f32 %v3111_v16, %v1419_v25 }
 0x2e2   : > { %v1427_v27 = vmul.f32 %v3184_v26, %v3184_v26 }
 0x2e4   : > { %v1433_v28 = vsel %vm1401_vm13, %v1427_v27, 0.0 }
 0x2e5   : > { %1434 = vadd.xlane.f32.xlu0 %v1433_v28 }
 0x338   : > { %v1585_v29 = vpop.xlane.xlu0 %1584 }
 0x339   : > { %v1595_v30 = vmul.f32 %v1585_v29, %v3137_v47 }
 0x33b   : > { %v1599_v31 = vadd.f32 1e-06, %v1595_v30 }
 0x33d   : > { %2678 = vrsqrt.f32 %v1599_v31  ;;  %vm1609_vm0 = vweird.f32 %v1599_v31 }
 0x340   : > { %v1588_v32 = vpop.xlane.xlu2 %1587  ;;  %v1594_v33 = vpop.xlane.xlu0 %1593 }
 0x341   : > { %v1596_v34 = vmul.f32 %v1588_v32, %v3137_v47  ;;  %v1432_v35 = vpop.xlane.xlu1 %1431  ;;  %v1598_v36 = vmul.f32 %v1594_v33, %v3137_v47 }
 0x342   : > { %v1442_v41 = vmul.f32 %v1432_v35, %v3137_v47 }
 0x343   : > { %v2679_v16 = vpop.eup %2678  ;;  %v1600_v37 = vadd.f32 1e-06, %v1596_v34  ;;  %v1602_v38 = vadd.f32 1e-06, %v1598_v36 }
 0x344   : > { %v1604_v39 = vmul.f32 %v2679_v16, %v1599_v31  ;;  %vm1610_vm15 = vweird.f32 %v2679_v16  ;;  %v3194_v49 = vadd.f32 1e-06, %v1442_v41 }
 0x345   : > { %2680 = vrsqrt.f32 %v1600_v37  ;;  %vm1611_vm1 = vmor %vm1609_vm0, %vm1610_vm15  ;;  %vm1619_vm5 = vweird.f32 %v1600_v37  ;;  %vm1639_vm8 = vweird.f32 %v1602_v38 }
 0x346   : > { %v1605_v40 = vmul.f32 %v2679_v16, %v1604_v39  ;;  %2682 = vrsqrt.f32 %v1602_v38 }
 0x348   : > { %v1606_v42 = vmul.f32 0.5, %v1605_v40  ;;  %v1438_v43 = vpop.xlane.xlu2 %1437 }
 0x349   : > { %v1444_v44 = vmul.f32 %v1438_v43, %v3137_v47  ;;  %v1591_v45 = vpop.xlane.xlu1 %1590 }
 0x34a   : > { %v1607_v46 = vsub.f32 1.5, %v1606_v42  ;;  %v1597_v50 = vmul.f32 %v1591_v45, %v3137_v47 }
 0x34b   : > { %v2681_v51 = vpop.eup %2680  ;;  %v3197_v53 = vadd.f32 1e-06, %v1444_v44 }
 0x34c   : > { %v1608_v54 = vmul.f32 %v2679_v16, %v1607_v46  ;;  %v1614_v56 = vmul.f32 %v2681_v51, %v1600_v37  ;;  %v3199_v57 = vadd.f32 1e-06, %v1597_v50  ;;  %v2683_v58 = vpop.eup %2682  ;;  %vm1620_vm4 = vweird.f32 %v2681_v51 }
 0x34d   : > { %2684 = vrsqrt.f32 %v3197_v53  ;;  %v1634_v0 = vmul.f32 %v2683_v58, %v1602_v38  ;;  %vm3230_vm6 = vmor %vm1619_vm5, %vm1620_vm4  ;;  %vm1640_vm7 = vweird.f32 %v2683_v58  ;;  %vm1476_vm0 = vweird.f32 %v3197_v53 }
 0x34e   : > { %v1612_v60 = vsel %vm1611_vm1, %v2679_v16, %v1608_v54  ;;  %v1615_v63 = vmul.f32 %v2681_v51, %v1614_v56  ;;  %2686 = vrsqrt.f32 %v3194_v49  ;;  %vm1641_vm9 = vmor %vm1639_vm8, %vm1640_vm7  ;;  %vm1629_vm13 = vweird.f32 %v3199_v57 }
 0x34f   : > { %2688 = vrsqrt.f32 %v3199_v57  ;;  %v1643_v1 = vmul.f32 %v1612_v60, %v3140_v52  ;;  %v1635_v4 = vmul.f32 %v2683_v58, %v1634_v0  ;;  %vm1456_vm8 = vweird.f32 %v3194_v49 }
 0x350   : > { %v1616_v3 = vmul.f32 0.5, %v1615_v63 }
 0x351   : > { %v1441_v5 = vpop.xlane.xlu1 %1440  ;;  %v1650_v7 = vmul.f32 %v3207_v59, %v1643_v1  ;;  %v1636_v10 = vmul.f32 0.5, %v1635_v4 }
 0x352   : > { %v1617_v8 = vsub.f32 1.5, %v1616_v3  ;;  %v1445_v11 = vmul.f32 %v1441_v5, %v3137_v47 }
 0x353   : > { %v3221_v13 = vpop.eup %2684  ;;  %v3224_v52 = vadd.f32 %v3217_v2, %v1650_v7  ;;  %v1637_v17 = vsub.f32 1.5, %v1636_v10 }
 0x354   : > { %v3226_v14 = vpop.eup %2686  ;;  %v1618_v15 = vmul.f32 %v2681_v51, %v1617_v8  ;;  %v1471_v20 = vmul.f32 %v3221_v13, %v3197_v53  ;;  %v1449_v25 = vadd.f32 1e-06, %v1445_v11  ;;  %vm1477_vm14 = vweird.f32 %v3221_v13 }
 0x355   : > { %v2689_v22 = vpop.eup %2688  ;;  %1677 = vrot.lane.b32.xlu0 %v3224_v52, %s2763_s6  ;;  %1665 = vrot.lane.b32.xlu1 %v3224_v52, %s2764_s23  ;;  %v1638_v28 = vmul.f32 %v2683_v58, %v1637_v17  ;;  %v1451_v31 = vmul.f32 %v3226_v14, %v3194_v49  ;;  %vm1478_vm1 = vmor %vm1476_vm0, %vm1477_vm14  ;;  %v2664_v17 = vld [vmem:[%s3561_s27] ss:$0 sm:$0xff]  ;;  %vm1773_vm0 = vcmask 113664   ;;  %s3569_s27 = sld [smem:[#allocation27_spill]] }
 0x356   : > { %v1622_v27 = vsel %vm3230_vm6, %v2681_v51, %v1618_v15  ;;  %v1472_v29 = vmul.f32 %v3221_v13, %v1471_v20  ;;  %v1624_v30 = vmul.f32 %v2689_v22, %v3199_v57  ;;  %2690 = vrsqrt.f32 %v1449_v25 }
 0x357   : > { %v1644_v35 = vmul.f32 %v1622_v27, %v3150_v61  ;;  %v1642_v36 = vsel %vm1641_vm9, %v2683_v58, %v1638_v28  ;;  %v1452_v41 = vmul.f32 %v3226_v14, %v1451_v31  ;;  %vm1630_vm10 = vweird.f32 %v2689_v22 }
 0x358   : > { %v1473_v32 = vmul.f32 0.5, %v1472_v29  ;;  %v1625_v33 = vmul.f32 %v2689_v22, %v1624_v30  ;;  %v1435_v34 = vpop.xlane.xlu0 %1434  ;;  %v1646_v44 = vmul.f32 %v1642_v36, %v3145_v55  ;;  %vm1631_vm15 = vmor %vm1629_vm13, %vm1630_vm10  ;;  %vm1486_vm5 = vweird.f32 %v1449_v25 }
 0x359   : > { %v1443_v16 = vmul.f32 %v1435_v34, %v3137_v47  ;;  %v1651_v40 = vmul.f32 %v3207_v59, %v1644_v35  ;;  %v1453_v50 = vmul.f32 0.5, %v1452_v41  ;;  %vm1457_vm6 = vweird.f32 %v3226_v14  ;;  %v1173_v35 = vld [vmem:[%s3563_s29] sm:$0xff] }
 0x35a   : > { %v1474_v37 = vsub.f32 1.5, %v1473_v32  ;;  %v1626_v39 = vmul.f32 0.5, %v1625_v33  ;;  %v1653_v54 = vmul.f32 %v3207_v59, %v1646_v44  ;;  %vm1458_vm9 = vmor %vm1456_vm8, %vm1457_vm6  ;;  %v1175_v33 = vld [vmem:[%s3562_s3] sm:$0xff] }
 0x35b   : > { %v1447_v42 = vadd.f32 1e-06, %v1443_v16  ;;  %v3249_v38 = vadd.f32 %v3217_v2, %v1651_v40  ;;  %v1454_v63 = vsub.f32 1.5, %v1453_v50  ;;  %v1176_v40 = vld [vmem:[%s3562_s3 + $0x8] sm:$0x3f]  ;;  %s3570_s0 = scalar_lea.vmem %s3569_s27, %s2931_s1 }
 0x35c   : > { %v1627_v43 = vsub.f32 1.5, %v1626_v39  ;;  %v2691_v45 = vpop.eup %2690  ;;  %v1475_v47 = vmul.f32 %v3221_v13, %v1474_v37  ;;  %v3265_v53 = vadd.f32 %v3217_v2, %v1653_v54  ;;  %v1693_v37 = vmul.f32 %v3224_v52, %v1173_v35  ;;  %v1174_v39 = vld [vmem:[%s3564_s4 + $0x8] sm:$0x3f] }
 0x35d   : > { %2692 = vrsqrt.f32 %v1447_v42  ;;  %v1481_v46 = vmul.f32 %v2691_v45, %v1449_v25  ;;  %1667 = vrot.lane.b32.xlu2 %v3249_v38, %s2764_s23  ;;  %1679 = vrot.lane.b32.xlu1 %v3249_v38, %s2763_s6  ;;  %vm1487_vm4 = vweird.f32 %v2691_v45  ;;  %vm1466_vm13 = vweird.f32 %v1447_v42 }
 0x35e   : > { %v1628_v61 = vmul.f32 %v2689_v22, %v1627_v43  ;;  %v1479_v57 = vsel %vm1478_vm1, %v3221_v13, %v1475_v47  ;;  %vm1488_vm7 = vmor %vm1486_vm5, %vm1487_vm4  ;;  %v1694_v44 = vmul.f32 %v3249_v38, %v1174_v39  ;;  %vm1777_vm1 = vcmask 111616  }
 0x35f   : > { %v1482_v51 = vmul.f32 %v2691_v45, %v1481_v46  ;;  %v1492_v5 = vmul.f32 %v1479_v57, %v3168_v9  ;;  %v2663_v9 = vld [vmem:[%s3560_s26] ss:$0 sm:$0xff]  ;;  %v1696_v57 = vmul.f32 %v3265_v53, %v1174_v39  ;;  %s3567_s26 = scalar_lea.vmem %s3566_s22, %s2931_s1 }
 0x360   : > { %v1632_v55 = vsel %vm1631_vm15, %v2689_v22, %v1628_v61  ;;  %vm1536_vm15 = vcmask 64512  }
 0x361   : > { %v1645_v56 = vmul.f32 %v1632_v55, %v3165_v6  ;;  %v1483_v58 = vmul.f32 0.5, %v1482_v51  ;;  %v1499_v10 = vmul.f32 %v2663_v9, %v1492_v5 }
 0x363   : > { %v2693_v60 = vpop.eup %2692  ;;  %v1652_v0 = vmul.f32 %v3207_v59, %v1645_v56  ;;  %v1484_v1 = vsub.f32 1.5, %v1483_v58  ;;  %v1455_v59 = vmul.f32 %v3226_v14, %v1454_v63  ;;  %v3292_v22 = vadd.f32 %v2664_v17, %v1499_v10 }
 0x364   : > { %v1461_v3 = vmul.f32 %v2693_v60, %v1447_v42  ;;  %vm1467_vm10 = vweird.f32 %v2693_v60 }
 0x365   : > { %v3268_v4 = vadd.f32 %v3217_v2, %v1652_v0  ;;  %v1485_v6 = vmul.f32 %v2691_v45, %v1484_v1  ;;  %1671 = vrot.lane.b32.xlu1 %v3265_v53, %s2764_s23  ;;  %v1459_v15 = vsel %vm1458_vm9, %v3226_v14, %v1455_v59  ;;  %vm1468_vm14 = vmor %vm1466_vm13, %vm1467_vm10 }
 0x366   : > { %v1462_v7 = vmul.f32 %v2693_v60, %v1461_v3  ;;  %v1490_v49 = vmul.f32 %v1459_v15, %v3153_v62 }
 0x367   : > { %1669 = vrot.lane.b32.xlu2 %v3268_v4, %s2764_s23  ;;  %1681 = vrot.lane.b32.xlu0 %v3268_v4, %s2763_s6  ;;  %v1489_v2 = vsel %vm1488_vm7, %v2691_v45, %v1485_v6  ;;  %v1695_v0 = vmul.f32 %v3268_v4, %v1173_v35 }
 0x368   : > { %v1463_v8 = vmul.f32 0.5, %v1462_v7  ;;  %v1493_v11 = vmul.f32 %v1489_v2, %v3177_v19  ;;  %v1497_v14 = vmul.f32 %v2663_v9, %v1490_v49 }
 0x36a   : > { %v1464_v13 = vsub.f32 1.5, %v1463_v8  ;;  %v1500_v20 = vmul.f32 %v2663_v9, %v1493_v11  ;;  %v3304_v28 = vadd.f32 %v2664_v17, %v1497_v14 }
 0x36c   : > { %v3294_v24 = vadd.f32 %v2664_v17, %v1500_v20  ;;  %v1465_v25 = vmul.f32 %v2693_v60, %v1464_v13  ;;  %v1543_v13 = vmul.f32 %v3292_v22, %v1173_v35 }
 0x36e   : > { %1518 = vrot.lane.b32.xlu1 %v3294_v24, %s2764_s23  ;;  %v1469_v19 = vsel %vm1468_vm14, %v2693_v60, %v1465_v25 }
 0x36f   : > { %1528 = vrot.lane.b32.xlu2 %v3292_v22, %s2763_s6  ;;  %1516 = vrot.lane.b32.xlu0 %v3292_v22, %s2764_s23  ;;  %v1491_v27 = vmul.f32 %v1469_v19, %v3184_v26 }
 0x371   : > { %v1498_v62 = vmul.f32 %v2663_v9, %v1491_v27  ;;  %v1544_v27 = vmul.f32 %v3294_v24, %v1174_v39 }
 0x373   : > { %v3312_v29 = vadd.f32 %v2664_v17, %v1498_v62 }
 0x376   : > { %1524 = vrot.lane.b32.xlu1 %v3304_v28, %s2763_s6 }
 0x377   : > { %1530 = vrot.lane.b32.xlu0 %v3294_v24, %s2763_s6  ;;  %1683 = vrot.lane.b32.xlu2 %v3265_v53, %s2763_s6 }
 0x37f   : > { %1512 = vrot.lane.b32.xlu2 %v3304_v28, %s2764_s23  ;;  %1514 = vrot.lane.b32.xlu0 %v3312_v29, %s2764_s23 }
 0x387   : > { %1526 = vrot.lane.b32.xlu2 %v3312_v29, %s2763_s6 }
 0x3b7   : > { %v1668_v26 = vpop.permute.xlu2 %1667 }
 0x3c1   : > { %v1670_v30 = vpop.permute.xlu2 %1669 }
 0x3c7   : > { %v1666_v31 = vpop.permute.xlu1 %1665  ;;  %v1678_v32 = vpop.permute.xlu0 %1677 }
 0x3c8   : > { %v1689_v34 = vsel %vm1536_vm15, %v1666_v31, %v1678_v32 }
 0x3c9   : > { %v1697_v36 = vmul.f32 %v1689_v34, %v1175_v33  ;;  %v1529_v16 = vpop.permute.xlu2 %1528 }
 0x3cb   : > { %v1701_v41 = vadd.f32 %v1697_v36, %v1693_v37 }
 0x3cd   : > { %v1709_v61 = vpack.c.bf16 %v1701_v41, %v1701_v41  ;;  %v1542_v41 = vmul.f32 %v3312_v29, %v1174_v39 }
 0x3cf   : > { %v1680_v42 = vpop.permute.xlu1 %1679  ;;  %v1720_v55 = vunpack.c.l.b16 %v1709_v61 }
 0x3d0   : > { %v1690_v43 = vsel %vm1536_vm15, %v1668_v26, %v1680_v42 }
 0x3d1   : > { %v1698_v45 = vmul.f32 %v1690_v43, %v1176_v40  ;;  %v1684_v50 = vpop.permute.xlu2 %1683 }
 0x3d3   : > { %v1702_v47 = vadd.f32 %v1698_v45, %v1694_v44 }
 0x3d5   : > { %v1710_v46 = vpack.c.bf16 %v1702_v47, %v1702_v47 }
 0x3d7   : > { %v1672_v52 = vpop.permute.xlu1 %1671  ;;  %v1721_v51 = vunpack.c.l.b16 %v1710_v46 }
 0x3d8   : > { %v1692_v54 = vsel %vm1536_vm15, %v1672_v52, %v1684_v50 }
 0x3d9   : > { %v1682_v56 = vpop.permute.xlu0 %1681  ;;  %v1700_v58 = vmul.f32 %v1692_v54, %v1176_v40  ;;  %v1722_v63 = vpack.c.b16 %v1721_v51, %v1720_v55  ;;  %v1513_v15 = vpop.permute.xlu2 %1512 }
 0x3da   : > { %v1691_v60 = vsel %vm1536_vm15, %v1670_v30, %v1682_v56  ;;  %v1541_v30 = vmul.f32 %v3304_v28, %v1173_v35 }
 0x3db   : > { %v1699_v38 = vmul.f32 %v1691_v60, %v1175_v33  ;;  %v1704_v1 = vadd.f32 %v1700_v58, %v1696_v57  ;;  %v1727_v3 = vsel %vm1397_vm12, %v1722_v63, 0 }
 0x3dc   : > { %1736 = vmatpush.bf16.xpose.msrb.mxu3 %v1727_v3 }
 0x3dd   : > { %v1703_v5 = vadd.f32 %v1699_v38, %v1695_v0  ;;  %v1712_v6 = vpack.c.bf16 %v1704_v1, %v1704_v1 }
 0x3df   : > { %v1711_v7 = vpack.c.bf16 %v1703_v5, %v1703_v5  ;;  %v1751_v59 = vunpack.c.l.b16 %v1712_v6 }
 0x3e0   : > { %v1519_v8 = vpop.permute.xlu1 %1518 }
 0x3e1   : > { %v1517_v9 = vpop.permute.xlu0 %1516  ;;  %v1750_v2 = vunpack.c.l.b16 %v1711_v7  ;;  %v1527_v36 = vpop.permute.xlu2 %1526 }
 0x3e2   : > { %v1539_v53 = vsel %vm1536_vm15, %v1517_v9, %v1529_v16 }
 0x3e3   : > { %v1547_v10 = vmul.f32 %v1539_v53, %v1175_v33  ;;  %v1752_v11 = vpack.c.b16 %v1751_v59, %v1750_v2 }
 0x3e5   : > { %v1757_v4 = vsel %vm1397_vm12, %v1752_v11, 0  ;;  %v1551_v17 = vadd.f32 %v1547_v10, %v1543_v13 }
 0x3e6   : > { %1766 = vmatpush.bf16.xpose.msrb.mxu0 %v1757_v4 }
 0x3e7   : > { %v1555_v19 = vmul.f32 0.25, %v1551_v17 }
 0x3e8   : > { %v1525_v25 = vpop.permute.xlu1 %1524 }
 0x3e9   : > { %v1531_v20 = vpop.permute.xlu0 %1530  ;;  %v1537_v14 = vsel %vm1536_vm15, %v1513_v15, %v1525_v25  ;;  %v1707_v22 = vpack.c.bf16 %v1555_v19, %v1555_v19 }
 0x3ea   : > { %v1540_v49 = vsel %vm1536_vm15, %v1519_v8, %v1531_v20  ;;  %v1545_v26 = vmul.f32 %v1537_v14, %v1175_v33 }
 0x3eb   : > { %v1548_v62 = vmul.f32 %v1540_v49, %v1176_v40  ;;  %v1745_v43 = vunpack.c.l.b16 %v1707_v22 }
 0x3ec   : > { %v1549_v32 = vadd.f32 %v1545_v26, %v1541_v30 }
 0x3ed   : > { %v1552_v31 = vadd.f32 %v1548_v62, %v1544_v27 }
 0x3ee   : > { %v1553_v44 = vmul.f32 0.25, %v1549_v32 }
 0x3ef   : > { %v1556_v34 = vmul.f32 0.25, %v1552_v31 }
 0x3f0   : > { %v1705_v33 = vpack.c.bf16 %v1553_v44, %v1553_v44 }
 0x3f1   : > { %v1708_v16 = vpack.c.bf16 %v1556_v34, %v1556_v34  ;;  %v1515_v37 = vpop.permute.xlu0 %1514 }
 0x3f2   : > { %v1538_v42 = vsel %vm1536_vm15, %v1515_v37, %v1527_v36  ;;  %v1715_v35 = vunpack.c.l.b16 %v1705_v33 }
 0x3f3   : > { %v1746_v45 = vunpack.c.l.b16 %v1708_v16  ;;  %v1546_v47 = vmul.f32 %v1538_v42, %v1176_v40 }
 0x3f5   : > { %v1550_v24 = vadd.f32 %v1546_v47, %v1542_v41  ;;  %v1747_v61 = vpack.c.b16 %v1746_v45, %v1745_v43 }
 0x3f7   : > { %v1554_v46 = vmul.f32 0.25, %v1550_v24  ;;  %2524 = vmatmul.msk.bf16.vlgmr.msrb.gmra.mxu0 %vm1397_vm12, %v1747_v61 }
 0x3f9   : > { %v1706_v28 = vpack.c.bf16 %v1554_v46, %v1554_v46 }
 0x3fb   : > { %v1716_v50 = vunpack.c.l.b16 %v1706_v28 }
 0x3fd   : > { %v1717_v52 = vpack.c.b16 %v1716_v50, %v1715_v35 }
 0x3ff   : > { %2523 = vmatmul.msk.bf16.vlgmr.msrb.gmra.mxu3 %vm1397_vm12, %v1717_v52 }
 0x474   : > { %v1768_v29 = vpop.f32.mrf.mxu0 }
 0x475   : > { %v1781_v39 = vsel %vm1773_vm0, %v1768_v29, -inf }
 0x476   : > { %1782 = vmax.xlane.f32.xlu0 %v1781_v39 }
 0x47c   : > { %v1770_v55 = vpop.f32.mrf.mxu0 }
 0x47d   : > { %v1784_v40 = vsel %vm1777_vm1, %v1770_v55, -inf }
 0x47e   : > { %1785 = vmax.xlane.f32.xlu1 %v1784_v40 }
 0x482   : > { %v1738_v51 = vpop.f32.mrf.mxu3 }
 0x483   : > { %v1774_v54 = vsel %vm1773_vm0, %v1738_v51, -inf }
 0x484   : > { %1775 = vmax.xlane.f32.xlu2 %v1774_v54 }
 0x48a   : > { %v1740_v56 = vpop.f32.mrf.mxu3 }
 0x48b   : > { %v1778_v57 = vsel %vm1777_vm1, %v1740_v56, -inf }
 0x48c   : > { %1779 = vmax.xlane.f32.xlu0 %v1778_v57 }
 0x4a0   : > { %2652 = vrot.lane.b32.xlu0 %v2651_v23, %s2761_s7  ;;  %s3565_s7 = sld [smem:[#allocation12_spill]] }
 0x4a6   : > { %v2595_v62 = vld [vmem:[%s3565_s7 + $0x8] sm:$0xff]  ;;  %v2594_v50 = vld [vmem:[%s3565_s7] sm:$0xff] }
 0x4a7   : > { %1910 = vmatpush.bf16.msra.mxu3 %v2595_v62  ;;  %1933 = vmatpush.bf16.msra.mxu0 %v2594_v50 }
 0x4e9   : > { %v1783_v58 = vpop.xlane.xlu0 %1782 }
 0x4ea   : > { %v1789_v60 = vsub.f32 %v1768_v29, %v1783_v58  ;;  %v1190_v58 = vperm.slane %v3077_v48, 5 }
 0x4ec   : > { %v1795_v63 = vmul.f32 1.442695, %v1789_v60 }
 0x4ee   : > { %2694 = vpow2.f32 %v1795_v63 }
 0x4f1   : > { %v1786_v0 = vpop.xlane.xlu1 %1785 }
 0x4f2   : > { %v1790_v38 = vsub.f32 %v1770_v55, %v1786_v0 }
 0x4f4   : > { %v2695_v1 = vpop.eup %2694  ;;  %v1797_v3 = vmul.f32 1.442695, %v1790_v38  ;;  %v2718_v38 = vld [vmem:[%s3046_s5] sm:$0xff] }
 0x4f5   : > { %v1805_v5 = vsel %vm1773_vm0, %v2695_v1, 0.0 }
 0x4f6   : > { %2696 = vpow2.f32 %v1797_v3  ;;  %1806 = vadd.xlane.f32.xlu1 %v1805_v5 }
 0x4f7   : > { %v1776_v6 = vpop.xlane.xlu2 %1775 }
 0x4f8   : > { %v1787_v7 = vsub.f32 %v1738_v51, %v1776_v6  ;;  %v1191_v6 = vperm.slane %v3077_v48, 2 }
 0x4fa   : > { %v1791_v59 = vmul.f32 1.442695, %v1787_v7 }
 0x4fc   : > { %v2697_v9 = vpop.eup %2696  ;;  %2698 = vpow2.f32 %v1791_v59 }
 0x4fd   : > { %v1808_v18 = vsel %vm1777_vm1, %v2697_v9, 0.0 }
 0x4fe   : > { %1809 = vadd.xlane.f32.xlu2 %v1808_v18 }
 0x4ff   : > { %v1780_v21 = vpop.xlane.xlu0 %1779 }
 0x500   : > { %v1788_v23 = vsub.f32 %v1740_v56, %v1780_v21  ;;  %v2665_v56 = vld [vmem:[%s3567_s26] ss:$0 sm:$0xff]  ;;  %v2719_v21 = vld [vmem:[%s3046_s5 + $0x8] sm:$0x3f] }
 0x502   : > { %v2699_v2 = vpop.eup %2698  ;;  %v1793_v8 = vmul.f32 1.442695, %v1788_v23 }
 0x503   : > { %v1799_v53 = vsel %vm1773_vm0, %v2699_v2, 0.0 }
 0x504   : > { %2700 = vpow2.f32 %v1793_v8  ;;  %1800 = vadd.xlane.f32.xlu1 %v1799_v53 }
 0x50a   : > { %v2701_v10 = vpop.eup %2700 }
 0x50b   : > { %v1802_v11 = vsel %vm1777_vm1, %v2701_v10, 0.0 }
 0x50c   : > { %1803 = vadd.xlane.f32.xlu2 %v1802_v11 }
 0x512   : > { %v2653_v13 = vpop.permute.xlu0 %2652 }
 0x513   : > { %v2655_v4 = vunpack.i.h.bf16 %v2653_v13  ;;  %v2654_v15 = vunpack.i.l.bf16 %v2653_v13 }
 0x515   : > { %v1826_v17 = vpack.c.bf16 %v2655_v4, %v2655_v4  ;;  %v1825_v20 = vpack.c.bf16 %v2654_v15, %v2654_v15 }
 0x517   : > { %v1866_v25 = vunpack.c.l.b16 %v1826_v17  ;;  %v1865_v49 = vunpack.c.l.b16 %v1825_v20 }
 0x519   : > { %v1867_v19 = vpack.c.b16 %v1866_v25, %v1865_v49 }
 0x51b   : > { %v1872_v14 = vsel %vm1840_vm11, %v1867_v19, 0 }
 0x51c   : > { %1881 = vmatpush.bf16.msra.mxu2 %v1872_v14  ;;  %v2597_v14 = vld [vmem:[%s3025_s11 + $0x8] sm:$0xff] }
 0x51d   : > { %2055 = vmatpush.bf16.msra.mxu1 %v2597_v14 }
 0x569   : > { %v1807_v27 = vpop.xlane.xlu1 %1806 }
 0x56a   : > { %2702 = vrcp.f32 %v1807_v27  ;;  %v2596_v27 = vld [vmem:[%s3025_s11] sm:$0xff] }
 0x56b   : > { %2056 = vmatpush.bf16.msra.mxu1 %v2596_v27 }
 0x570   : > { %v2703_v30 = vpop.eup %2702 }
 0x571   : > { %v1810_v26 = vpop.xlane.xlu2 %1809  ;;  %v1817_v31 = vmul.f32 %v2703_v30, %v2695_v1 }
 0x572   : > { %2704 = vrcp.f32 %v1810_v26 }
 0x573   : > { %v1821_v36 = vpack.c.bf16 %v1817_v31, %v1817_v31 }
 0x575   : > { %v1860_v37 = vunpack.c.l.b16 %v1821_v36 }
 0x577   : > { %v1801_v22 = vpop.xlane.xlu1 %1800 }
 0x578   : > { %v2705_v32 = vpop.eup %2704  ;;  %2706 = vrcp.f32 %v1801_v22 }
 0x579   : > { %v1818_v34 = vmul.f32 %v2705_v32, %v2697_v9 }
 0x57b   : > { %v1822_v16 = vpack.c.bf16 %v1818_v34, %v1818_v34 }
 0x57d   : > { %v1861_v41 = vunpack.c.l.b16 %v1822_v16 }
 0x57e   : > { %v2707_v44 = vpop.eup %2706 }
 0x57f   : > { %v1804_v42 = vpop.xlane.xlu2 %1803  ;;  %v1862_v43 = vpack.c.b16 %v1861_v41, %v1860_v37  ;;  %v1815_v45 = vmul.f32 %v2707_v44, %v2699_v2 }
 0x580   : > { %2708 = vrcp.f32 %v1804_v42 }
 0x581   : > { %2526 = vmatmul.msk.bf16.vlgmr.msra.gmra.mxu2 %vm1773_vm0, %v1862_v43  ;;  %v1819_v24 = vpack.c.bf16 %v1815_v45, %v1815_v45  ;;  %v3404_v45 = vld [vmem:[%s3568_s24] sm:$0x3f] }
 0x583   : > { %v1829_v46 = vunpack.c.l.b16 %v1819_v24 }
 0x586   : > { %v2709_v47 = vpop.eup %2708 }
 0x587   : > { %v1816_v61 = vmul.f32 %v2709_v47, %v2701_v10 }
 0x589   : > { %v1820_v33 = vpack.c.bf16 %v1816_v61, %v1816_v61  ;;  %v1955_v61 = vperm.slane %v3404_v45, 4 }
 0x58b   : > { %v1830_v28 = vunpack.c.l.b16 %v1820_v33  ;;  %v2667_v33 = vld [vmem:[%s3571_s25] ss:$0 sm:$0xff] }
 0x58d   : > { %v1831_v35 = vpack.c.b16 %v1830_v28, %v1829_v46 }
 0x58f   : > { %2525 = vmatmul.msk.bf16.vlgmr.msrb.gmra.mxu1 %vm1773_vm0, %v1831_v35  ;;  %v1956_v35 = vperm.slane %v3404_v45, 1 }
 0x604   : > { %v1883_v52 = vpop.f32.mrf.mxu2 }
 0x60c   : > { %v1853_v29 = vpop.f32.mrf.mxu1  ;;  %v1885_v39 = vpop.f32.mrf.mxu2 }
 0x60d   : > { %v1891_v55 = vpack.c.bf16 %v1885_v39, %v1883_v52  ;;  %v2019_v52 = vadd.f32 1.0, %v1955_v61 }
 0x60f   : > { %2531 = vmatmul.msk.bf16.vlgmr.msra.gmra.mxu3 %vm1397_vm12, %v1891_v55  ;;  %v2020_v55 = vadd.f32 1.0, %v1956_v35 }
 0x614   : > { %v1855_v40 = vpop.f32.mrf.mxu1 }
 0x615   : > { %v1888_v51 = vpack.c.bf16 %v1855_v40, %v1853_v29 }
 0x617   : > { %2536 = vmatmul.msk.bf16.vlgmr.msra.gmra.mxu0 %vm1397_vm12, %v1888_v51 }
 0x692   : > { %v1912_v54 = vpop.f32.mrf.mxu3 }
 0x694   : > { %v1935_v57 = vpop.f32.mrf.mxu0 }
 0x695   : > { %v1936_v60 = vadd.f32 %v1935_v57, %v1912_v54  ;;  %v1952_v57 = vperm.slane %v3404_v45, 0 }
 0x697   : > { %v1944_v63 = vadd.f32 %v2665_v56, %v1936_v60 }
 0x699   : > { %v1946_v0 = vmul.f32 %v1944_v63, %v1190_v58 }
 0x69a   : > { %v1914_v3 = vpop.f32.mrf.mxu3 }
 0x69b   : > { %v3378_v1 = vadd.f32 %v2718_v38, %v1946_v0  ;;  %v2605_v38 = vld [vmem:[%s3039_s19 + $0x38] sm:$0xff] }
 0x69c   : > { %v1937_v5 = vpop.f32.mrf.mxu0  ;;  %2150 = vmatpush.bf16.msrb.mxu2 %v2605_v38 }
 0x69d   : > { %v1938_v7 = vadd.f32 %v1937_v5, %v1914_v3  ;;  %v1965_v59 = vsel %vm1196_vm2, %v3378_v1, 0.0  ;;  %v2604_v3 = vld [vmem:[%s3039_s19 + $0x30] sm:$0xff]  ;;  %v2603_v5 = vld [vmem:[%s3039_s19 + $0x28] sm:$0xff] }
 0x69e   : > { %1966 = vadd.xlane.f32.xlu1 %v1965_v59  ;;  %v2600_v59 = vld [vmem:[%s3039_s19 + $0x10] sm:$0xff] }
 0x69f   : > { %v1945_v9 = vadd.f32 %v2665_v56, %v1938_v7  ;;  %v1951_v56 = vperm.slane %v3404_v45, 3  ;;  %v2601_v7 = vld [vmem:[%s3039_s19 + $0x18] sm:$0xff] }
 0x6a0   : > { %2151 = vmatpush.bf16.msrb.mxu2 %v2604_v3 }
 0x6a1   : > { %v1947_v18 = vmul.f32 %v1945_v9, %v1191_v6  ;;  %v2602_v6 = vld [vmem:[%s3039_s19 + $0x20] sm:$0xff]  ;;  %v2599_v9 = vld [vmem:[%s3039_s19 + $0x8] sm:$0xff] }
 0x6a3   : > { %v3384_v23 = vadd.f32 %v2719_v21, %v1947_v18  ;;  %v2668_v18 = vld [vmem:[%s1141_s17] ss:$0 sm:$0xff] }
 0x6a4   : > { %2152 = vmatpush.bf16.msrb.mxu2 %v2603_v5  ;;  %v2598_v21 = vld [vmem:[%s3039_s19] sm:$0xff] }
 0x6a5   : > { %v1968_v2 = vsel %vm1200_vm3, %v3384_v23, 0.0 }
 0x6a6   : > { %1969 = vadd.xlane.f32.xlu2 %v1968_v2 }
 0x6a8   : > { %2153 = vmatpush.bf16.msrb.mxu2 %v2602_v6 }
 0x6ac   : > { %2154 = vmatpush.bf16.msrb.mxu2 %v2601_v7 }
 0x6b0   : > { %2155 = vmatpush.bf16.msrb.mxu2 %v2600_v59 }
 0x6b4   : > { %2156 = vmatpush.bf16.msrb.mxu2 %v2599_v9 }
 0x6b8   : > { %2157 = vmatpush.bf16.msrb.mxu2 %v2598_v21 }
 0x711   : > { %v1967_v8 = vpop.xlane.xlu1 %1966 }
 0x712   : > { %v1971_v53 = vmul.f32 %v1967_v8, %v3057_v12 }
 0x714   : > { %v1973_v48 = vsub.f32 %v3378_v1, %v1971_v53 }
 0x716   : > { %v1975_v10 = vmul.f32 %v1973_v48, %v1973_v48 }
 0x718   : > { %v1977_v11 = vsel %vm1196_vm2, %v1975_v10, 0.0 }
 0x719   : > { %1978 = vadd.xlane.f32.xlu1 %v1977_v11  ;;  %v1970_v13 = vpop.xlane.xlu2 %1969 }
 0x71a   : > { %v1972_v4 = vmul.f32 %v1970_v13, %v3057_v12 }
 0x71c   : > { %v1974_v15 = vsub.f32 %v3384_v23, %v1972_v4 }
 0x71e   : > { %v1976_v17 = vmul.f32 %v1974_v15, %v1974_v15 }
 0x720   : > { %v1980_v20 = vsel %vm1200_vm3, %v1976_v17, 0.0 }
 0x721   : > { %1981 = vadd.xlane.f32.xlu0 %v1980_v20 }
 0x78c   : > { %v1979_v25 = vpop.xlane.xlu1 %1978 }
 0x78d   : > { %v1983_v49 = vmul.f32 %v1979_v25, %v3057_v12 }
 0x78f   : > { %v1985_v19 = vadd.f32 1e-05, %v1983_v49 }
 0x791   : > { %2710 = vrsqrt.f32 %v1985_v19  ;;  %vm1993_vm12 = vweird.f32 %v1985_v19 }
 0x794   : > { %v1982_v62 = vpop.xlane.xlu0 %1981 }
 0x795   : > { %v1984_v26 = vmul.f32 %v1982_v62, %v3057_v12  ;;  %v2666_v12 = vld [vmem:[%s3570_s0] ss:$0 sm:$0xff] }
 0x797   : > { %v2711_v30 = vpop.eup %2710  ;;  %v1986_v31 = vadd.f32 1e-05, %v1984_v26 }
 0x798   : > { %v1988_v22 = vmul.f32 %v2711_v30, %v1985_v19  ;;  %vm1994_vm11 = vweird.f32 %v2711_v30 }
 0x799   : > { %2712 = vrsqrt.f32 %v1986_v31  ;;  %vm1995_vm4 = vmor %vm1993_vm12, %vm1994_vm11  ;;  %vm2003_vm6 = vweird.f32 %v1986_v31 }
 0x79a   : > { %v1989_v32 = vmul.f32 %v2711_v30, %v1988_v22 }
 0x79c   : > { %v1990_v34 = vmul.f32 0.5, %v1989_v32 }
 0x79e   : > { %v1991_v36 = vsub.f32 1.5, %v1990_v34 }
 0x79f   : > { %v2713_v16 = vpop.eup %2712 }
 0x7a0   : > { %v1992_v37 = vmul.f32 %v2711_v30, %v1991_v36  ;;  %v1998_v41 = vmul.f32 %v2713_v16, %v1986_v31  ;;  %vm2004_vm5 = vweird.f32 %v2713_v16  ;;  %v2669_v36 = vld [vmem:[%s1149_s18] ss:$0 sm:$0xff] }
 0x7a1   : > { %vm2005_vm7 = vmor %vm2003_vm6, %vm2004_vm5 }
 0x7a2   : > { %v1996_v42 = vsel %vm1995_vm4, %v2711_v30, %v1992_v37  ;;  %v1999_v43 = vmul.f32 %v2713_v16, %v1998_v41 }
 0x7a3   : > { %v2007_v44 = vmul.f32 %v1996_v42, %v1973_v48 }
 0x7a4   : > { %v2000_v47 = vmul.f32 0.5, %v1999_v43 }
 0x7a5   : > { %v2012_v46 = vmul.f32 %v2666_v12, %v2007_v44 }
 0x7a6   : > { %v2001_v24 = vsub.f32 1.5, %v2000_v47 }
 0x7a7   : > { %v2017_v29 = vadd.f32 %v2667_v33, %v2012_v46 }
 0x7a8   : > { %v2002_v28 = vmul.f32 %v2713_v16, %v2001_v24 }
 0x7a9   : > { %v2021_v51 = vmul.f32 %v2019_v52, %v2017_v29 }
 0x7aa   : > { %v2006_v50 = vsel %vm2005_vm7, %v2713_v16, %v2002_v28  ;;  %v1959_v16 = vperm.slane %v3404_v45, 5 }
 0x7ab   : > { %v2008_v39 = vmul.f32 %v2006_v50, %v1974_v15  ;;  %v2023_v60 = vadd.f32 %v2021_v51, %v1951_v56 }
 0x7ad   : > { %v2013_v40 = vmul.f32 %v2666_v12, %v2008_v39  ;;  %v1960_v12 = vperm.slane %v3404_v45, 2 }
 0x7af   : > { %v2018_v54 = vadd.f32 %v2667_v33, %v2013_v40 }
 0x7b1   : > { %v2022_v58 = vmul.f32 %v2020_v55, %v2018_v54 }
 0x7b3   : > { %v2024_v63 = vadd.f32 %v2022_v58, %v1952_v57 }
 0x7b5   : > { %v2025_v0 = vpack.c.bf16 %v2024_v63, %v2023_v60 }
 0x7b7   : > { %2545 = vmatmul.msk.bf16.vlgmr.msra.gmra.mxu1 %vm1196_vm2, %v2025_v0 }
 0x834   : > { %v2058_v2 = vpop.f32.mrf.mxu1 }
 0x835   : > { %v2059_v8 = vadd.f32 %v2668_v18, %v2058_v2 }
 0x837   : > { %v2063_v53 = vmul.f32 %v2059_v8, %v2059_v8 }
 0x839   : > { %v2065_v48 = vmul.f32 %v2063_v53, %v2059_v8 }
 0x83b   : > { %v2067_v10 = vmul.f32 0.044715, %v2065_v48 }
 0x83c   : > { %v2060_v11 = vpop.f32.mrf.mxu1 }
 0x83d   : > { %v2069_v13 = vadd.f32 %v2067_v10, %v2059_v8  ;;  %v2061_v4 = vadd.f32 %v2668_v18, %v2060_v11 }
 0x83f   : > { %v2071_v15 = vmul.f32 0.7978846, %v2069_v13  ;;  %v2064_v17 = vmul.f32 %v2061_v4, %v2061_v4 }
 0x841   : > { %v2066_v20 = vmul.f32 %v2064_v17, %v2061_v4  ;;  %2714 = vtanh.f32 %v2071_v15 }
 0x843   : > { %v2068_v25 = vmul.f32 0.044715, %v2066_v20 }
 0x845   : > { %v2070_v49 = vadd.f32 %v2068_v25, %v2061_v4 }
 0x847   : > { %v2072_v19 = vmul.f32 0.7978846, %v2070_v49  ;;  %v2715_v14 = vpop.eup %2714 }
 0x848   : > { %v2075_v27 = vadd.f32 1.0, %v2715_v14 }
 0x849   : > { %2716 = vtanh.f32 %v2072_v19 }
 0x84a   : > { %v2077_v30 = vmul.f32 0.5, %v2075_v27 }
 0x84c   : > { %v2079_v22 = vmul.f32 %v2077_v30, %v2059_v8 }
 0x84f   : > { %v2717_v62 = vpop.eup %2716 }
 0x850   : > { %v2076_v26 = vadd.f32 1.0, %v2717_v62 }
 0x852   : > { %v2078_v31 = vmul.f32 0.5, %v2076_v26 }
 0x854   : > { %v2080_v32 = vmul.f32 %v2078_v31, %v2061_v4 }
 0x856   : > { %v2081_v34 = vpack.c.bf16 %v2080_v32, %v2079_v22 }
 0x858   : > { %2158 = vmatmul.bf16.vlgmr.msrb.gmra.mxu2 %v2081_v34 }
 0x8db   : > { %v2159_v37 = vpop.f32.mrf.mxu2 }
 0x8dc   : > { %v2160_v41 = vadd.f32 %v2669_v36, %v2159_v37 }
 0x8de   : > { %v2164_v42 = vmul.f32 %v2160_v41, %v1959_v16 }
 0x8e0   : > { %v2166_v43 = vadd.f32 %v2164_v42, %v3378_v1 }
 0x8e2   : > { %2168 = vst.msk [vmem:[%s3046_s5] sm:$0xff] %vm1196_vm2, %v2166_v43 }
 0x8e3   : > { %v2161_v44 = vpop.f32.mrf.mxu2 }
 0x8e4   : > { %v2162_v47 = vadd.f32 %v2669_v36, %v2161_v44 }
 0x8e6   : > { %v2165_v24 = vmul.f32 %v2162_v47, %v1960_v12 }
 0x8e8   : > { %v2167_v61 = vadd.f32 %v2165_v24, %v3384_v23 }
 0x8ea   : > { %2169 = vst.msk [vmem:[%s3046_s5 + $0x8] sm:$0x3f] %vm1200_vm3, %v2167_v61 }
 0x8eb PF: > { %s3574_s18 = sld [smem:[#allocation5_spill]] }
 0x8ec   : > { %s3575_s29 = sld [smem:[#allocation3_spill]] }
 0x8ed   : > { %s3576_s2 = sld [smem:[#allocation4_spill]] }
 0x8ee   : > { %s3577_s6 = sld [smem:[#allocation6_spill]] }
 0x8ef   : > { %s3578_s30 = sld [smem:[#allocation7_spill]] }
 0x8f1   : > { %s35_s7 = sadd.s32 1, %s3574_s18  }
 0x8f2   : > { %p32_p8 = scmp.ge.s32.totalorder %s35_s7, 10  }
 0x8f4   :  { %34 = sbr.rel (!%p32_p8) target bundleno = 21 (0x15), region = 220 }

</bundles_post_ra>
